<compile_context>
chip_gen: v7x
topology: tpu7x:2x2x1
jax: 0.10.0
libtpu: 0.0.40
codegen_flags: <defaults>
</compile_context>

<pallas_src>
import functools

import jax
import jax.numpy as jnp
import numpy as np
from jax import lax
from jax.experimental import pallas as pl
from jax.experimental.pallas import tpu as pltpu

_BN_EPS = 1e-5


@functools.lru_cache(maxsize=None)
def _vmem_limit_bytes():
    """Generation-aware VMEM limit (v5e/v6e: 128 MiB physical, v7x: 64 MiB)."""
    cap = 64 * 1024 * 1024
    try:
        info = pltpu.get_tpu_info()
        cap = int(getattr(info, "vmem_capacity_bytes", cap))
    except Exception:
        pass
    return int(max(16 * 1024 * 1024, min(48 * 1024 * 1024, (3 * cap) // 4)))


# ----------------------------------------------------------------------------
# Fused layer kernel: in-kernel zero pad -> K-folded im2col patch -> single
# bf16 MXU matmul (f32 accum) -> train-mode BatchNorm (one pass) -> ReLU.
# ----------------------------------------------------------------------------
def _conv3x3_bn_relu_kernel(x_ref, w_ref, g_ref, b_ref, o_ref, *,
                            n, h, w, cin, cout):
    # x_ref: (n, h, w, cin)      un-padded NHWC activation, f32
    # w_ref: (9*cin, cout)       conv taps, (kh, kw, cin) row-major, bf16
    # g_ref: (1, cout)           BN gamma, f32
    # b_ref: (1, cout)           BN beta,  f32
    # o_ref: (n*h*w, cout)       BN+ReLU output, f32
    f32 = jnp.float32

    # --- zero padding (pad=1 per side) fused into the kernel ----------------
    x = x_ref[...]                                             # (n, h, w, cin)
    zr = jnp.zeros((n, 1, w, cin), f32)
    xp = jnp.concatenate([zr, x, zr], axis=1)                  # (n, h+2, w, cin)
    zc = jnp.zeros((n, h + 2, 1, cin), f32)
    xp = jnp.concatenate([zc, xp, zc], axis=2)                 # (n, h+2, w+2, cin)

    # --- K-concatenated patch: 9 shifted windows folded into the contraction
    #     dim (one matmul, accumulation happens inside the MXU).  Built in
    #     f32 (safer relayouts); cast to bf16 only for the MXU operands.
    taps = []
    for kh in range(3):
        for kw in range(3):
            taps.append(xp[:, kh:kh + h, kw:kw + w, :])        # (n, h, w, cin)
    patch = jnp.concatenate(taps, axis=3)                      # (n, h, w, 9*cin)
    patch = patch.reshape(n * h * w, 9 * cin)                  # (M, 9*cin)

    conv = jnp.dot(patch.astype(jnp.bfloat16), w_ref[...],
                   preferred_element_type=jnp.float32)         # (M, cout) f32

    # --- train-mode BatchNorm over all (N, H, W) positions, one pass, on the
    #     in-register conv result (no o_ref re-read), fused ReLU.  Conv bias
    #     is never added: the mean subtraction cancels it exactly.
    inv_m = 1.0 / float(n * h * w)
    mean = jnp.sum(conv, axis=0, keepdims=True) * inv_m        # (1, cout)
    var = jnp.sum(conv * conv, axis=0, keepdims=True) * inv_m - mean * mean
    scale = g_ref[...] * lax.rsqrt(var + _BN_EPS)
    shift = b_ref[...] - mean * scale
    o_ref[...] = jnp.maximum(conv * scale + shift, 0.0)


def _fused_layer(x_nhwc, w_k, gamma, beta):
    """One encoder layer (3x3/s1/p1 conv + train-BN + ReLU) as one pallas_call."""
    n, h, w, c = x_nhwc.shape
    cout = w_k.shape[-1]
    m = n * h * w

    kernel = functools.partial(_conv3x3_bn_relu_kernel,
                               n=n, h=h, w=w, cin=c, cout=cout)
    vmem = pl.BlockSpec(memory_space=pltpu.MemorySpace.VMEM)
    flops = 2 * m * (9 * c) * cout
    bytes_accessed = (4 * x_nhwc.size + 2 * w_k.size
                      + 4 * (gamma.size + beta.size) + 4 * m * cout)
    out = pl.pallas_call(
        kernel,
        out_shape=jax.ShapeDtypeStruct((m, cout), jnp.float32),
        in_specs=[vmem, vmem, vmem, vmem],
        out_specs=vmem,
        compiler_params=pltpu.CompilerParams(
            vmem_limit_bytes=_vmem_limit_bytes()),
        cost_estimate=pl.CostEstimate(flops=int(flops), transcendentals=0,
                                      bytes_accessed=int(bytes_accessed)),
    )(x_nhwc, w_k, gamma, beta)
    return out.reshape(n, h, w, cout)


# ----------------------------------------------------------------------------
# Stride-2 conv -> stride-1 conv on space-to-depth input (exact rewrite)
# ----------------------------------------------------------------------------
def _space_to_depth(x):
    """(N, H, W, C) -> (N, H/2, W/2, 4C); channel order (row-phase, col-phase, c)."""
    n, h, w, c = x.shape
    x = x.reshape(n, h // 2, 2, w // 2, 2, c)
    x = x.transpose(0, 1, 3, 2, 4, 5)
    return x.reshape(n, h // 2, w // 2, 4 * c)


# kh of the 4x4 stride-2 kernel -> (3x3 block tap, within-block phase)
_TAP_MAP = {0: (0, 1), 1: (1, 0), 2: (1, 1), 3: (2, 0)}


def _conv4x4s2_as_3x3s1_weights(w_hwio):
    """Exactly rewrite a 4x4/stride-2/pad-1 conv as a 3x3/stride-1/pad-1 conv
    acting on the space-to-depth (2x2 block -> channels) input."""
    cin, cout = w_hwio.shape[2], w_hwio.shape[3]
    w3 = jnp.zeros((3, 3, 4, cin, cout), w_hwio.dtype)
    for kh in range(4):
        bh, a = _TAP_MAP[kh]
        for kw in range(4):
            bw, b = _TAP_MAP[kw]
            w3 = w3.at[bh, bw, a * 2 + b].set(w_hwio[kh, kw])
    return w3.reshape(3, 3, 4 * cin, cout)


# ----------------------------------------------------------------------------
# Encoder parameters (PyTorch layout) + kernel-side preparation
# ----------------------------------------------------------------------------
def init_encoder_params(key, input_dim, ch, n_downs):
    params = []
    cin, cout = input_dim, ch
    key, k1, k2 = jax.random.split(key, 3)
    params.append(dict(
        w=0.1 * jax.random.normal(k1, (3, 3, cin, cout), jnp.float32),
        b=0.05 * jax.random.normal(k2, (cout,), jnp.float32),
        gamma=jnp.ones((cout,), jnp.float32)
              + 0.1 * jax.random.normal(jax.random.fold_in(key, 1), (cout,)),
        beta=0.1 * jax.random.normal(jax.random.fold_in(key, 2), (cout,)),
        k=3, stride=1, pad=1))
    cin = cout
    for d in range(n_downs):
        cout = cin * 2
        key, k1, k2 = jax.random.split(key, 3)
        params.append(dict(
            w=0.1 * jax.random.normal(k1, (4, 4, cin, cout), jnp.float32),
            b=0.05 * jax.random.normal(k2, (cout,), jnp.float32),
            gamma=jnp.ones((cout,), jnp.float32)
                  + 0.1 * jax.random.normal(jax.random.fold_in(key, 3 + d), (cout,)),
            beta=0.1 * jax.random.normal(jax.random.fold_in(key, 13 + d), (cout,)),
            k=4, stride=2, pad=1))
        cin = cout
    return params


def prepare_kernel_params(params):
    """Convert PyTorch-layout parameters to the fused-kernel layout.

    - stride-2 4x4 convs become stride-1 3x3 convs over space-to-depth input
    - weights are reshaped to (9*cin, cout) (taps folded into K) and cast bf16
    - conv bias is dropped: training-mode BatchNorm cancels it exactly.
    """
    prepped = []
    for p in params:
        if p["k"] == 3:
            w3, downsample = p["w"], False
        else:
            w3, downsample = _conv4x4s2_as_3x3s1_weights(p["w"]), True
        cin_eff, cout = w3.shape[2], w3.shape[3]
        prepped.append(dict(
            w_k=w3.reshape(9 * cin_eff, cout).astype(jnp.bfloat16),
            gamma=p["gamma"].reshape(1, cout).astype(jnp.float32),
            beta=p["beta"].reshape(1, cout).astype(jnp.float32),
            downsample=downsample))
    return prepped


def encoder_forward(x_nchw, params):
    """Encoder.forward (slot_attention=False path).  NCHW in, NCHW out."""
    prepped = prepare_kernel_params(params)
    x = jnp.transpose(x_nchw, (0, 2, 3, 1))            # NCHW -> NHWC
    for lp in prepped:
        if lp["downsample"]:
            assert x.shape[1] % 2 == 0 and x.shape[2] % 2 == 0
            x = _space_to_depth(x)                     # 1x layout op only
        x = _fused_layer(x, lp["w_k"], lp["gamma"], lp["beta"])
    # TODO(synk): BatchNorm running_mean/running_var buffer updates are not
    # materialized; they do not affect this forward output.
    return jnp.transpose(x, (0, 3, 1, 2))              # NHWC -> NCHW


# ----------------------------------------------------------------------------
# Pure-JAX f32 reference (original 3x3/s1 + 4x4/s2 convs with bias)
# ----------------------------------------------------------------------------
def _ref_layer(x_nhwc, w_hwio, bias, gamma, beta, *, stride, pad):
    y = lax.conv_general_dilated(
        x_nhwc, w_hwio, (stride, stride), [(pad, pad), (pad, pad)],
        dimension_numbers=("NHWC", "HWIO", "NHWC")) + bias
    mean = y.mean(axis=(0, 1, 2))
    var = ((y - mean) ** 2).mean(axis=(0, 1, 2))
    yn = (y - mean) / jnp.sqrt(var + _BN_EPS) * gamma + beta
    return jnp.maximum(yn, 0.0)


def encoder_forward_ref(x_nchw, params):
    x = jnp.transpose(x_nchw, (0, 2, 3, 1))
    for p in params:
        x = _ref_layer(x, p["w"], p["b"], p["gamma"], p["beta"],
                       stride=p["stride"], pad=p["pad"])
    return jnp.transpose(x, (0, 3, 1, 2))


if __name__ == "__main__":
    # Small shapes consistent with the module: batch=2, input_dim=4, H=W=16,
    # base ch=8, n_downs=2  ->  output (2, 32, 4, 4).
    N, CIN, H, W = 2, 4, 16, 16
    CH, N_DOWNS = 8, 2

    key = jax.random.PRNGKey(0)
    kx, kp = jax.random.split(key)
    x = jax.random.normal(kx, (N, CIN, H, W), jnp.float32)   # NCHW like PyTorch
    params = init_encoder_params(kp, CIN, CH, N_DOWNS)

    out = jax.block_until_ready(encoder_forward(x, params))
    assert out.shape == (N, CH * (2 ** N_DOWNS), H // (2 ** N_DOWNS),
                         W // (2 ** N_DOWNS)), out.shape

    ref = jax.block_until_ready(encoder_forward_ref(x, params))
    # Looser tolerance than the f32 version: the kernel uses bf16 MXU operands
    # (f32 accumulation / f32 BN statistics), drops the exactly-cancelled conv
    # bias, and uses the one-pass var = E[x^2] - mean^2 formulation; errors
    # compound over the 3 stacked BN layers.
    np.testing.assert_allclose(np.asarray(out), np.asarray(ref),
                               rtol=5e-2, atol=5e-2)

    print("KERNEL_OK")
</pallas_src>

<mosaic_0001>
module attributes {stable_mosaic.version = 11 : i64} {
  func.func @_conv3x3_bn_relu_kernel(%arg0: memref<2x16x16x4xf32, #tpu.memory_space<vmem>>, %arg1: memref<36x8xbf16, #tpu.memory_space<vmem>>, %arg2: memref<1x8xf32, #tpu.memory_space<vmem>>, %arg3: memref<1x8xf32, #tpu.memory_space<vmem>>, %arg4: memref<512x8xf32, #tpu.memory_space<vmem>>) attributes {dimension_semantics = [], scalar_prefetch = 0 : i64, scratch_operands = 0 : i64, tpu.core_type = #tpu.core_type<tc>} {
    %c0 = arith.constant 0 : index
    %c0_0 = arith.constant 0 : index
    %c0_1 = arith.constant 0 : index
    %c0_2 = arith.constant 0 : index
    %0 = vector.load %arg0[%c0, %c0_0, %c0_1, %c0_2] : memref<2x16x16x4xf32, #tpu.memory_space<vmem>>, vector<2x16x16x4xf32>
    %cst = arith.constant 0.000000e+00 : f32
    %1 = vector.broadcast %cst : f32 to vector<2x1x16x4xf32>
    %2 = tpu.concatenate %1, %0, %1 in 1 : vector<2x1x16x4xf32>, vector<2x16x16x4xf32>, vector<2x1x16x4xf32> -> vector<2x18x16x4xf32>
    %cst_3 = arith.constant 0.000000e+00 : f32
    %3 = vector.broadcast %cst_3 : f32 to vector<2x18x1x4xf32>
    %4 = tpu.concatenate %3, %2, %3 in 2 : vector<2x18x1x4xf32>, vector<2x18x16x4xf32>, vector<2x18x1x4xf32> -> vector<2x18x18x4xf32>
    %5 = vector.extract_strided_slice %4 {offsets = [0, 0, 0, 0], sizes = [2, 16, 16, 4], strides = [1, 1, 1, 1]} : vector<2x18x18x4xf32> to vector<2x16x16x4xf32>
    %6 = vector.extract_strided_slice %4 {offsets = [0, 0, 1, 0], sizes = [2, 16, 16, 4], strides = [1, 1, 1, 1]} : vector<2x18x18x4xf32> to vector<2x16x16x4xf32>
    %7 = vector.extract_strided_slice %4 {offsets = [0, 0, 2, 0], sizes = [2, 16, 16, 4], strides = [1, 1, 1, 1]} : vector<2x18x18x4xf32> to vector<2x16x16x4xf32>
    %8 = vector.extract_strided_slice %4 {offsets = [0, 1, 0, 0], sizes = [2, 16, 16, 4], strides = [1, 1, 1, 1]} : vector<2x18x18x4xf32> to vector<2x16x16x4xf32>
    %9 = vector.extract_strided_slice %4 {offsets = [0, 1, 1, 0], sizes = [2, 16, 16, 4], strides = [1, 1, 1, 1]} : vector<2x18x18x4xf32> to vector<2x16x16x4xf32>
    %10 = vector.extract_strided_slice %4 {offsets = [0, 1, 2, 0], sizes = [2, 16, 16, 4], strides = [1, 1, 1, 1]} : vector<2x18x18x4xf32> to vector<2x16x16x4xf32>
    %11 = vector.extract_strided_slice %4 {offsets = [0, 2, 0, 0], sizes = [2, 16, 16, 4], strides = [1, 1, 1, 1]} : vector<2x18x18x4xf32> to vector<2x16x16x4xf32>
    %12 = vector.extract_strided_slice %4 {offsets = [0, 2, 1, 0], sizes = [2, 16, 16, 4], strides = [1, 1, 1, 1]} : vector<2x18x18x4xf32> to vector<2x16x16x4xf32>
    %13 = vector.extract_strided_slice %4 {offsets = [0, 2, 2, 0], sizes = [2, 16, 16, 4], strides = [1, 1, 1, 1]} : vector<2x18x18x4xf32> to vector<2x16x16x4xf32>
    %14 = tpu.concatenate %5, %6, %7, %8, %9, %10, %11, %12, %13 in 3 : vector<2x16x16x4xf32>, vector<2x16x16x4xf32>, vector<2x16x16x4xf32>, vector<2x16x16x4xf32>, vector<2x16x16x4xf32>, vector<2x16x16x4xf32>, vector<2x16x16x4xf32>, vector<2x16x16x4xf32>, vector<2x16x16x4xf32> -> vector<2x16x16x36xf32>
    %15 = vector.shape_cast %14 : vector<2x16x16x36xf32> to vector<512x36xf32>
    %16 = arith.truncf %15 : vector<512x36xf32> to vector<512x36xbf16>
    %c0_4 = arith.constant 0 : index
    %c0_5 = arith.constant 0 : index
    %17 = vector.load %arg1[%c0_4, %c0_5] : memref<36x8xbf16, #tpu.memory_space<vmem>>, vector<36x8xbf16>
    %cst_6 = arith.constant dense<0.000000e+00> : vector<512x8xf32>
    %18 = tpu.matmul %16, %17, %cst_6 {dimension_numbers = #tpu.dot_dimension_numbers<[1], [0], [0], [1], [0, 0, 1, 1], [], []>} : vector<512x36xbf16>, vector<36x8xbf16>, vector<512x8xf32> -> vector<512x8xf32>
    %cst_7 = arith.constant dense<0.000000e+00> : vector<8xf32>
    %19 = vector.multi_reduction <add>, %18, %cst_7 [0] : vector<512x8xf32> to vector<8xf32>
    %20 = vector.shape_cast %19 : vector<8xf32> to vector<1x8xf32>
    %cst_8 = arith.constant 0.001953125 : f32
    %21 = vector.broadcast %cst_8 : f32 to vector<1x8xf32>
    %22 = arith.mulf %20, %21 : vector<1x8xf32>
    %23 = arith.mulf %18, %18 : vector<512x8xf32>
    %cst_9 = arith.constant dense<0.000000e+00> : vector<8xf32>
    %24 = vector.multi_reduction <add>, %23, %cst_9 [0] : vector<512x8xf32> to vector<8xf32>
    %25 = vector.shape_cast %24 : vector<8xf32> to vector<1x8xf32>
    %cst_10 = arith.constant 0.001953125 : f32
    %26 = vector.broadcast %cst_10 : f32 to vector<1x8xf32>
    %27 = arith.mulf %25, %26 : vector<1x8xf32>
    %28 = arith.mulf %22, %22 : vector<1x8xf32>
    %29 = arith.subf %27, %28 : vector<1x8xf32>
    %c0_11 = arith.constant 0 : index
    %c0_12 = arith.constant 0 : index
    %30 = vector.load %arg2[%c0_11, %c0_12] : memref<1x8xf32, #tpu.memory_space<vmem>>, vector<1x8xf32>
    %cst_13 = arith.constant 9.99999974E-6 : f32
    %31 = vector.broadcast %cst_13 : f32 to vector<1x8xf32>
    %32 = arith.addf %29, %31 : vector<1x8xf32>
    %33 = math.rsqrt %32 : vector<1x8xf32>
    %34 = arith.mulf %30, %33 : vector<1x8xf32>
    %c0_14 = arith.constant 0 : index
    %c0_15 = arith.constant 0 : index
    %35 = vector.load %arg3[%c0_14, %c0_15] : memref<1x8xf32, #tpu.memory_space<vmem>>, vector<1x8xf32>
    %36 = arith.mulf %22, %34 : vector<1x8xf32>
    %37 = arith.subf %35, %36 : vector<1x8xf32>
    %38 = vector.broadcast %34 : vector<1x8xf32> to vector<512x8xf32>
    %39 = arith.mulf %18, %38 : vector<512x8xf32>
    %40 = vector.broadcast %37 : vector<1x8xf32> to vector<512x8xf32>
    %41 = arith.addf %39, %40 : vector<512x8xf32>
    %cst_16 = arith.constant 0.000000e+00 : f32
    %42 = vector.broadcast %cst_16 : f32 to vector<512x8xf32>
    %43 = arith.maximumf %41, %42 : vector<512x8xf32>
    %c0_17 = arith.constant 0 : index
    %c0_18 = arith.constant 0 : index
    %44 = vector.load %arg4[%c0_17, %c0_18] : memref<512x8xf32, #tpu.memory_space<vmem>>, vector<512x8xf32>
    tpu.vector_store %arg4[%c0_17, %c0_18], %43 {strides = array<i32>} : memref<512x8xf32, #tpu.memory_space<vmem>>, vector<512x8xf32>,
    return
  }
}

</mosaic_0001>

<bundles_post_ra>
// kernel: tpu_custom_call.1
= control target key start
LH: loop header
LB: loop body
LE: loop exit
PB: predicated region body
PF: predicated region fallthrough
CT: control target
= control target key end

     0   :  { %vm147_vm0 = vcmask 1040384   ;;  %v5300_v0 = vmov 0.0   ;;  %vm470_vm1 = vcmask 1046528   ;;  %s5301_s9 = smov 4   ;;  %vm812_vm2 = vcmask 1045504   ;;  %s5302_s10 = smov 8   ;;  %s9899_s0 = inlined_call_operand.vmem [shape: f32[2,16,16,4], index: 0, kind: input, shape index: {}]   ;;  %s9900_s1 = inlined_call_operand.vmem [shape: bf16[36,8], index: 1, kind: input, shape index: {}]   ;;  %s9901_s2 = inlined_call_operand.vmem [shape: f32[1,8], index: 2, kind: input, shape index: {}]   ;;  %s9902_s3 = inlined_call_operand.vmem [shape: f32[1,8], index: 3, kind: input, shape index: {}]   ;;  %s9903_s4 = inlined_call_operand.vmem [shape: f32[512,8], index: 4, kind: output, shape index: {}]  }
   0x1   :  { %v5334_v1 = vrot.slane %v5300_v0, 7  ;;  %v20_v2 = vld [vmem:[%s9899_s0 + $0x10] sm:$0xff]  ;;  %v21_v3 = vld [vmem:[%s9899_s0 + $0x18] sm:$0xff]  ;;  %v18_v4 = vld [vmem:[%s9899_s0] sm:$0xff]  ;;  %s5305_s19 = smov 20   ;;  %vm2312_vm3 = vcmask 31744  }
   0x2   :  { %v153_v5 = vrot.slane %v20_v2, 7  ;;  %v154_v6 = vrot.slane %v21_v3, 7  ;;  %v19_v7 = vld [vmem:[%s9899_s0 + $0x8] sm:$0xff]  ;;  %v150_v8 = vrot.slane %v18_v4, 7  ;;  %v22_v24 = vld [vmem:[%s9899_s0 + $0x20] sm:$0xff]  ;;  %v24_v29 = vld [vmem:[%s9899_s0 + $0x30] sm:$0xff] }
   0x3   :  { %10272 = vst [vmem:[#allocation2_spill] sm:$0xff] %v5334_v1  ;;  %v5350_v9 = vsel %vm147_vm0, 0.0, %v5334_v1  ;;  %v5354_v10 = vsel %vm147_vm0, %v5334_v1, 0.0  ;;  %v472_v11 = vrot.slane %v5334_v1, 1  ;;  %v151_v12 = vrot.slane %v19_v7, 7  ;;  %v23_v28 = vld [vmem:[%s9899_s0 + $0x28] sm:$0xff] }
   0x4   :  { %10273 = vst [vmem:[#allocation3_spill] sm:$0xff] %v5350_v9  ;;  %v471_v13 = vrot.slane %v5350_v9, 1  ;;  %v474_v14 = vrot.slane %v5354_v10, 1  ;;  %v5360_v15 = vsel %vm147_vm0, %v153_v5, %v154_v6  ;;  %v5363_v16 = vsel %vm147_vm0, 0.0, %v153_v5  ;;  %v25_v30 = vld [vmem:[%s9899_s0 + $0x38] sm:$0xff]  ;;  %v26_v35 = vld [vmem:[%s9899_s0 + $0x40] sm:$0xff] }
   0x5   :  { %v5366_v17 = vsel %vm147_vm0, %v154_v6, 0.0  ;;  %v482_v18 = vrot.slane %v5360_v15, 1  ;;  %v5370_v19 = vsel %vm147_vm0, %v150_v8, %v151_v12  ;;  %v481_v22 = vrot.slane %v5363_v16, 1  ;;  %v27_v36 = vld [vmem:[%s9899_s0 + $0x48] sm:$0xff]  ;;  %v28_v2 = vld [vmem:[%s9899_s0 + $0x50] sm:$0xff]  ;;  %v29_v3 = vld [vmem:[%s9899_s0 + $0x58] sm:$0xff] }
   0x6   :  { %v473_v20 = vsel %vm470_vm1, %v471_v13, %v472_v11  ;;  %v475_v21 = vsel %vm470_vm1, %v472_v11, %v474_v14  ;;  %v484_v23 = vrot.slane %v5366_v17, 1  ;;  %v5383_v27 = vsel %vm147_vm0, 0.0, %v150_v8  ;;  %v30_v4 = vld [vmem:[%s9899_s0 + $0x60] sm:$0xff]  ;;  %v31_v11 = vld [vmem:[%s9899_s0 + $0x68] sm:$0xff]  ;;  %v44_v25 = vld [vmem:[%s9899_s0 + $0xd0] sm:$0xff]  ;;  %s5307_s26 = smov 28  }
   0x7   :  { %v5380_v26 = vpack.i.bf16 %v475_v21, %v473_v20  ;;  %10275 = vst [vmem:[#allocation5_spill] sm:$0xff] %v5383_v27  ;;  %v483_v31 = vsel %vm470_vm1, %v481_v22, %v482_v18  ;;  %v5397_v33 = vsel %vm147_vm0, %v151_v12, 0.0  ;;  %v476_v34 = vrot.slane %v5383_v27, 1  ;;  %v32_v12 = vld [vmem:[%s9899_s0 + $0x70] sm:$0xff]  ;;  %s5308_s27 = smov 32  }
   0x8   :  { %v485_v32 = vsel %vm470_vm1, %v482_v18, %v484_v23  ;;  %v477_v39 = vrot.slane %v5370_v19, 1  ;;  %v479_v40 = vrot.slane %v5397_v33, 1  ;;  %v156_v41 = vrot.slane %v22_v24, 7 }
   0x9   :  { %10274 = vst [vmem:[#allocation4_spill] sm:$0xff] %v5380_v26  ;;  %4041 = vrot.lane.b32.xlu0 %v5380_v26, %s5301_s9  ;;  %v5409_v38 = vpack.i.bf16 %v485_v32, %v483_v31  ;;  %v157_v42 = vrot.slane %v23_v28, 7  ;;  %v159_v43 = vrot.slane %v24_v29, 7  ;;  %v160_v44 = vrot.slane %v25_v30, 7  ;;  %v33_v31 = vld [vmem:[%s9899_s0 + $0x78] sm:$0xff] }
   0xa   :  { %v478_v45 = vsel %vm470_vm1, %v476_v34, %v477_v39  ;;  %v480_v46 = vsel %vm470_vm1, %v477_v39, %v479_v40  ;;  %v162_v47 = vrot.slane %v26_v35, 7  ;;  %v163_v48 = vrot.slane %v27_v36, 7 }
   0xb   :  { %10276 = vst [vmem:[#allocation6_spill] sm:$0xff] %v5409_v38  ;;  %4051 = vrot.lane.b32.xlu1 %v5409_v38, %s5301_s9  ;;  %v5417_v49 = vpack.i.bf16 %v480_v46, %v478_v45  ;;  %v5420_v50 = vsel %vm147_vm0, %v156_v41, %v157_v42  ;;  %v5423_v51 = vsel %vm147_vm0, 0.0, %v156_v41  ;;  %v5426_v52 = vsel %vm147_vm0, %v157_v42, 0.0  ;;  %v55_v38 = vld [vmem:[%s9899_s0 + $0x128] sm:$0xff] }
   0xc   :  { %v486_v53 = vrot.slane %v5423_v51, 1  ;;  %v487_v54 = vrot.slane %v5420_v50, 1  ;;  %v489_v55 = vrot.slane %v5426_v52, 1  ;;  %v5432_v56 = vsel %vm147_vm0, %v159_v43, %v160_v44 }
   0xd   :  { %10277 = vst [vmem:[#allocation7_spill] sm:$0xff] %v5417_v49  ;;  %4046 = vrot.lane.b32.xlu0 %v5417_v49, %s5301_s9  ;;  %v5437_v57 = vsel %vm147_vm0, 0.0, %v159_v43  ;;  %v5440_v58 = vsel %vm147_vm0, %v160_v44, 0.0  ;;  %v492_v59 = vrot.slane %v5432_v56, 1  ;;  %v5444_v60 = vsel %vm147_vm0, %v162_v47, %v163_v48 }
   0xe   :  { %v488_v61 = vsel %vm470_vm1, %v486_v53, %v487_v54  ;;  %v490_v62 = vsel %vm470_vm1, %v487_v54, %v489_v55  ;;  %v491_v63 = vrot.slane %v5437_v57, 1  ;;  %v494_v0 = vrot.slane %v5440_v58, 1 }
   0xf   :  { %v5459_v5 = vpack.i.bf16 %v490_v62, %v488_v61  ;;  %v5462_v6 = vsel %vm147_vm0, 0.0, %v162_v47  ;;  %v5465_v7 = vsel %vm147_vm0, %v163_v48, 0.0  ;;  %v497_v8 = vrot.slane %v5444_v60, 1  ;;  %v35_v61 = vld [vmem:[%s9899_s0 + $0x88] sm:$0xff] }
  0x10   :  { %v493_v13 = vsel %vm470_vm1, %v491_v63, %v492_v59  ;;  %v495_v14 = vsel %vm470_vm1, %v492_v59, %v494_v0  ;;  %v496_v18 = vrot.slane %v5462_v6, 1  ;;  %v499_v20 = vrot.slane %v5465_v7, 1  ;;  %v34_v59 = vld [vmem:[%s9899_s0 + $0x80] sm:$0xff] }
  0x11   :  { %10278 = vst [vmem:[#allocation8_spill] sm:$0xff] %v5459_v5  ;;  %4056 = vrot.lane.b32.xlu1 %v5459_v5, %s5301_s9  ;;  %v5480_v21 = vpack.i.bf16 %v495_v14, %v493_v13  ;;  %v165_v22 = vrot.slane %v28_v2, 7  ;;  %v166_v23 = vrot.slane %v29_v3, 7  ;;  %v168_v24 = vrot.slane %v30_v4, 7  ;;  %v36_v3 = vld [vmem:[%s9899_s0 + $0x90] sm:$0xff]  ;;  %v37_v4 = vld [vmem:[%s9899_s0 + $0x98] sm:$0xff] }
  0x12   :  { %v498_v28 = vsel %vm470_vm1, %v496_v18, %v497_v8  ;;  %v500_v29 = vsel %vm470_vm1, %v497_v8, %v499_v20  ;;  %v169_v30 = vrot.slane %v31_v11, 7  ;;  %v171_v32 = vrot.slane %v32_v12, 7  ;;  %v38_v8 = vld [vmem:[%s9899_s0 + $0xa0] sm:$0xff] }
  0x13   :  { %10279 = vst [vmem:[#allocation9_spill] sm:$0xff] %v5480_v21  ;;  %4061 = vrot.lane.b32.xlu0 %v5480_v21, %s5301_s9  ;;  %v5489_v34 = vpack.i.bf16 %v500_v29, %v498_v28  ;;  %v5492_v35 = vsel %vm147_vm0, %v165_v22, %v166_v23  ;;  %v5495_v36 = vsel %vm147_vm0, 0.0, %v165_v22  ;;  %v5498_v39 = vsel %vm147_vm0, %v166_v23, 0.0 }
  0x14   :  { %v501_v40 = vrot.slane %v5495_v36, 1  ;;  %v502_v41 = vrot.slane %v5492_v35, 1  ;;  %v504_v42 = vrot.slane %v5498_v39, 1  ;;  %v5504_v43 = vsel %vm147_vm0, %v168_v24, %v169_v30 }
  0x15   :  { %10280 = vst [vmem:[#allocation10_spill] sm:$0xff] %v5489_v34  ;;  %4066 = vrot.lane.b32.xlu1 %v5489_v34, %s5301_s9  ;;  %v5509_v44 = vsel %vm147_vm0, 0.0, %v168_v24  ;;  %v5512_v45 = vsel %vm147_vm0, %v169_v30, 0.0  ;;  %v507_v46 = vrot.slane %v5504_v43, 1  ;;  %v172_v47 = vrot.slane %v33_v31, 7  ;;  %v39_v30 = vld [vmem:[%s9899_s0 + $0xa8] sm:$0xff] }
  0x16   :  { %v503_v48 = vsel %vm470_vm1, %v501_v40, %v502_v41  ;;  %v505_v53 = vsel %vm470_vm1, %v502_v41, %v504_v42  ;;  %v506_v54 = vrot.slane %v5509_v44, 1  ;;  %v509_v55 = vrot.slane %v5512_v45, 1  ;;  %v51_v34 = vld [vmem:[%s9899_s0 + $0x108] sm:$0xff] }
  0x17   :  { %v5525_v62 = vpack.i.bf16 %v505_v53, %v503_v48  ;;  %v5528_v63 = vsel %vm147_vm0, %v171_v32, %v172_v47  ;;  %v5531_v0 = vsel %vm147_vm0, 0.0, %v171_v32  ;;  %v5534_v2 = vsel %vm147_vm0, %v172_v47, 0.0 }
  0x18   :  { %v508_v11 = vsel %vm470_vm1, %v506_v54, %v507_v46  ;;  %v510_v12 = vsel %vm470_vm1, %v507_v46, %v509_v55  ;;  %v511_v13 = vrot.slane %v5531_v0, 1  ;;  %v512_v14 = vrot.slane %v5528_v63, 1 }
  0x19   :  { %10281 = vst [vmem:[#allocation11_spill] sm:$0xff] %v5525_v62  ;;  %4071 = vrot.lane.b32.xlu0 %v5525_v62, %s5301_s9  ;;  %v5551_v18 = vpack.i.bf16 %v510_v12, %v508_v11  ;;  %v514_v20 = vrot.slane %v5534_v2, 1  ;;  %v174_v22 = vrot.slane %v34_v59, 7  ;;  %v175_v23 = vrot.slane %v35_v61, 7  ;;  %v40_v12 = vld [vmem:[%s9899_s0 + $0xb0] sm:$0xff] }
  0x1a   :  { %v513_v24 = vsel %vm470_vm1, %v511_v13, %v512_v14  ;;  %v177_v28 = vrot.slane %v36_v3, 7  ;;  %v178_v29 = vrot.slane %v37_v4, 7  ;;  %v180_v31 = vrot.slane %v38_v8, 7  ;;  %v41_v13 = vld [vmem:[%s9899_s0 + $0xb8] sm:$0xff] }
  0x1b   :  { %10282 = vst [vmem:[#allocation12_spill] sm:$0xff] %v5551_v18  ;;  %4076 = vrot.lane.b32.xlu1 %v5551_v18, %s5301_s9  ;;  %v515_v32 = vsel %vm470_vm1, %v512_v14, %v514_v20  ;;  %v5562_v40 = vsel %vm147_vm0, %v174_v22, %v175_v23  ;;  %v5565_v41 = vsel %vm147_vm0, 0.0, %v174_v22  ;;  %v5568_v42 = vsel %vm147_vm0, %v175_v23, 0.0 }
  0x1c   :  { %v5570_v46 = vpack.i.bf16 %v515_v32, %v513_v24  ;;  %v516_v47 = vrot.slane %v5565_v41, 1  ;;  %v517_v48 = vrot.slane %v5562_v40, 1  ;;  %v519_v53 = vrot.slane %v5568_v42, 1  ;;  %v42_v24 = vld [vmem:[%s9899_s0 + $0xc0] sm:$0xff] }
  0x1d   :  { %v5576_v54 = vsel %vm147_vm0, %v177_v28, %v178_v29  ;;  %v5579_v55 = vsel %vm147_vm0, 0.0, %v177_v28  ;;  %v5582_v59 = vsel %vm147_vm0, %v178_v29, 0.0  ;;  %v181_v61 = vrot.slane %v39_v30, 7  ;;  %v43_v28 = vld [vmem:[%s9899_s0 + $0xc8] sm:$0xff] }
  0x1e   :  { %10283 = vst [vmem:[#allocation13_spill] sm:$0xff] %v5570_v46  ;;  %4081 = vrot.lane.b32.xlu0 %v5570_v46, %s5301_s9  ;;  %v518_v3 = vsel %vm470_vm1, %v516_v47, %v517_v48  ;;  %v520_v4 = vsel %vm470_vm1, %v517_v48, %v519_v53  ;;  %v521_v8 = vrot.slane %v5579_v55, 1  ;;  %v522_v11 = vrot.slane %v5576_v54, 1 }
  0x1f   :  { %v5596_v14 = vpack.i.bf16 %v520_v4, %v518_v3  ;;  %v524_v20 = vrot.slane %v5582_v59, 1  ;;  %v5600_v22 = vsel %vm147_vm0, %v180_v31, %v181_v61  ;;  %v5603_v23 = vsel %vm147_vm0, 0.0, %v180_v31 }
  0x20   :  { %10285 = vst [vmem:[#allocation15_spill] sm:$0xff] %v5603_v23  ;;  %v523_v29 = vsel %vm470_vm1, %v521_v8, %v522_v11  ;;  %v5613_v30 = vsel %vm147_vm0, %v181_v61, 0.0  ;;  %v526_v32 = vrot.slane %v5603_v23, 1  ;;  %v527_v47 = vrot.slane %v5600_v22, 1 }
  0x21   :  { %10284 = vst [vmem:[#allocation14_spill] sm:$0xff] %v5596_v14  ;;  %4086 = vrot.lane.b32.xlu1 %v5596_v14, %s5301_s9  ;;  %v525_v31 = vsel %vm470_vm1, %v522_v11, %v524_v20  ;;  %v529_v48 = vrot.slane %v5613_v30, 1  ;;  %v183_v53 = vrot.slane %v40_v12, 7  ;;  %v184_v3 = vrot.slane %v41_v13, 7 }
  0x22   :  { %v5621_v4 = vpack.i.bf16 %v525_v31, %v523_v29  ;;  %v528_v8 = vsel %vm470_vm1, %v526_v32, %v527_v47  ;;  %v186_v37 = vrot.slane %v42_v24, 7  ;;  %v187_v61 = vrot.slane %v43_v28, 7  ;;  %v45_v29 = vld [vmem:[%s9899_s0 + $0xd8] sm:$0xff] }
  0x23   :  { %v530_v26 = vsel %vm470_vm1, %v527_v47, %v529_v48  ;;  %v5629_v14 = vsel %vm147_vm0, %v183_v53, %v184_v3  ;;  %v5632_v11 = vsel %vm147_vm0, 0.0, %v183_v53  ;;  %v5635_v12 = vsel %vm147_vm0, %v184_v3, 0.0  ;;  %v46_v48 = vld [vmem:[%s9899_s0 + $0xe0] sm:$0xff]  ;;  %v47_v53 = vld [vmem:[%s9899_s0 + $0xe8] sm:$0xff] }
  0x24   :  { %10286 = vst [vmem:[#allocation16_spill] sm:$0xff] %v5621_v4  ;;  %4091 = vrot.lane.b32.xlu0 %v5621_v4, %s5301_s9  ;;  %v5639_v13 = vpack.i.bf16 %v530_v26, %v528_v8  ;;  %v531_v20 = vrot.slane %v5632_v11, 1  ;;  %v532_v24 = vrot.slane %v5629_v14, 1  ;;  %v534_v28 = vrot.slane %v5635_v12, 1 }
  0x25   :  { %v5648_v32 = vsel %vm147_vm0, %v186_v37, %v187_v61  ;;  %v5651_v47 = vsel %vm147_vm0, 0.0, %v186_v37  ;;  %v5654_v31 = vsel %vm147_vm0, %v187_v61, 0.0  ;;  %v189_v26 = vrot.slane %v44_v25, 7  ;;  %v50_v25 = vld [vmem:[%s9899_s0 + $0x100] sm:$0xff] }
  0x26   :  { %10287 = vst [vmem:[#allocation17_spill] sm:$0xff] %v5639_v13  ;;  %10288 = vst [vmem:[#allocation18_spill] sm:$0xff] %v5648_v32  ;;  %4096 = vrot.lane.b32.xlu1 %v5639_v13, %s5301_s9  ;;  %v533_v3 = vsel %vm470_vm1, %v531_v20, %v532_v24  ;;  %v535_v37 = vsel %vm470_vm1, %v532_v24, %v534_v28  ;;  %v536_v8 = vrot.slane %v5651_v47, 1  ;;  %v537_v61 = vrot.slane %v5648_v32, 1 }
  0x27   :  { %10289 = vst [vmem:[#allocation19_spill] sm:$0xff] %v5651_v47  ;;  %10290 = vst [vmem:[#allocation20_spill] sm:$0xff] %v5654_v31  ;;  %v5671_v4 = vpack.i.bf16 %v535_v37, %v533_v3  ;;  %v539_v46 = vrot.slane %v5654_v31, 1  ;;  %v190_v18 = vrot.slane %v45_v29, 7  ;;  %v5675_v62 = vsel %vm147_vm0, 0.0, %v189_v26 }
  0x28   :  { %10292 = vst [vmem:[#allocation22_spill] sm:$0xff] %v5675_v62  ;;  %v538_v20 = vsel %vm470_vm1, %v536_v8, %v537_v61  ;;  %v541_v24 = vrot.slane %v5675_v62, 1  ;;  %v192_v28 = vrot.slane %v46_v48, 7  ;;  %v193_v13 = vrot.slane %v47_v53, 7 }
  0x29   :  { %10291 = vst [vmem:[#allocation21_spill] sm:$0xff] %v5671_v4  ;;  %4101 = vrot.lane.b32.xlu0 %v5671_v4, %s5301_s9  ;;  %v540_v3 = vsel %vm470_vm1, %v537_v61, %v539_v46  ;;  %v5686_v29 = vsel %vm147_vm0, %v189_v26, %v190_v18  ;;  %v5689_v37 = vsel %vm147_vm0, %v190_v18, 0.0  ;;  %v198_v8 = vrot.slane %v50_v25, 7 }
  0x2a   :  { %10293 = vst [vmem:[#allocation23_spill] sm:$0xff] %v5686_v29  ;;  %10294 = vst [vmem:[#allocation24_spill] sm:$0xff] %v5689_v37  ;;  %v5691_v21 = vpack.i.bf16 %v540_v3, %v538_v20  ;;  %v542_v48 = vrot.slane %v5686_v29, 1  ;;  %v544_v53 = vrot.slane %v5689_v37, 1  ;;  %v5696_v5 = vsel %vm147_vm0, %v192_v28, %v193_v13 }
  0x2b   :  { %10296 = vst [vmem:[#allocation26_spill] sm:$0xff] %v5696_v5  ;;  %v5699_v4 = vsel %vm147_vm0, 0.0, %v192_v28  ;;  %v5702_v46 = vsel %vm147_vm0, %v193_v13, 0.0  ;;  %v547_v26 = vrot.slane %v5696_v5, 1  ;;  %v199_v18 = vrot.slane %v51_v34, 7  ;;  %v52_v28 = vld [vmem:[%s9899_s0 + $0x110] sm:$0xff] }
  0x2c   :  { %10295 = vst [vmem:[#allocation25_spill] sm:$0xff] %v5691_v21  ;;  %10297 = vst [vmem:[#allocation27_spill] sm:$0xff] %v5699_v4  ;;  %4106 = vrot.lane.b32.xlu1 %v5691_v21, %s5301_s9  ;;  %v543_v61 = vsel %vm470_vm1, %v541_v24, %v542_v48  ;;  %v545_v25 = vsel %vm470_vm1, %v542_v48, %v544_v53  ;;  %v546_v20 = vrot.slane %v5699_v4, 1  ;;  %v549_v3 = vrot.slane %v5702_v46, 1  ;;  %v53_v13 = vld [vmem:[%s9899_s0 + $0x118] sm:$0xff]  ;;  %v54_v53 = vld [vmem:[%s9899_s0 + $0x120] sm:$0xff] }
  0x2d   :  { %10298 = vst [vmem:[#allocation28_spill] sm:$0xff] %v5702_v46  ;;  %v5717_v34 = vpack.i.bf16 %v545_v25, %v543_v61  ;;  %v5720_v21 = vsel %vm147_vm0, %v198_v8, %v199_v18  ;;  %v5723_v24 = vsel %vm147_vm0, 0.0, %v198_v8  ;;  %v5726_v48 = vsel %vm147_vm0, %v199_v18, 0.0  ;;  %v56_v61 = vld [vmem:[%s9899_s0 + $0x130] sm:$0xff] }
  0x2e   :  { %10300 = vst [vmem:[#allocation30_spill] sm:$0xff] %v5720_v21  ;;  %10301 = vst [vmem:[#allocation31_spill] sm:$0xff] %v5723_v24  ;;  %v548_v25 = vsel %vm470_vm1, %v546_v20, %v547_v26  ;;  %v550_v8 = vsel %vm470_vm1, %v547_v26, %v549_v3  ;;  %v551_v49 = vrot.slane %v5723_v24, 1  ;;  %v552_v18 = vrot.slane %v5720_v21, 1 }
  0x2f   :  { %10299 = vst [vmem:[#allocation29_spill] sm:$0xff] %v5717_v34  ;;  %10302 = vst [vmem:[#allocation32_spill] sm:$0xff] %v5726_v48  ;;  %4111 = vrot.lane.b32.xlu0 %v5717_v34, %s5301_s9  ;;  %v5743_v46 = vpack.i.bf16 %v550_v8, %v548_v25  ;;  %v554_v5 = vrot.slane %v5726_v48, 1  ;;  %v201_v4 = vrot.slane %v52_v28, 7  ;;  %v202_v37 = vrot.slane %v53_v13, 7  ;;  %v57_v13 = vld [vmem:[%s9899_s0 + $0x138] sm:$0xff] }
  0x30   :  { %v553_v29 = vsel %vm470_vm1, %v551_v49, %v552_v18  ;;  %v204_v62 = vrot.slane %v54_v53, 7  ;;  %v205_v31 = vrot.slane %v55_v38, 7  ;;  %v207_v20 = vrot.slane %v56_v61, 7  ;;  %v59_v34 = vld [vmem:[%s9899_s0 + $0x148] sm:$0xff] }
  0x31   :  { %10303 = vst [vmem:[#allocation33_spill] sm:$0xff] %v5743_v46  ;;  %4116 = vrot.lane.b32.xlu1 %v5743_v46, %s5301_s9  ;;  %v555_v26 = vsel %vm470_vm1, %v552_v18, %v554_v5  ;;  %v5751_v3 = vsel %vm147_vm0, %v201_v4, %v202_v37  ;;  %v5754_v25 = vsel %vm147_vm0, 0.0, %v201_v4  ;;  %v5757_v8 = vsel %vm147_vm0, %v202_v37, 0.0  ;;  %v58_v5 = vld [vmem:[%s9899_s0 + $0x140] sm:$0xff] }
  0x32   :  { %10304 = vst [vmem:[#allocation34_spill] sm:$0xff] %v5751_v3  ;;  %10305 = vst [vmem:[#allocation35_spill] sm:$0xff] %v5754_v25  ;;  %v5759_v28 = vpack.i.bf16 %v555_v26, %v553_v29  ;;  %v556_v49 = vrot.slane %v5754_v25, 1  ;;  %v557_v38 = vrot.slane %v5751_v3, 1  ;;  %v559_v4 = vrot.slane %v5757_v8, 1 }
  0x33   :  { %10306 = vst [vmem:[#allocation36_spill] sm:$0xff] %v5757_v8  ;;  %v5771_v53 = vsel %vm147_vm0, %v204_v62, %v205_v31  ;;  %v5774_v29 = vsel %vm147_vm0, 0.0, %v204_v62  ;;  %v5777_v37 = vsel %vm147_vm0, %v205_v31, 0.0  ;;  %v208_v8 = vrot.slane %v57_v13, 7 }
  0x34   :  { %10307 = vst [vmem:[#allocation37_spill] sm:$0xff] %v5759_v28  ;;  %10308 = vst [vmem:[#allocation38_spill] sm:$0xff] %v5771_v53  ;;  %4121 = vrot.lane.b32.xlu0 %v5759_v28, %s5301_s9  ;;  %v558_v61 = vsel %vm470_vm1, %v556_v49, %v557_v38  ;;  %v561_v18 = vrot.slane %v5774_v29, 1  ;;  %v562_v26 = vrot.slane %v5771_v53, 1  ;;  %v564_v46 = vrot.slane %v5777_v37, 1  ;;  %v60_v49 = vld [vmem:[%s9899_s0 + $0x150] sm:$0xff] }
  0x35   :  { %10309 = vst [vmem:[#allocation39_spill] sm:$0xff] %v5774_v29  ;;  %10310 = vst [vmem:[#allocation40_spill] sm:$0xff] %v5777_v37  ;;  %v560_v62 = vsel %vm470_vm1, %v557_v38, %v559_v4  ;;  %v5790_v31 = vsel %vm147_vm0, 0.0, %v207_v20  ;;  %v210_v3 = vrot.slane %v58_v5, 7  ;;  %v61_v38 = vld [vmem:[%s9899_s0 + $0x158] sm:$0xff]  ;;  %v5806_v5 = vsel %vm147_vm0, %v207_v20, %v208_v8 }
  0x36   :  { %10311 = vst [vmem:[#allocation41_spill] sm:$0xff] %v5790_v31  ;;  %v5795_v28 = vpack.i.bf16 %v560_v62, %v558_v61  ;;  %v563_v53 = vsel %vm470_vm1, %v561_v18, %v562_v26  ;;  %v565_v37 = vsel %vm470_vm1, %v562_v26, %v564_v46  ;;  %v566_v29 = vrot.slane %v5790_v31, 1  ;;  %10314 = vst [vmem:[#allocation44_spill] sm:$0xff] %v5806_v5 }
  0x37   :  { %v5803_v13 = vpack.i.bf16 %v565_v37, %v563_v53  ;;  %v5809_v4 = vsel %vm147_vm0, %v208_v8, 0.0  ;;  %v211_v61 = vrot.slane %v59_v34, 7  ;;  %v567_v46 = vrot.slane %v5806_v5, 1 }
  0x38   :  { %10312 = vst [vmem:[#allocation42_spill] sm:$0xff] %v5795_v28  ;;  %10315 = vst [vmem:[#allocation45_spill] sm:$0xff] %v5809_v4  ;;  %4126 = vrot.lane.b32.xlu1 %v5795_v28, %s5301_s9  ;;  %v569_v18 = vrot.slane %v5809_v4, 1  ;;  %v5816_v26 = vsel %vm147_vm0, 0.0, %v210_v3  ;;  %v213_v62 = vrot.slane %v60_v49, 7  ;;  %v214_v53 = vrot.slane %v61_v38, 7 }
  0x39   :  { %10313 = vst [vmem:[#allocation43_spill] sm:$0xff] %v5803_v13  ;;  %10316 = vst [vmem:[#allocation46_spill] sm:$0xff] %v5816_v26  ;;  %4131 = vrot.lane.b32.xlu0 %v5803_v13, %s5301_s9  ;;  %v5821_v20 = vsel %vm147_vm0, %v210_v3, %v211_v61  ;;  %v5824_v8 = vsel %vm147_vm0, %v211_v61, 0.0  ;;  %v571_v34 = vrot.slane %v5816_v26, 1  ;;  %v568_v37 = vsel %vm470_vm1, %v566_v29, %v567_v46  ;;  %v62_v13 = vld [vmem:[%s9899_s0 + $0x160] sm:$0xff]  ;;  %v63_v3 = vld [vmem:[%s9899_s0 + $0x168] sm:$0xff] }
  0x3a   :  { %10317 = vst [vmem:[#allocation47_spill] sm:$0xff] %v5821_v20  ;;  %10318 = vst [vmem:[#allocation48_spill] sm:$0xff] %v5824_v8  ;;  %v570_v28 = vsel %vm470_vm1, %v567_v46, %v569_v18  ;;  %v572_v4 = vrot.slane %v5821_v20, 1  ;;  %v574_v49 = vrot.slane %v5824_v8, 1  ;;  %v5840_v38 = vsel %vm147_vm0, %v213_v62, %v214_v53  ;;  %v64_v18 = vld [vmem:[%s9899_s0 + $0x170] sm:$0xff]  ;;  %v65_v8 = vld [vmem:[%s9899_s0 + $0x178] sm:$0xff] }
  0x3b   :  { %v5837_v61 = vpack.i.bf16 %v570_v28, %v568_v37  ;;  %10320 = vst [vmem:[#allocation50_spill] sm:$0xff] %v5840_v38  ;;  %v5843_v29 = vsel %vm147_vm0, 0.0, %v213_v62  ;;  %v5846_v46 = vsel %vm147_vm0, %v214_v53, 0.0  ;;  %v66_v28 = vld [vmem:[%s9899_s0 + $0x180] sm:$0xff]  ;;  %v577_v53 = vrot.slane %v5840_v38, 1 }
  0x3c   :  { %10321 = vst [vmem:[#allocation51_spill] sm:$0xff] %v5843_v29  ;;  %10322 = vst [vmem:[#allocation52_spill] sm:$0xff] %v5846_v46  ;;  %v573_v37 = vsel %vm470_vm1, %v571_v34, %v572_v4  ;;  %v575_v62 = vsel %vm470_vm1, %v572_v4, %v574_v49  ;;  %v576_v20 = vrot.slane %v5843_v29, 1  ;;  %v579_v5 = vrot.slane %v5846_v46, 1  ;;  %v67_v4 = vld [vmem:[%s9899_s0 + $0x188] sm:$0xff] }
  0x3d   :  { %10319 = vst [vmem:[#allocation49_spill] sm:$0xff] %v5837_v61  ;;  %4136 = vrot.lane.b32.xlu1 %v5837_v61, %s5301_s9  ;;  %v5863_v26 = vpack.i.bf16 %v575_v62, %v573_v37  ;;  %v216_v31 = vrot.slane %v62_v13, 7  ;;  %v217_v25 = vrot.slane %v63_v3, 7  ;;  %v219_v21 = vrot.slane %v64_v18, 7  ;;  %v71_v61 = vld [vmem:[%s9899_s0 + $0x1a8] sm:$0xff] }
  0x3e   :  { %v578_v48 = vsel %vm470_vm1, %v576_v20, %v577_v53  ;;  %v220_v24 = vrot.slane %v65_v8, 7  ;;  %v222_v34 = vrot.slane %v66_v28, 7  ;;  %v580_v49 = vsel %vm470_vm1, %v577_v53, %v579_v5 }
  0x3f   :  { %10323 = vst [vmem:[#allocation53_spill] sm:$0xff] %v5863_v26  ;;  %4141 = vrot.lane.b32.xlu0 %v5863_v26, %s5301_s9  ;;  %v5874_v37 = vsel %vm147_vm0, %v216_v31, %v217_v25  ;;  %v5877_v13 = vsel %vm147_vm0, 0.0, %v216_v31  ;;  %v5880_v20 = vsel %vm147_vm0, %v217_v25, 0.0  ;;  %v5882_v8 = vpack.i.bf16 %v580_v49, %v578_v48 }
  0x40   :  { %10324 = vst [vmem:[#allocation54_spill] sm:$0xff] %v5874_v37  ;;  %10325 = vst [vmem:[#allocation55_spill] sm:$0xff] %v5877_v13  ;;  %v581_v3 = vrot.slane %v5877_v13, 1  ;;  %v582_v18 = vrot.slane %v5874_v37, 1  ;;  %v584_v28 = vrot.slane %v5880_v20, 1  ;;  %v5888_v62 = vsel %vm147_vm0, %v219_v21, %v220_v24 }
  0x41   :  { %10326 = vst [vmem:[#allocation56_spill] sm:$0xff] %v5880_v20  ;;  %10327 = vst [vmem:[#allocation57_spill] sm:$0xff] %v5882_v8  ;;  %v5891_v5 = vsel %vm147_vm0, 0.0, %v219_v21  ;;  %v5894_v31 = vsel %vm147_vm0, %v220_v24, 0.0  ;;  %v223_v53 = vrot.slane %v67_v4, 7  ;;  %4146 = vrot.lane.b32.xlu1 %v5882_v8, %s5301_s9  ;;  %v587_v26 = vrot.slane %v5888_v62, 1 }
  0x42   :  { %10328 = vst [vmem:[#allocation58_spill] sm:$0xff] %v5888_v62  ;;  %10329 = vst [vmem:[#allocation59_spill] sm:$0xff] %v5891_v5  ;;  %v583_v48 = vsel %vm470_vm1, %v581_v3, %v582_v18  ;;  %v585_v25 = vsel %vm470_vm1, %v582_v18, %v584_v28  ;;  %v586_v49 = vrot.slane %v5891_v5, 1  ;;  %v68_v21 = vld [vmem:[%s9899_s0 + $0x190] sm:$0xff]  ;;  %v69_v24 = vld [vmem:[%s9899_s0 + $0x198] sm:$0xff]  ;;  %v589_v8 = vrot.slane %v5894_v31, 1 }
  0x43   :  { %10330 = vst [vmem:[#allocation60_spill] sm:$0xff] %v5894_v31  ;;  %v5908_v4 = vpack.i.bf16 %v585_v25, %v583_v48  ;;  %v5912_v3 = vsel %vm147_vm0, %v222_v34, %v223_v53  ;;  %v5915_v18 = vsel %vm147_vm0, 0.0, %v222_v34  ;;  %v70_v28 = vld [vmem:[%s9899_s0 + $0x1a0] sm:$0xff]  ;;  %v5925_v48 = vsel %vm147_vm0, %v223_v53, 0.0 }
  0x44   :  { %10332 = vst [vmem:[#allocation62_spill] sm:$0xff] %v5912_v3  ;;  %10333 = vst [vmem:[#allocation63_spill] sm:$0xff] %v5915_v18  ;;  %v588_v62 = vsel %vm470_vm1, %v586_v49, %v587_v26  ;;  %v591_v25 = vrot.slane %v5915_v18, 1  ;;  %v592_v31 = vrot.slane %v5912_v3, 1  ;;  %v590_v34 = vsel %vm470_vm1, %v587_v26, %v589_v8  ;;  %v72_v18 = vld [vmem:[%s9899_s0 + $0x1b0] sm:$0xff] }
  0x45   :  { %10331 = vst [vmem:[#allocation61_spill] sm:$0xff] %v5908_v4  ;;  %4151 = vrot.lane.b32.xlu0 %v5908_v4, %s5301_s9  ;;  %v594_v5 = vrot.slane %v5925_v48, 1  ;;  %v225_v20 = vrot.slane %v68_v21, 7  ;;  %v226_v37 = vrot.slane %v69_v24, 7  ;;  %v5933_v13 = vpack.i.bf16 %v590_v34, %v588_v62 }
  0x46   :  { %v593_v49 = vsel %vm470_vm1, %v591_v25, %v592_v31  ;;  %v228_v46 = vrot.slane %v70_v28, 7  ;;  %v229_v53 = vrot.slane %v71_v61, 7  ;;  %v74_v28 = vld [vmem:[%s9899_s0 + $0x1c0] sm:$0xff]  ;;  %v75_v25 = vld [vmem:[%s9899_s0 + $0x1c8] sm:$0xff]  ;;  %vm2375_vm4 = vcmask 64512  }
  0x47   :  { %10334 = vst [vmem:[#allocation64_spill] sm:$0xff] %v5933_v13  ;;  %v595_v3 = vsel %vm470_vm1, %v592_v31, %v594_v5  ;;  %v5941_v4 = vsel %vm147_vm0, %v225_v20, %v226_v37  ;;  %v5944_v26 = vsel %vm147_vm0, 0.0, %v225_v20  ;;  %v5947_v8 = vsel %vm147_vm0, %v226_v37, 0.0  ;;  %4156 = vrot.lane.b32.xlu1 %v5933_v13, %s5301_s9  ;;  %v73_v31 = vld [vmem:[%s9899_s0 + $0x1b8] sm:$0xff] }
  0x48   :  { %10335 = vst [vmem:[#allocation65_spill] sm:$0xff] %v5941_v4  ;;  %10336 = vst [vmem:[#allocation66_spill] sm:$0xff] %v5944_v26  ;;  %v5951_v62 = vpack.i.bf16 %v595_v3, %v593_v49  ;;  %v596_v61 = vrot.slane %v5944_v26, 1  ;;  %v597_v21 = vrot.slane %v5941_v4, 1  ;;  %v599_v5 = vrot.slane %v5947_v8, 1 }
  0x49   :  { %10337 = vst [vmem:[#allocation67_spill] sm:$0xff] %v5947_v8  ;;  %v5960_v20 = vsel %vm147_vm0, %v228_v46, %v229_v53  ;;  %v5963_v37 = vsel %vm147_vm0, 0.0, %v228_v46  ;;  %v5966_v24 = vsel %vm147_vm0, %v229_v53, 0.0  ;;  %v231_v3 = vrot.slane %v72_v18, 7  ;;  %v76_v18 = vld [vmem:[%s9899_s0 + $0x1d0] sm:$0xff] }
  0x4a   :  { %10338 = vst [vmem:[#allocation68_spill] sm:$0xff] %v5951_v62  ;;  %10339 = vst [vmem:[#allocation69_spill] sm:$0xff] %v5960_v20  ;;  %4161 = vrot.lane.b32.xlu0 %v5951_v62, %s5301_s9  ;;  %v598_v34 = vsel %vm470_vm1, %v596_v61, %v597_v21  ;;  %v600_v46 = vsel %vm470_vm1, %v597_v21, %v599_v5  ;;  %v601_v49 = vrot.slane %v5963_v37, 1  ;;  %v602_v53 = vrot.slane %v5960_v20, 1  ;;  %v77_v20 = vld [vmem:[%s9899_s0 + $0x1d8] sm:$0xff] }
  0x4b   :  { %10340 = vst [vmem:[#allocation70_spill] sm:$0xff] %v5963_v37  ;;  %10341 = vst [vmem:[#allocation71_spill] sm:$0xff] %v5966_v24  ;;  %v5983_v13 = vpack.i.bf16 %v600_v46, %v598_v34  ;;  %v604_v8 = vrot.slane %v5966_v24, 1  ;;  %v232_v4 = vrot.slane %v73_v31, 7  ;;  %v5987_v26 = vsel %vm147_vm0, 0.0, %v231_v3 }
  0x4c   :  { %10343 = vst [vmem:[#allocation73_spill] sm:$0xff] %v5987_v26  ;;  %v603_v61 = vsel %vm470_vm1, %v601_v49, %v602_v53  ;;  %v606_v21 = vrot.slane %v5987_v26, 1  ;;  %v234_v5 = vrot.slane %v74_v28, 7  ;;  %v235_v62 = vrot.slane %v75_v25, 7 }
  0x4d   :  { %10342 = vst [vmem:[#allocation72_spill] sm:$0xff] %v5983_v13  ;;  %4166 = vrot.lane.b32.xlu1 %v5983_v13, %s5301_s9  ;;  %v605_v34 = vsel %vm470_vm1, %v602_v53, %v604_v8  ;;  %v5998_v31 = vsel %vm147_vm0, %v231_v3, %v232_v4  ;;  %v6001_v46 = vsel %vm147_vm0, %v232_v4, 0.0  ;;  %v237_v49 = vrot.slane %v76_v18, 7 }
  0x4e   :  { %10344 = vst [vmem:[#allocation74_spill] sm:$0xff] %v5998_v31  ;;  %10345 = vst [vmem:[#allocation75_spill] sm:$0xff] %v6001_v46  ;;  %v6003_v26 = vpack.i.bf16 %v605_v34, %v603_v61  ;;  %v607_v28 = vrot.slane %v5998_v31, 1  ;;  %v609_v25 = vrot.slane %v6001_v46, 1  ;;  %v6008_v24 = vsel %vm147_vm0, %v234_v5, %v235_v62 }
  0x4f   :  { %10347 = vst [vmem:[#allocation77_spill] sm:$0xff] %v6008_v24  ;;  %v6011_v13 = vsel %vm147_vm0, 0.0, %v234_v5  ;;  %v6014_v8 = vsel %vm147_vm0, %v235_v62, 0.0  ;;  %v612_v3 = vrot.slane %v6008_v24, 1  ;;  %v238_v4 = vrot.slane %v77_v20, 7  ;;  %v78_v5 = vld [vmem:[%s9899_s0 + $0x1e0] sm:$0xff] }
  0x50   :  { %10346 = vst [vmem:[#allocation76_spill] sm:$0xff] %v6003_v26  ;;  %10348 = vst [vmem:[#allocation78_spill] sm:$0xff] %v6011_v13  ;;  %4171 = vrot.lane.b32.xlu0 %v6003_v26, %s5301_s9  ;;  %v608_v53 = vsel %vm470_vm1, %v606_v21, %v607_v28  ;;  %v610_v18 = vsel %vm470_vm1, %v607_v28, %v609_v25  ;;  %v611_v61 = vrot.slane %v6011_v13, 1  ;;  %v614_v34 = vrot.slane %v6014_v8, 1  ;;  %v79_v62 = vld [vmem:[%s9899_s0 + $0x1e8] sm:$0xff] }
  0x51   :  { %10349 = vst [vmem:[#allocation79_spill] sm:$0xff] %v6014_v8  ;;  %v6029_v20 = vpack.i.bf16 %v610_v18, %v608_v53  ;;  %v6032_v26 = vsel %vm147_vm0, %v237_v49, %v238_v4  ;;  %v6035_v21 = vsel %vm147_vm0, 0.0, %v237_v49  ;;  %v6038_v28 = vsel %vm147_vm0, %v238_v4, 0.0 }
  0x52   :  { %10351 = vst [vmem:[#allocation81_spill] sm:$0xff] %v6032_v26  ;;  %10352 = vst [vmem:[#allocation82_spill] sm:$0xff] %v6035_v21  ;;  %v613_v25 = vsel %vm470_vm1, %v611_v61, %v612_v3  ;;  %v615_v8 = vsel %vm470_vm1, %v612_v3, %v614_v34  ;;  %v616_v24 = vrot.slane %v6035_v21, 1  ;;  %v617_v13 = vrot.slane %v6032_v26, 1 }
  0x53   :  { %10350 = vst [vmem:[#allocation80_spill] sm:$0xff] %v6029_v20  ;;  %4176 = vrot.lane.b32.xlu1 %v6029_v20, %s5301_s9  ;;  %v6046_v53 = vpack.i.bf16 %v615_v8, %v613_v25  ;;  %v619_v18 = vrot.slane %v6038_v28, 1  ;;  %v240_v49 = vrot.slane %v78_v5, 7  ;;  %v241_v46 = vrot.slane %v79_v62, 7 }
  0x54   :  { %v618_v4 = vsel %vm470_vm1, %v616_v24, %v617_v13  ;;  %v813_v31 = vrot.slane %v5350_v9, 2  ;;  %v814_v61 = vrot.slane %v5334_v1, 2  ;;  %v818_v3 = vrot.slane %v5383_v27, 2 }
  0x55   :  { %10353 = vst [vmem:[#allocation83_spill] sm:$0xff] %v6046_v53  ;;  %4181 = vrot.lane.b32.xlu0 %v6046_v53, %s5301_s9  ;;  %v620_v34 = vsel %vm470_vm1, %v617_v13, %v619_v18  ;;  %v6057_v8 = vsel %vm147_vm0, %v240_v49, %v241_v46  ;;  %v6060_v25 = vsel %vm147_vm0, 0.0, %v240_v49  ;;  %v6063_v5 = vsel %vm147_vm0, %v241_v46, 0.0 }
  0x56   :  { %10354 = vst [vmem:[#allocation84_spill] sm:$0xff] %v6057_v8  ;;  %10355 = vst [vmem:[#allocation85_spill] sm:$0xff] %v6060_v25  ;;  %v6065_v24 = vpack.i.bf16 %v620_v34, %v618_v4  ;;  %v621_v62 = vrot.slane %v6060_v25, 1  ;;  %v622_v9 = vrot.slane %v6057_v8, 1  ;;  %v624_v1 = vrot.slane %v6063_v5, 1 }
  0x57   :  { %v815_v53 = vsel %vm812_vm2, %v813_v31, %v814_v61  ;;  %v10357_v13 = vrot.slane %v5354_v10, 2  ;;  %v819_v49 = vrot.slane %v5370_v19, 2  ;;  %v821_v20 = vrot.slane %v5397_v33, 2 }
  0x58   :  { %10356 = vst [vmem:[#allocation86_spill] sm:$0xff] %v6065_v24  ;;  %4186 = vrot.lane.b32.xlu1 %v6065_v24, %s5301_s9  ;;  %v623_v46 = vsel %vm470_vm1, %v621_v62, %v622_v9  ;;  %v625_v4 = vsel %vm470_vm1, %v622_v9, %v624_v1  ;;  %v824_v33 = vrot.slane %v5360_v15, 2  ;;  %v828_v24 = vrot.slane %v5423_v51, 2 }
  0x59   :  { %v817_v18 = vsel %vm812_vm2, %v814_v61, %v10357_v13  ;;  %v6082_v27 = vpack.i.bf16 %v625_v4, %v623_v46  ;;  %v820_v31 = vsel %vm812_vm2, %v818_v3, %v819_v49  ;;  %v822_v10 = vsel %vm812_vm2, %v819_v49, %v821_v20 }
  0x5a   :  { %v6080_v34 = vpack.i.bf16 %v817_v18, %v815_v53  ;;  %v823_v61 = vrot.slane %v5363_v16, 2  ;;  %v6087_v13 = vpack.i.bf16 %v822_v10, %v820_v31  ;;  %v829_v1 = vrot.slane %v5420_v50, 2 }
  0x5b   :  { %10359 = vst [vmem:[#allocation88_spill] sm:$0xff] %v6082_v27  ;;  %4191 = vrot.lane.b32.xlu0 %v6082_v27, %s5301_s9  ;;  %v831_v9 = vrot.slane %v5426_v52, 2  ;;  %v833_v53 = vrot.slane %v5437_v57, 2  ;;  %v834_v3 = vrot.slane %v5432_v56, 2  ;;  %v10361_v62 = vrot.slane %v5366_v17, 2  ;;  %s5303_s9 = smov 12  }
  0x5c   :  { %10358 = vst [vmem:[#allocation87_spill] sm:$0xff] %v6080_v34  ;;  %10360 = vst [vmem:[#allocation89_spill] sm:$0xff] %v6087_v13  ;;  %4196 = vrot.lane.b32.xlu1 %v6080_v34, %s5302_s10  ;;  %v825_v20 = vsel %vm812_vm2, %v823_v61, %v824_v33  ;;  %v836_v49 = vrot.slane %v5440_v58, 2  ;;  %v838_v46 = vrot.slane %v5462_v6, 2  ;;  %v830_v52 = vsel %vm812_vm2, %v828_v24, %v829_v1  ;;  %v10374_v34 = vld [vmem:[#allocation24_spill] sm:$0xff] }
  0x5d   :  { %v827_v18 = vsel %vm812_vm2, %v824_v33, %v10361_v62  ;;  %v832_v31 = vsel %vm812_vm2, %v829_v1, %v831_v9  ;;  %v835_v10 = vsel %vm812_vm2, %v833_v53, %v834_v3  ;;  %v839_v17 = vrot.slane %v5444_v60, 2 }
  0x5e   :  { %v6105_v4 = vpack.i.bf16 %v827_v18, %v825_v20  ;;  %v6110_v27 = vpack.i.bf16 %v832_v31, %v830_v52  ;;  %v837_v61 = vsel %vm812_vm2, %v834_v3, %v836_v49  ;;  %v841_v33 = vrot.slane %v5465_v7, 2 }
  0x5f   :  { %4201 = vrot.lane.b32.xlu0 %v6087_v13, %s5302_s10  ;;  %v6117_v58 = vpack.i.bf16 %v837_v61, %v835_v10  ;;  %v843_v20 = vrot.slane %v5495_v36, 2  ;;  %v844_v24 = vrot.slane %v5492_v35, 2  ;;  %v846_v1 = vrot.slane %v5498_v39, 2 }
  0x60   :  { %10362 = vst [vmem:[#allocation90_spill] sm:$0xff] %v6105_v4  ;;  %10363 = vst [vmem:[#allocation91_spill] sm:$0xff] %v6110_v27  ;;  %4206 = vrot.lane.b32.xlu1 %v6105_v4, %s5302_s10  ;;  %v840_v9 = vsel %vm812_vm2, %v838_v46, %v839_v17  ;;  %v842_v53 = vsel %vm812_vm2, %v839_v17, %v841_v33  ;;  %v848_v7 = vrot.slane %v5509_v44, 2  ;;  %v849_v3 = vrot.slane %v5504_v43, 2  ;;  %v10382_v4 = vld [vmem:[#allocation28_spill] sm:$0xff] }
  0x61   :  { %10364 = vst [vmem:[#allocation92_spill] sm:$0xff] %v6117_v58  ;;  %v845_v62 = vsel %vm812_vm2, %v843_v20, %v844_v24  ;;  %v847_v18 = vsel %vm812_vm2, %v844_v24, %v846_v1  ;;  %v851_v49 = vrot.slane %v5512_v45, 2  ;;  %v6131_v52 = vpack.i.bf16 %v842_v53, %v840_v9 }
  0x62   :  { %v850_v39 = vsel %vm812_vm2, %v848_v7, %v849_v3  ;;  %v853_v31 = vrot.slane %v5531_v0, 2  ;;  %v854_v46 = vrot.slane %v5528_v63, 2  ;;  %v856_v61 = vrot.slane %v5534_v2, 2 }
  0x63   :  { %10365 = vst [vmem:[#allocation93_spill] sm:$0xff] %v6131_v52  ;;  %4211 = vrot.lane.b32.xlu0 %v6110_v27, %s5302_s10  ;;  %v852_v10 = vsel %vm812_vm2, %v849_v3, %v851_v49  ;;  %v858_v17 = vrot.slane %v5565_v41, 2  ;;  %v859_v33 = vrot.slane %v5562_v40, 2  ;;  %v6144_v45 = vpack.i.bf16 %v847_v18, %v845_v62 }
  0x64   :  { %4216 = vrot.lane.b32.xlu1 %v6117_v58, %s5302_s10  ;;  %v861_v20 = vrot.slane %v5568_v42, 2  ;;  %v863_v24 = vrot.slane %v5579_v55, 2  ;;  %v855_v1 = vsel %vm812_vm2, %v853_v31, %v854_v46  ;;  %v857_v9 = vsel %vm812_vm2, %v854_v46, %v856_v61  ;;  %v10380_v58 = vld [vmem:[#allocation32_spill] sm:$0xff] }
  0x65   :  { %10366 = vst [vmem:[#allocation94_spill] sm:$0xff] %v6144_v45  ;;  %v864_v53 = vrot.slane %v5576_v54, 2  ;;  %v866_v2 = vrot.slane %v5582_v59, 2  ;;  %v6152_v7 = vpack.i.bf16 %v852_v10, %v850_v39  ;;  %v860_v3 = vsel %vm812_vm2, %v858_v17, %v859_v33 }
  0x66   :  { %v862_v49 = vsel %vm812_vm2, %v859_v33, %v861_v20  ;;  %v868_v62 = vrot.slane %v5603_v23, 2  ;;  %v869_v31 = vrot.slane %v5600_v22, 2  ;;  %v871_v46 = vrot.slane %v5613_v30, 2 }
  0x67   :  { %10367 = vst [vmem:[#allocation95_spill] sm:$0xff] %v6152_v7  ;;  %4221 = vrot.lane.b32.xlu0 %v6131_v52, %s5302_s10  ;;  %v865_v42 = vsel %vm812_vm2, %v863_v24, %v864_v53  ;;  %v867_v18 = vsel %vm812_vm2, %v864_v53, %v866_v2  ;;  %v6165_v59 = vpack.i.bf16 %v857_v9, %v855_v1  ;;  %v873_v39 = vrot.slane %v5632_v11, 2  ;;  %v10371_v53 = vld [vmem:[#allocation20_spill] sm:$0xff] }
  0x68   :  { %4226 = vrot.lane.b32.xlu1 %v6144_v45, %s5302_s10  ;;  %v874_v10 = vrot.slane %v5629_v14, 2  ;;  %v876_v61 = vrot.slane %v5635_v12, 2  ;;  %v6170_v17 = vpack.i.bf16 %v862_v49, %v860_v3  ;;  %v6172_v33 = vpack.i.bf16 %v867_v18, %v865_v42  ;;  %v10372_v3 = vld [vmem:[#allocation22_spill] sm:$0xff]  ;;  %v10373_v42 = vld [vmem:[#allocation23_spill] sm:$0xff] }
  0x69   :  { %10368 = vst [vmem:[#allocation96_spill] sm:$0xff] %v6165_v59  ;;  %v878_v20 = vrot.slane %v5651_v47, 2  ;;  %v879_v24 = vrot.slane %v5648_v32, 2  ;;  %v870_v30 = vsel %vm812_vm2, %v868_v62, %v869_v31  ;;  %v872_v1 = vsel %vm812_vm2, %v869_v31, %v871_v46  ;;  %v10376_v31 = vld [vmem:[#allocation31_spill] sm:$0xff] }
  0x6a   :  { %10369 = vst [vmem:[#allocation97_spill] sm:$0xff] %v6170_v17  ;;  %10370 = vst [vmem:[#allocation98_spill] sm:$0xff] %v6172_v33  ;;  %v875_v9 = vsel %vm812_vm2, %v873_v39, %v874_v10  ;;  %v881_v2 = vrot.slane %v10371_v53, 2  ;;  %v877_v12 = vsel %vm812_vm2, %v874_v10, %v876_v61  ;;  %v883_v49 = vrot.slane %v10372_v3, 2  ;;  %v10377_v39 = vld [vmem:[#allocation30_spill] sm:$0xff]  ;;  %v10379_v61 = vld [vmem:[#allocation27_spill] sm:$0xff] }
  0x6b   :  { %4231 = vrot.lane.b32.xlu0 %v6152_v7, %s5302_s10  ;;  %v884_v18 = vrot.slane %v10373_v42, 2  ;;  %v886_v45 = vrot.slane %v10374_v34, 2  ;;  %v6188_v7 = vpack.i.bf16 %v872_v1, %v870_v30  ;;  %v880_v62 = vsel %vm812_vm2, %v878_v20, %v879_v24  ;;  %v10381_v30 = vld [vmem:[#allocation26_spill] sm:$0xff] }
  0x6c   :  { %4236 = vrot.lane.b32.xlu1 %v6165_v59, %s5302_s10  ;;  %v893_v46 = vrot.slane %v10376_v31, 2  ;;  %v894_v52 = vrot.slane %v10377_v39, 2  ;;  %v6195_v53 = vpack.i.bf16 %v877_v12, %v875_v9  ;;  %v882_v10 = vsel %vm812_vm2, %v879_v24, %v881_v2 }
  0x6d   :  { %10375 = vst [vmem:[#allocation20_spill] sm:$0xff] %v6188_v7  ;;  %v888_v59 = vrot.slane %v10379_v61, 2  ;;  %v896_v27 = vrot.slane %v10380_v58, 2  ;;  %v885_v34 = vsel %vm812_vm2, %v883_v49, %v884_v18  ;;  %v887_v20 = vsel %vm812_vm2, %v884_v18, %v886_v45  ;;  %v10386_v49 = vld [vmem:[#allocation35_spill] sm:$0xff]  ;;  %v10387_v45 = vld [vmem:[#allocation34_spill] sm:$0xff] }
  0x6e   :  { %10378 = vst [vmem:[#allocation24_spill] sm:$0xff] %v6195_v53  ;;  %v889_v1 = vrot.slane %v10381_v30, 2  ;;  %v891_v13 = vrot.slane %v10382_v4, 2  ;;  %v895_v9 = vsel %vm812_vm2, %v893_v46, %v894_v52  ;;  %v6212_v58 = vpack.i.bf16 %v882_v10, %v880_v62  ;;  %v10391_v10 = vld [vmem:[#allocation40_spill] sm:$0xff] }
  0x6f   :  { %4241 = vrot.lane.b32.xlu0 %v6170_v17, %s5302_s10  ;;  %v897_v12 = vsel %vm812_vm2, %v894_v52, %v896_v27  ;;  %v6214_v2 = vpack.i.bf16 %v887_v20, %v885_v34  ;;  %v899_v18 = vrot.slane %v10387_v45, 2  ;;  %v10388_v52 = vld [vmem:[#allocation36_spill] sm:$0xff]  ;;  %v906_v34 = vrot.slane %v10391_v10, 2  ;;  %v10392_v20 = vld [vmem:[#allocation41_spill] sm:$0xff] }
  0x70   :  { %4246 = vrot.lane.b32.xlu1 %v6172_v33, %s5302_s10  ;;  %v6208_v24 = vpack.i.bf16 %v897_v12, %v895_v9  ;;  %10384 = vst [vmem:[#allocation28_spill] sm:$0xff] %v6212_v58  ;;  %v898_v33 = vrot.slane %v10386_v49, 2  ;;  %v890_v4 = vsel %vm812_vm2, %v888_v59, %v889_v1  ;;  %v892_v27 = vsel %vm812_vm2, %v889_v1, %v891_v13  ;;  %v10389_v9 = vld [vmem:[#allocation39_spill] sm:$0xff]  ;;  %v10393_v49 = vld [vmem:[#allocation44_spill] sm:$0xff]  ;;  %v10394_v45 = vld [vmem:[#allocation45_spill] sm:$0xff] }
  0x71   :  { %10385 = vst [vmem:[#allocation99_spill] sm:$0xff] %v6214_v2  ;;  %v901_v46 = vrot.slane %v10388_v52, 2  ;;  %v903_v12 = vrot.slane %v10389_v9, 2  ;;  %v908_v17 = vrot.slane %v10392_v20, 2  ;;  %v909_v39 = vrot.slane %v10393_v49, 2  ;;  %v10396_v52 = vld [vmem:[#allocation46_spill] sm:$0xff] }
  0x72   :  { %10383 = vst [vmem:[#allocation32_spill] sm:$0xff] %v6208_v24  ;;  %v911_v31 = vrot.slane %v10394_v45, 2  ;;  %v6231_v59 = vpack.i.bf16 %v892_v27, %v890_v4  ;;  %v900_v13 = vsel %vm812_vm2, %v898_v33, %v899_v18  ;;  %v913_v10 = vrot.slane %v10396_v52, 2  ;;  %v10399_v9 = vld [vmem:[#allocation52_spill] sm:$0xff] }
  0x73   :  { %4251 = vrot.lane.b32.xlu0 %v6188_v7, %s5302_s10  ;;  %v10390_v7 = vld [vmem:[#allocation38_spill] sm:$0xff]  ;;  %v902_v1 = vsel %vm812_vm2, %v899_v18, %v901_v46  ;;  %v918_v33 = vrot.slane %v5843_v29, 2  ;;  %v921_v18 = vrot.slane %v10399_v9, 2  ;;  %vm2438_vm5 = vcmask 97280  }
  0x74   :  { %4256 = vrot.lane.b32.xlu1 %v6195_v53, %s5302_s10  ;;  %v904_v62 = vrot.slane %v10390_v7, 2  ;;  %10395 = vst [vmem:[#allocation36_spill] sm:$0xff] %v6231_v59  ;;  %v10397_v53 = vld [vmem:[#allocation47_spill] sm:$0xff]  ;;  %v910_v7 = vsel %vm812_vm2, %v908_v17, %v909_v39  ;;  %v912_v27 = vsel %vm812_vm2, %v909_v39, %v911_v31  ;;  %vm2977_vm6 = vcmask 1041408  }
  0x75   :  { %v914_v20 = vrot.slane %v10397_v53, 2  ;;  %v10403_v39 = vld [vmem:[#allocation55_spill] sm:$0xff]  ;;  %vm2503_vm7 = vcmask 130048   ;;  %vm2568_vm8 = vcmask 162816   ;;  %vm2633_vm9 = vcmask 195584  }
  0x76   :  { %v905_v49 = vsel %vm812_vm2, %v903_v12, %v904_v62  ;;  %v907_v45 = vsel %vm812_vm2, %v904_v62, %v906_v34  ;;  %v6251_v12 = vpack.i.bf16 %v902_v1, %v900_v13  ;;  %v6259_v62 = vpack.i.bf16 %v912_v27, %v910_v7  ;;  %v10405_v34 = vld [vmem:[#allocation54_spill] sm:$0xff]  ;;  %v10410_v7 = vld [vmem:[#allocation60_spill] sm:$0xff] }
  0x77   :  { %4261 = vrot.lane.b32.xlu0 %v6212_v58, %s5302_s10  ;;  %v10398_v58 = vld [vmem:[#allocation48_spill] sm:$0xff]  ;;  %v6255_v17 = vpack.i.bf16 %v907_v45, %v905_v49  ;;  %v915_v31 = vsel %vm812_vm2, %v913_v10, %v914_v20  ;;  %v10408_v49 = vld [vmem:[#allocation59_spill] sm:$0xff]  ;;  %v931_v27 = vrot.slane %v10410_v7, 2  ;;  %vm2698_vm10 = vcmask 228352  }
  0x78   :  { %4266 = vrot.lane.b32.xlu1 %v6214_v2, %s5302_s10  ;;  %v916_v4 = vrot.slane %v10398_v58, 2  ;;  %v919_v2 = vrot.slane %v5840_v38, 2  ;;  %10401 = vst [vmem:[#allocation45_spill] sm:$0xff] %v6251_v12  ;;  %v923_v58 = vrot.slane %v10403_v39, 2  ;;  %10404 = vst [vmem:[#allocation52_spill] sm:$0xff] %v6259_v62  ;;  %v10406_v38 = vld [vmem:[#allocation56_spill] sm:$0xff] }
  0x79   :  { %10402 = vst [vmem:[#allocation48_spill] sm:$0xff] %v6255_v17  ;;  %v926_v29 = vrot.slane %v10406_v38, 2  ;;  %v928_v45 = vrot.slane %v10408_v49, 2  ;;  %v936_v38 = vrot.slane %v5925_v48, 2  ;;  %vm2763_vm11 = vcmask 261120  }
  0x7a   :  { %v917_v9 = vsel %vm812_vm2, %v914_v20, %v916_v4  ;;  %v920_v13 = vsel %vm812_vm2, %v918_v33, %v919_v2  ;;  %v922_v1 = vsel %vm812_vm2, %v919_v2, %v921_v18  ;;  %v10411_v20 = vld [vmem:[#allocation63_spill] sm:$0xff]  ;;  %vm2880_vm12 = vcmask 293888  }
  0x7b   :  { %v6247_v46 = vpop.permute.xlu0 %4041  ;;  %4271 = vrot.lane.b32.xlu0 %v6231_v59, %s5302_s10  ;;  %v933_v4 = vrot.slane %v10411_v20, 2  ;;  %v6280_v2 = vpack.i.bf16 %v917_v9, %v915_v31  ;;  %v10416_v20 = vld [vmem:[#allocation66_spill] sm:$0xff] }
  0x7c   :  { %10400 = vst [vmem:[#allocation40_spill] sm:$0xff] %v6247_v46  ;;  %4276 = vrot.lane.b32.xlu1 %v6208_v24, %s5302_s10  ;;  %v924_v46 = vrot.slane %v10405_v34, 2  ;;  %v10409_v24 = vld [vmem:[#allocation58_spill] sm:$0xff] }
  0x7d   :  { %v6264_v59 = vpop.permute.xlu1 %4051  ;;  %v929_v10 = vrot.slane %v10409_v24, 2  ;;  %v10412_v34 = vld [vmem:[#allocation62_spill] sm:$0xff]  ;;  %10414 = vst [vmem:[#allocation100_spill] sm:$0xff] %v6280_v2  ;;  %v938_v24 = vrot.slane %v10416_v20, 2 }
  0x7e   :  { %10407 = vst [vmem:[#allocation56_spill] sm:$0xff] %v6264_v59  ;;  %v934_v39 = vrot.slane %v10412_v34, 2  ;;  %v925_v33 = vsel %vm812_vm2, %v923_v58, %v924_v46  ;;  %v927_v18 = vsel %vm812_vm2, %v924_v46, %v926_v29  ;;  %v10417_v34 = vld [vmem:[#allocation65_spill] sm:$0xff]  ;;  %v10418_v58 = vld [vmem:[#allocation67_spill] sm:$0xff] }
  0x7f   :  { %4281 = vrot.lane.b32.xlu0 %v6251_v12, %s5302_s10  ;;  %v6276_v59 = vpop.permute.xlu0 %4046  ;;  %v6284_v12 = vpack.i.bf16 %v922_v1, %v920_v13  ;;  %v930_v7 = vsel %vm812_vm2, %v928_v45, %v929_v10  ;;  %v939_v49 = vrot.slane %v10417_v34, 2  ;;  %v932_v48 = vsel %vm812_vm2, %v929_v10, %v931_v27  ;;  %v10421_v1 = vld [vmem:[#allocation69_spill] sm:$0xff] }
  0x80   :  { %10413 = vst [vmem:[#allocation60_spill] sm:$0xff] %v6276_v59  ;;  %4286 = vrot.lane.b32.xlu1 %v6255_v17, %s5302_s10  ;;  %v935_v31 = vsel %vm812_vm2, %v933_v4, %v934_v39  ;;  %v937_v9 = vsel %vm812_vm2, %v934_v39, %v936_v38  ;;  %v941_v17 = vrot.slane %v10418_v58, 2  ;;  %v6299_v46 = vpack.i.bf16 %v927_v18, %v925_v33  ;;  %v10426_v33 = vld [vmem:[#allocation73_spill] sm:$0xff]  ;;  %v10427_v58 = vld [vmem:[#allocation74_spill] sm:$0xff] }
  0x81   :  { %10415 = vst [vmem:[#allocation101_spill] sm:$0xff] %v6284_v12  ;;  %v943_v13 = vrot.slane %v5963_v37, 2  ;;  %v944_v45 = vrot.slane %v10421_v1, 2  ;;  %v6306_v27 = vpack.i.bf16 %v932_v48, %v930_v7  ;;  %v6308_v39 = vpack.i.bf16 %v937_v9, %v935_v31  ;;  %v10430_v48 = vld [vmem:[#allocation78_spill] sm:$0xff]  ;;  %v10431_v9 = vld [vmem:[#allocation77_spill] sm:$0xff] }
  0x82   :  { %10420 = vst [vmem:[#allocation102_spill] sm:$0xff] %v6299_v46  ;;  %v940_v4 = vsel %vm812_vm2, %v938_v24, %v939_v49  ;;  %v942_v38 = vsel %vm812_vm2, %v939_v49, %v941_v17  ;;  %v948_v18 = vrot.slane %v10426_v33, 2  ;;  %v953_v31 = vrot.slane %v10430_v48, 2  ;;  %v10432_v17 = vld [vmem:[#allocation79_spill] sm:$0xff] }
  0x83   :  { %4291 = vrot.lane.b32.xlu0 %v6259_v62, %s5302_s10  ;;  %v6295_v29 = vpop.permute.xlu1 %4056  ;;  %v10422_v62 = vld [vmem:[#allocation71_spill] sm:$0xff]  ;;  %10424 = vst [vmem:[#allocation103_spill] sm:$0xff] %v6306_v27  ;;  %10425 = vst [vmem:[#allocation104_spill] sm:$0xff] %v6308_v39  ;;  %v945_v7 = vsel %vm812_vm2, %v943_v13, %v944_v45  ;;  %v956_v49 = vrot.slane %v10432_v17, 2  ;;  %v959_v17 = vrot.slane %v6032_v26, 2 }
  0x84   :  { %10419 = vst [vmem:[#allocation67_spill] sm:$0xff] %v6295_v29  ;;  %4296 = vrot.lane.b32.xlu1 %v6280_v2, %s5302_s10  ;;  %v946_v59 = vrot.slane %v10422_v62, 2  ;;  %v949_v2 = vrot.slane %v10427_v58, 2  ;;  %v10428_v29 = vld [vmem:[#allocation75_spill] sm:$0xff] }
  0x85   :  { %v6304_v10 = vpop.permute.xlu0 %4061  ;;  %v951_v1 = vrot.slane %v10428_v29, 2 }
  0x86   :  { %10423 = vst [vmem:[#allocation71_spill] sm:$0xff] %v6304_v10  ;;  %v947_v24 = vsel %vm812_vm2, %v944_v45, %v946_v59  ;;  %v6328_v10 = vpack.i.bf16 %v942_v38, %v940_v4  ;;  %v958_v45 = vrot.slane %v6035_v21, 2  ;;  %v961_v4 = vrot.slane %v6038_v28, 2 }
  0x87   :  { %4301 = vrot.lane.b32.xlu0 %v6284_v12, %s5302_s10  ;;  %v6317_v62 = vpop.permute.xlu1 %4066  ;;  %v954_v12 = vrot.slane %v10431_v9, 2  ;;  %v6330_v29 = vpack.i.bf16 %v947_v24, %v945_v7  ;;  %v963_v7 = vrot.slane %v6060_v25, 2 }
  0x88   :  { %10429 = vst [vmem:[#allocation75_spill] sm:$0xff] %v6317_v62  ;;  %4306 = vrot.lane.b32.xlu1 %v6299_v46, %s5302_s10  ;;  %10433 = vst [vmem:[#allocation79_spill] sm:$0xff] %v6328_v10  ;;  %v950_v62 = vsel %vm812_vm2, %v948_v18, %v949_v2  ;;  %v952_v46 = vsel %vm812_vm2, %v949_v2, %v951_v1  ;;  %v964_v18 = vrot.slane %v6057_v8, 2  ;;  %v966_v2 = vrot.slane %v6063_v5, 2 }
  0x89   :  { %10434 = vst [vmem:[#allocation105_spill] sm:$0xff] %v6330_v29  ;;  %v955_v59 = vsel %vm812_vm2, %v953_v31, %v954_v12  ;;  %v957_v38 = vsel %vm812_vm2, %v954_v12, %v956_v49  ;;  %v6350_v24 = vpack.i.bf16 %v952_v46, %v950_v62  ;;  %v960_v28 = vsel %vm812_vm2, %v958_v45, %v959_v17 }
  0x8a   :  { %v6354_v31 = vpack.i.bf16 %v957_v38, %v955_v59  ;;  %v962_v12 = vsel %vm812_vm2, %v959_v17, %v961_v4  ;;  %v965_v5 = vsel %vm812_vm2, %v963_v7, %v964_v18  ;;  %v10439_v17 = vld [vmem:[#allocation5_spill] sm:$0xff]  ;;  %v6382_v38 = vpack.i.bf16 %v5360_v15, %v5363_v16 }
  0x8b   :  { %4311 = vrot.lane.b32.xlu0 %v6306_v27, %s5302_s10  ;;  %v6334_v13 = vpop.permute.xlu0 %4071  ;;  %10435 = vst [vmem:[#allocation106_spill] sm:$0xff] %v6350_v24  ;;  %v6364_v46 = vpack.i.bf16 %v962_v12, %v960_v28  ;;  %v4350_v4 = vpack.i.bf16 %v5370_v19, %v10439_v17  ;;  %v6405_v12 = vpack.i.bf16 %v5444_v60, %v5462_v6 }
  0x8c   :  { %4316 = vrot.lane.b32.xlu1 %v6308_v39, %s5302_s10  ;;  %10436 = vst [vmem:[#allocation107_spill] sm:$0xff] %v6354_v31  ;;  %v967_v39 = vsel %vm812_vm2, %v964_v18, %v966_v2  ;;  %v6397_v2 = vpack.i.bf16 %v5432_v56, %v5437_v57 }
  0x8d   :  { %v6346_v1 = vpop.permute.xlu1 %4076  ;;  %10437 = vst [vmem:[#allocation108_spill] sm:$0xff] %v6364_v46  ;;  %v6370_v59 = vpack.i.bf16 %v967_v39, %v965_v5  ;;  %v6389_v39 = vpack.i.bf16 %v5420_v50, %v5423_v51  ;;  %10443 = vst [vmem:[#allocation112_spill] sm:$0xff] %v6405_v12  ;;  %v6411_v5 = vpack.i.bf16 %v5492_v35, %v5495_v36 }
  0x8e   :  { %10442 = vst [vmem:[#allocation111_spill] sm:$0xff] %v6397_v2 }
  0x8f   :  { %4321 = vrot.lane.b32.xlu0 %v6328_v10, %s5302_s10  ;;  %10438 = vst [vmem:[#allocation109_spill] sm:$0xff] %v6370_v59  ;;  %10441 = vst [vmem:[#allocation110_spill] sm:$0xff] %v6389_v39  ;;  %v6441_v10 = vpack.i.bf16 %v5576_v54, %v5579_v55 }
  0x90   :  { %4326 = vrot.lane.b32.xlu1 %v6330_v29, %s5302_s10  ;;  %v6358_v49 = vpop.permute.xlu0 %4081  ;;  %10444 = vst [vmem:[#allocation113_spill] sm:$0xff] %v6411_v5  ;;  %v6435_v29 = vpack.i.bf16 %v5562_v40, %v5565_v41 }
  0x91   :  { %10448 = vst [vmem:[#allocation117_spill] sm:$0xff] %v6441_v10 }
  0x92   :  { %10447 = vst [vmem:[#allocation116_spill] sm:$0xff] %v6435_v29 }
  0x93   :  { %4331 = vrot.lane.b32.xlu0 %v6350_v24, %s5302_s10  ;;  %v6366_v62 = vpop.permute.xlu1 %4086 }
  0x94   :  { %4336 = vrot.lane.b32.xlu1 %v6354_v31, %s5302_s10 }
  0x96   :  { %v6372_v45 = vpop.permute.xlu0 %4091 }
  0x97   :  { %4341 = vrot.lane.b32.xlu0 %v6364_v46, %s5302_s10  ;;  %v6425_v46 = vpack.i.bf16 %v5528_v63, %v5531_v0 }
  0x98   :  { %4346 = vrot.lane.b32.xlu1 %v6370_v59, %s5302_s10  ;;  %v6384_v7 = vpop.permute.xlu1 %4096  ;;  %v6419_v59 = vpack.i.bf16 %v5504_v43, %v5509_v44 }
  0x99   :  { %10440 = vst [vmem:[#allocation5_spill] sm:$0xff] %v6384_v7  ;;  %10446 = vst [vmem:[#allocation115_spill] sm:$0xff] %v6425_v46 }
  0x9a   :  { %10445 = vst [vmem:[#allocation114_spill] sm:$0xff] %v6419_v59 }
  0x9b   :  { %4351 = vrot.lane.b32.xlu0 %v4350_v4, %s5303_s9  ;;  %v6391_v18 = vpop.permute.xlu0 %4101 }
  0x9c   :  { %4356 = vrot.lane.b32.xlu1 %v6382_v38, %s5303_s9 }
  0x9e   :  { %v6399_v28 = vpop.permute.xlu1 %4106 }
  0x9f   :  { %4361 = vrot.lane.b32.xlu0 %v6389_v39, %s5303_s9 }
  0xa0   :  { %4366 = vrot.lane.b32.xlu1 %v6397_v2, %s5303_s9  ;;  %v6465_v2 = vpack.i.bf16 %v5629_v14, %v5632_v11 }
  0xa1   :  { %v6413_v4 = vpop.permute.xlu0 %4111 }
  0xa2   :  { %10452 = vst [vmem:[#allocation121_spill] sm:$0xff] %v6465_v2 }
  0xa3   :  { %4371 = vrot.lane.b32.xlu0 %v6405_v12, %s5303_s9  ;;  %v6427_v31 = vpop.permute.xlu1 %4116 }
  0xa4   :  { %4376 = vrot.lane.b32.xlu1 %v6411_v5, %s5303_s9  ;;  %v48_v5 = vld [vmem:[%s9899_s0 + $0xf0] sm:$0xff] }
  0xa6   :  { %v6429_v24 = vpop.permute.xlu0 %4121 }
  0xa7   :  { %4381 = vrot.lane.b32.xlu0 %v6419_v59, %s5303_s9  ;;  %v6451_v59 = vld [vmem:[%s9899_s0 + $0xf8] sm:$0xff] }
  0xa8   :  { %4386 = vrot.lane.b32.xlu1 %v6425_v46, %s5303_s9  ;;  %v6457_v46 = vpack.i.bf16 %v5600_v22, %v5603_v23  ;;  %v10121_v39 = vrot.slane %v6451_v59, 7 }
  0xaa   :  { %v6443_v27 = vpop.permute.xlu1 %4126  ;;  %10450 = vst [vmem:[#allocation119_spill] sm:$0xff] %v6457_v46 }
  0xab   :  { %10449 = vst [vmem:[#allocation118_spill] sm:$0xff] %v6443_v27  ;;  %4391 = vrot.lane.b32.xlu0 %v6435_v29, %s5303_s9  ;;  %v6459_v12 = vpop.permute.xlu0 %4131  ;;  %v195_v27 = vrot.slane %v48_v5, 7  ;;  %v6472_v29 = vpack.i.bf16 %v5648_v32, %v5651_v47  ;;  %v10467_v47 = vld [vmem:[#allocation38_spill] sm:$0xff] }
  0xac   :  { %10451 = vst [vmem:[#allocation120_spill] sm:$0xff] %v6459_v12  ;;  %4396 = vrot.lane.b32.xlu1 %v6441_v10, %s5303_s9  ;;  %v6480_v10 = vpack.i.bf16 %v10373_v42, %v10372_v3 }
  0xad   :  { %10453 = vst [vmem:[#allocation122_spill] sm:$0xff] %v6472_v29  ;;  %v6485_v5 = vsel %vm147_vm0, %v195_v27, %v10121_v39 }
  0xae   :  { %10455 = vst [vmem:[#allocation124_spill] sm:$0xff] %v6480_v10 }
  0xaf   :  { %4401 = vrot.lane.b32.xlu0 %v6457_v46, %s5303_s9  ;;  %v6474_v23 = vpop.permute.xlu1 %4136  ;;  %v6488_v46 = vsel %vm147_vm0, 0.0, %v195_v27  ;;  %v10460_v27 = vld [vmem:[#allocation31_spill] sm:$0xff] }
  0xb0   :  { %10454 = vst [vmem:[#allocation123_spill] sm:$0xff] %v6474_v23  ;;  %4406 = vrot.lane.b32.xlu1 %v6465_v2, %s5303_s9  ;;  %v6496_v2 = vpack.i.bf16 %v10381_v30, %v10379_v61  ;;  %v6502_v23 = vpack.i.bf16 %v6485_v5, %v6488_v46  ;;  %v10463_v61 = vld [vmem:[#allocation35_spill] sm:$0xff]  ;;  %v10464_v30 = vld [vmem:[#allocation34_spill] sm:$0xff] }
  0xb1   :  { %v6490_v12 = vpop.permute.xlu0 %4141 }
  0xb2   :  { %10456 = vst [vmem:[#allocation125_spill] sm:$0xff] %v6490_v12  ;;  %10457 = vst [vmem:[#allocation126_spill] sm:$0xff] %v6496_v2  ;;  %v10461_v12 = vld [vmem:[#allocation30_spill] sm:$0xff] }
  0xb3   :  { %4411 = vrot.lane.b32.xlu0 %v6472_v29, %s5303_s9  ;;  %10458 = vst [vmem:[#allocation127_spill] sm:$0xff] %v6502_v23  ;;  %v6504_v39 = vpop.permute.xlu1 %4146  ;;  %v4430_v3 = vpack.i.bf16 %v10461_v12, %v10460_v27 }
  0xb4   :  { %4416 = vrot.lane.b32.xlu1 %v6480_v10, %s5303_s9  ;;  %10459 = vst [vmem:[#allocation128_spill] sm:$0xff] %v6504_v39  ;;  %v6516_v10 = vpack.i.bf16 %v10464_v30, %v10463_v61  ;;  %v10466_v39 = vld [vmem:[#allocation39_spill] sm:$0xff] }
  0xb5   :  { %v6523_v32 = vpack.i.bf16 %v10467_v47, %v10466_v39  ;;  %v10475_v39 = vld [vmem:[#allocation51_spill] sm:$0xff] }
  0xb6   :  { %10465 = vst [vmem:[#allocation34_spill] sm:$0xff] %v6516_v10 }
  0xb7   :  { %4421 = vrot.lane.b32.xlu0 %v6496_v2, %s5303_s9  ;;  %v6510_v29 = vpop.permute.xlu0 %4151  ;;  %10468 = vst [vmem:[#allocation129_spill] sm:$0xff] %v6523_v32  ;;  %v10469_v2 = vld [vmem:[#allocation41_spill] sm:$0xff] }
  0xb8   :  { %10462 = vst [vmem:[#allocation30_spill] sm:$0xff] %v6510_v29  ;;  %4426 = vrot.lane.b32.xlu1 %v6502_v23, %s5303_s9  ;;  %v10470_v29 = vld [vmem:[#allocation44_spill] sm:$0xff] }
  0xb9   :  { %v6518_v42 = vpop.permute.xlu1 %4156  ;;  %v6529_v27 = vpack.i.bf16 %v10470_v29, %v10469_v2 }
  0xbb   :  { %4431 = vrot.lane.b32.xlu0 %v4430_v3, %s5303_s9  ;;  %10471 = vst [vmem:[#allocation130_spill] sm:$0xff] %v6529_v27  ;;  %v6539_v3 = vpack.i.bf16 %v10397_v53, %v10396_v52  ;;  %v10483_v52 = vld [vmem:[#allocation58_spill] sm:$0xff] }
  0xbc   :  { %4436 = vrot.lane.b32.xlu1 %v6516_v10, %s5303_s9  ;;  %v6531_v23 = vpop.permute.xlu0 %4161  ;;  %v10476_v10 = vld [vmem:[#allocation50_spill] sm:$0xff] }
  0xbd   :  { %10472 = vst [vmem:[#allocation131_spill] sm:$0xff] %v6531_v23  ;;  %10474 = vst [vmem:[#allocation133_spill] sm:$0xff] %v6539_v3  ;;  %v6545_v47 = vpack.i.bf16 %v10476_v10, %v10475_v39  ;;  %v10479_v23 = vld [vmem:[#allocation55_spill] sm:$0xff] }
  0xbe   :  { %v10487_v39 = vld [vmem:[#allocation63_spill] sm:$0xff] }
  0xbf   :  { %4441 = vrot.lane.b32.xlu0 %v6523_v32, %s5303_s9  ;;  %v6535_v61 = vpop.permute.xlu1 %4166  ;;  %10477 = vst [vmem:[#allocation134_spill] sm:$0xff] %v6545_v47  ;;  %v10480_v32 = vld [vmem:[#allocation54_spill] sm:$0xff] }
  0xc0   :  { %10473 = vst [vmem:[#allocation132_spill] sm:$0xff] %v6535_v61  ;;  %4446 = vrot.lane.b32.xlu1 %v6529_v27, %s5303_s9  ;;  %v6553_v29 = vpack.i.bf16 %v10480_v32, %v10479_v23  ;;  %v10482_v61 = vld [vmem:[#allocation59_spill] sm:$0xff] }
  0xc1   :  { %v6559_v53 = vpack.i.bf16 %v10483_v52, %v10482_v61  ;;  %v10592_v52 = vld [vmem:[#allocation71_spill] sm:$0xff] }
  0xc2   :  { %v6547_v2 = vpop.permute.xlu0 %4171  ;;  %10481 = vst [vmem:[#allocation136_spill] sm:$0xff] %v6553_v29  ;;  %v4064_v23 = vunpack.i.h.bf16 %v10592_v52 }
  0xc3   :  { %10478 = vst [vmem:[#allocation135_spill] sm:$0xff] %v6547_v2  ;;  %4451 = vrot.lane.b32.xlu0 %v6539_v3, %s5303_s9  ;;  %10484 = vst [vmem:[#allocation137_spill] sm:$0xff] %v6559_v53  ;;  %v10488_v3 = vld [vmem:[#allocation62_spill] sm:$0xff] }
  0xc4   :  { %4456 = vrot.lane.b32.xlu1 %v6545_v47, %s5303_s9  ;;  %v6569_v10 = vpack.i.bf16 %v10488_v3, %v10487_v39  ;;  %v6575_v47 = vpack.i.bf16 %v10417_v34, %v10416_v20  ;;  %v6597_v20 = vpack.i.bf16 %v10427_v58, %v10426_v33 }
  0xc5   :  { %v6561_v27 = vpop.permute.xlu1 %4176 }
  0xc6   :  { %10485 = vst [vmem:[#allocation138_spill] sm:$0xff] %v6561_v27  ;;  %10489 = vst [vmem:[#allocation140_spill] sm:$0xff] %v6569_v10  ;;  %v80_v27 = vld [vmem:[%s9899_s0 + $0x1f0] sm:$0xff] }
  0xc7   :  { %4461 = vrot.lane.b32.xlu0 %v6553_v29, %s5303_s9  ;;  %v6565_v2 = vpop.permute.xlu0 %4181  ;;  %10490 = vst [vmem:[#allocation141_spill] sm:$0xff] %v6575_v47  ;;  %v6585_v29 = vld [vmem:[%s9899_s0 + $0x1f8] sm:$0xff]  ;;  %10494 = vst [vmem:[#allocation144_spill] sm:$0xff] %v6597_v20  ;;  %v243_v3 = vrot.slane %v80_v27, 7  ;;  %s5304_s0 = smov 16  }
  0xc8   :  { %10486 = vst [vmem:[#allocation139_spill] sm:$0xff] %v6565_v2  ;;  %4466 = vrot.lane.b32.xlu1 %v6559_v53, %s5303_s9  ;;  %v10492_v53 = vld [vmem:[#allocation69_spill] sm:$0xff] }
  0xc9   :  { %v6591_v39 = vpack.i.bf16 %v10492_v53, %v5963_v37 }
  0xca   :  { %v6577_v61 = vpop.permute.xlu1 %4186 }
  0xcb   :  { %10491 = vst [vmem:[#allocation142_spill] sm:$0xff] %v6577_v61  ;;  %4471 = vrot.lane.b32.xlu0 %v6569_v10, %s5303_s9  ;;  %10493 = vst [vmem:[#allocation143_spill] sm:$0xff] %v6591_v39  ;;  %v10159_v61 = vrot.slane %v6585_v29, 7  ;;  %v6608_v10 = vpack.i.bf16 %v10431_v9, %v10430_v48 }
  0xcc   :  { %4476 = vrot.lane.b32.xlu1 %v6575_v47, %s5303_s9  ;;  %v6614_v47 = vpack.i.bf16 %v6032_v26, %v6035_v21  ;;  %v10521_v26 = vld [vmem:[#allocation13_spill] sm:$0xff] }
  0xcd   :  { %v6599_v34 = vpop.permute.xlu0 %4191  ;;  %10496 = vst [vmem:[#allocation146_spill] sm:$0xff] %v6608_v10  ;;  %v6621_v27 = vsel %vm147_vm0, %v243_v3, %v10159_v61 }
  0xce   :  { %10495 = vst [vmem:[#allocation145_spill] sm:$0xff] %v6599_v34  ;;  %v6602_v2 = vpop.permute.xlu1 %4196  ;;  %10497 = vst [vmem:[#allocation147_spill] sm:$0xff] %v6614_v47 }
  0xcf   :  { %4481 = vrot.lane.b32.xlu0 %v6591_v39, %s5303_s9  ;;  %10499 = vst [vmem:[#allocation149_spill] sm:$0xff] %v6621_v27  ;;  %v6624_v39 = vsel %vm147_vm0, 0.0, %v243_v3 }
  0xd0   :  { %4486 = vrot.lane.b32.xlu1 %v6597_v20, %s5303_s9  ;;  %10500 = vst [vmem:[#allocation150_spill] sm:$0xff] %v6624_v39  ;;  %v6632_v20 = vpack.i.bf16 %v6057_v8, %v6060_v25  ;;  %v10509_v25 = vld [vmem:[#allocation6_spill] sm:$0xff] }
  0xd1   :  { %v6616_v33 = vpop.permute.xlu0 %4201  ;;  %v10516_v8 = vld [vmem:[#allocation10_spill] sm:$0xff] }
  0xd2   :  { %10498 = vst [vmem:[#allocation148_spill] sm:$0xff] %v6616_v33  ;;  %v6626_v58 = vpop.permute.xlu1 %4206  ;;  %10502 = vst [vmem:[#allocation152_spill] sm:$0xff] %v6632_v20  ;;  %v6638_v33 = vpack.i.bf16 %v6621_v27, %v6624_v39 }
  0xd3   :  { %10501 = vst [vmem:[#allocation151_spill] sm:$0xff] %v6626_v58  ;;  %4491 = vrot.lane.b32.xlu0 %v6608_v10, %s5303_s9 }
  0xd4   :  { %4496 = vrot.lane.b32.xlu1 %v6614_v47, %s5303_s9  ;;  %10503 = vst [vmem:[#allocation153_spill] sm:$0xff] %v6638_v33  ;;  %v10508_v47 = vld [vmem:[#allocation7_spill] sm:$0xff] }
  0xd5   :  { %v6640_v61 = vpop.permute.xlu0 %4211 }
  0xd6   :  { %10504 = vst [vmem:[#allocation154_spill] sm:$0xff] %v6640_v61  ;;  %v6642_v3 = vpop.permute.xlu1 %4216 }
  0xd7   :  { %10505 = vst [vmem:[#allocation155_spill] sm:$0xff] %v6642_v3  ;;  %4501 = vrot.lane.b32.xlu0 %v6632_v20, %s5303_s9  ;;  %v10512_v20 = vld [vmem:[#allocation8_spill] sm:$0xff] }
  0xd8   :  { %4506 = vrot.lane.b32.xlu1 %v6638_v33, %s5303_s9  ;;  %v10513_v33 = vld [vmem:[#allocation9_spill] sm:$0xff] }
  0xd9   :  { %v6648_v10 = vpop.permute.xlu0 %4221 }
  0xda   :  { %10506 = vst [vmem:[#allocation156_spill] sm:$0xff] %v6648_v10  ;;  %v6650_v58 = vpop.permute.xlu1 %4226 }
  0xdb   :  { %10507 = vst [vmem:[#allocation157_spill] sm:$0xff] %v6650_v58  ;;  %4511 = vrot.lane.b32.xlu0 %v10508_v47, %s5304_s0  ;;  %v10517_v47 = vld [vmem:[#allocation11_spill] sm:$0xff] }
  0xdc   :  { %4516 = vrot.lane.b32.xlu1 %v10509_v25, %s5304_s0 }
  0xdd   :  { %v6656_v61 = vpop.permute.xlu0 %4231 }
  0xde   :  { %10510 = vst [vmem:[#allocation7_spill] sm:$0xff] %v6656_v61  ;;  %v6658_v3 = vpop.permute.xlu1 %4236 }
  0xdf   :  { %10511 = vst [vmem:[#allocation6_spill] sm:$0xff] %v6658_v3  ;;  %4521 = vrot.lane.b32.xlu0 %v10512_v20, %s5304_s0  ;;  %v10520_v3 = vld [vmem:[#allocation12_spill] sm:$0xff] }
  0xe0   :  { %4526 = vrot.lane.b32.xlu1 %v10513_v33, %s5304_s0  ;;  %v10591_v33 = vld [vmem:[#allocation3_spill] sm:$0xff] }
  0xe1   :  { %v6664_v10 = vpop.permute.xlu0 %4241 }
  0xe2   :  { %10514 = vst [vmem:[#allocation8_spill] sm:$0xff] %v6664_v10  ;;  %v6666_v58 = vpop.permute.xlu1 %4246 }
  0xe3   :  { %10515 = vst [vmem:[#allocation158_spill] sm:$0xff] %v6666_v58  ;;  %4531 = vrot.lane.b32.xlu0 %v10516_v8, %s5304_s0  ;;  %v10524_v58 = vrot.slane %v6451_v59, 7  ;;  %v10530_v59 = vld [vmem:[#allocation17_spill] sm:$0xff] }
  0xe4   :  { %4536 = vrot.lane.b32.xlu1 %v10517_v47, %s5304_s0  ;;  %v10526_v47 = vld [vmem:[#allocation14_spill] sm:$0xff] }
  0xe5   :  { %v6672_v21 = vpop.permute.xlu0 %4251  ;;  %v6687_v9 = vsel %vm147_vm0, %v10524_v58, 0.0  ;;  %v10531_v58 = vld [vmem:[#allocation21_spill] sm:$0xff] }
  0xe6   :  { %10518 = vst [vmem:[#allocation159_spill] sm:$0xff] %v6672_v21  ;;  %v6674_v61 = vpop.permute.xlu1 %4256  ;;  %10525 = vst [vmem:[#allocation163_spill] sm:$0xff] %v6687_v9  ;;  %v10527_v21 = vld [vmem:[#allocation16_spill] sm:$0xff] }
  0xe7   :  { %10519 = vst [vmem:[#allocation160_spill] sm:$0xff] %v6674_v61  ;;  %4541 = vrot.lane.b32.xlu0 %v10520_v3, %s5304_s0  ;;  %v1350_v3 = vrot.slane %v6488_v46, 1  ;;  %v1351_v61 = vrot.slane %v6485_v5, 1 }
  0xe8   :  { %4546 = vrot.lane.b32.xlu1 %v10521_v26, %s5304_s0 }
  0xe9   :  { %v6680_v48 = vpop.permute.xlu0 %4261 }
  0xea   :  { %10522 = vst [vmem:[#allocation161_spill] sm:$0xff] %v6680_v48  ;;  %v6682_v10 = vpop.permute.xlu1 %4266  ;;  %v1353_v48 = vrot.slane %v6687_v9, 1  ;;  %v10535_v9 = vld [vmem:[#allocation29_spill] sm:$0xff] }
  0xeb   :  { %10523 = vst [vmem:[#allocation162_spill] sm:$0xff] %v6682_v10  ;;  %4551 = vrot.lane.b32.xlu0 %v10526_v47, %s5304_s0 }
  0xec   :  { %4556 = vrot.lane.b32.xlu1 %v10527_v21, %s5304_s0  ;;  %v1352_v21 = vsel %vm470_vm1, %v1350_v3, %v1351_v61  ;;  %v1354_v8 = vsel %vm470_vm1, %v1351_v61, %v1353_v48  ;;  %v10542_v3 = vld [vmem:[#allocation37_spill] sm:$0xff] }
  0xed   :  { %v6695_v26 = vpop.permute.xlu0 %4271 }
  0xee   :  { %10528 = vst [vmem:[#allocation164_spill] sm:$0xff] %v6695_v26  ;;  %v6698_v10 = vpop.permute.xlu1 %4276  ;;  %v10534_v26 = vld [vmem:[#allocation25_spill] sm:$0xff] }
  0xef   :  { %10529 = vst [vmem:[#allocation165_spill] sm:$0xff] %v6698_v10  ;;  %4561 = vrot.lane.b32.xlu0 %v10530_v59, %s5304_s0  ;;  %v6714_v10 = vpack.i.bf16 %v1354_v8, %v1352_v21  ;;  %v10543_v21 = vld [vmem:[#allocation42_spill] sm:$0xff] }
  0xf0   :  { %4566 = vrot.lane.b32.xlu1 %v10531_v58, %s5304_s0  ;;  %v10539_v58 = vld [vmem:[#allocation33_spill] sm:$0xff] }
  0xf1   :  { %v6704_v47 = vpop.permute.xlu0 %4281  ;;  %10536 = vst [vmem:[#allocation168_spill] sm:$0xff] %v6714_v10 }
  0xf2   :  { %10532 = vst [vmem:[#allocation166_spill] sm:$0xff] %v6704_v47  ;;  %v6708_v37 = vpop.permute.xlu1 %4286  ;;  %v10588_v47 = vld [vmem:[#allocation67_spill] sm:$0xff] }
  0xf3   :  { %10533 = vst [vmem:[#allocation167_spill] sm:$0xff] %v6708_v37  ;;  %4571 = vrot.lane.b32.xlu0 %v10534_v26, %s5304_s0  ;;  %v10546_v26 = vld [vmem:[#allocation43_spill] sm:$0xff]  ;;  %v10587_v37 = vld [vmem:[#allocation93_spill] sm:$0xff] }
  0xf4   :  { %4576 = vrot.lane.b32.xlu1 %v10535_v9, %s5304_s0 }
  0xf5   :  { %v6716_v59 = vpop.permute.xlu0 %4291 }
  0xf6   :  { %10537 = vst [vmem:[#allocation169_spill] sm:$0xff] %v6716_v59  ;;  %v6718_v53 = vpop.permute.xlu1 %4296 }
  0xf7   :  { %10538 = vst [vmem:[#allocation170_spill] sm:$0xff] %v6718_v53  ;;  %4581 = vrot.lane.b32.xlu0 %v10539_v58, %s5304_s0  ;;  %v10547_v58 = vld [vmem:[#allocation49_spill] sm:$0xff] }
  0xf8   :  { %4586 = vrot.lane.b32.xlu1 %v6714_v10, %s5304_s0 }
  0xf9   :  { %v6724_v61 = vpop.permute.xlu0 %4301 }
  0xfa   :  { %10540 = vst [vmem:[#allocation171_spill] sm:$0xff] %v6724_v61  ;;  %v6726_v48 = vpop.permute.xlu1 %4306 }
  0xfb   :  { %10541 = vst [vmem:[#allocation172_spill] sm:$0xff] %v6726_v48  ;;  %4591 = vrot.lane.b32.xlu0 %v10542_v3, %s5304_s0  ;;  %v10550_v48 = vld [vmem:[#allocation53_spill] sm:$0xff] }
  0xfc   :  { %4596 = vrot.lane.b32.xlu1 %v10543_v21, %s5304_s0  ;;  %v10551_v3 = vld [vmem:[#allocation57_spill] sm:$0xff] }
  0xfd   :  { %v6732_v8 = vpop.permute.xlu0 %4311 }
  0xfe   :  { %10544 = vst [vmem:[#allocation37_spill] sm:$0xff] %v6732_v8  ;;  %v6734_v9 = vpop.permute.xlu1 %4316 }
  0xff   :  { %10545 = vst [vmem:[#allocation173_spill] sm:$0xff] %v6734_v9  ;;  %4601 = vrot.lane.b32.xlu0 %v10546_v26, %s5304_s0  ;;  %v10554_v9 = vld [vmem:[#allocation61_spill] sm:$0xff]  ;;  %v10555_v26 = vld [vmem:[#allocation64_spill] sm:$0xff] }
 0x100   :  { %4606 = vrot.lane.b32.xlu1 %v10547_v58, %s5304_s0 }
 0x101   :  { %v6740_v10 = vpop.permute.xlu0 %4321 }
 0x102   :  { %10548 = vst [vmem:[#allocation174_spill] sm:$0xff] %v6740_v10  ;;  %v6742_v61 = vpop.permute.xlu1 %4326 }
 0x103   :  { %10549 = vst [vmem:[#allocation175_spill] sm:$0xff] %v6742_v61  ;;  %4611 = vrot.lane.b32.xlu0 %v10550_v48, %s5304_s0  ;;  %v10558_v61 = vrot.slane %v6585_v29, 7  ;;  %v10564_v29 = vld [vmem:[#allocation76_spill] sm:$0xff] }
 0x104   :  { %4616 = vrot.lane.b32.xlu1 %v10551_v3, %s5304_s0  ;;  %v10560_v3 = vld [vmem:[#allocation68_spill] sm:$0xff] }
 0x105   :  { %v6748_v21 = vpop.permute.xlu0 %4331  ;;  %v6763_v48 = vsel %vm147_vm0, %v10558_v61, 0.0  ;;  %v10565_v61 = vld [vmem:[#allocation80_spill] sm:$0xff] }
 0x106   :  { %10552 = vst [vmem:[#allocation176_spill] sm:$0xff] %v6748_v21  ;;  %v6750_v8 = vpop.permute.xlu1 %4336  ;;  %10559 = vst [vmem:[#allocation180_spill] sm:$0xff] %v6763_v48  ;;  %v1356_v21 = vrot.slane %v6621_v27, 1  ;;  %v10568_v27 = vld [vmem:[#allocation83_spill] sm:$0xff] }
 0x107   :  { %10553 = vst [vmem:[#allocation177_spill] sm:$0xff] %v6750_v8  ;;  %4621 = vrot.lane.b32.xlu0 %v10554_v9, %s5304_s0  ;;  %v10561_v8 = vld [vmem:[#allocation72_spill] sm:$0xff]  ;;  %v1355_v9 = vrot.slane %v6624_v39, 1 }
 0x108   :  { %4626 = vrot.lane.b32.xlu1 %v10555_v26, %s5304_s0 }
 0x109   :  { %v6756_v58 = vpop.permute.xlu0 %4341 }
 0x10a   :  { %10556 = vst [vmem:[#allocation178_spill] sm:$0xff] %v6756_v58  ;;  %v6758_v10 = vpop.permute.xlu1 %4346  ;;  %v1358_v58 = vrot.slane %v6763_v48, 1  ;;  %v10569_v48 = vld [vmem:[#allocation86_spill] sm:$0xff] }
 0x10b   :  { %10557 = vst [vmem:[#allocation179_spill] sm:$0xff] %v6758_v10  ;;  %4631 = vrot.lane.b32.xlu0 %v10560_v3, %s5304_s0 }
 0x10c   :  { %4636 = vrot.lane.b32.xlu1 %v10561_v8, %s5304_s0  ;;  %v1357_v8 = vsel %vm470_vm1, %v1355_v9, %v1356_v21  ;;  %v1359_v39 = vsel %vm470_vm1, %v1356_v21, %v1358_v58  ;;  %v10576_v21 = vld [vmem:[#allocation89_spill] sm:$0xff] }
 0x10d   :  { %v6771_v26 = vpop.permute.xlu0 %4351 }
 0x10e   :  { %10562 = vst [vmem:[#allocation181_spill] sm:$0xff] %v6771_v26  ;;  %v6774_v10 = vpop.permute.xlu1 %4356 }
 0x10f   :  { %10563 = vst [vmem:[#allocation182_spill] sm:$0xff] %v6774_v10  ;;  %4641 = vrot.lane.b32.xlu0 %v10564_v29, %s5304_s0  ;;  %v6790_v10 = vpack.i.bf16 %v1359_v39, %v1357_v8  ;;  %v10577_v39 = vld [vmem:[#allocation90_spill] sm:$0xff] }
 0x110   :  { %4646 = vrot.lane.b32.xlu1 %v10565_v61, %s5304_s0  ;;  %v10573_v61 = vld [vmem:[#allocation88_spill] sm:$0xff] }
 0x111   :  { %v6780_v3 = vpop.permute.xlu0 %4361  ;;  %10570 = vst [vmem:[#allocation185_spill] sm:$0xff] %v6790_v10 }
 0x112   :  { %10566 = vst [vmem:[#allocation183_spill] sm:$0xff] %v6780_v3  ;;  %v6784_v53 = vpop.permute.xlu1 %4366 }
 0x113   :  { %10567 = vst [vmem:[#allocation184_spill] sm:$0xff] %v6784_v53  ;;  %4651 = vrot.lane.b32.xlu0 %v10568_v27, %s5304_s0  ;;  %v10582_v27 = vld [vmem:[#allocation40_spill] sm:$0xff] }
 0x114   :  { %4656 = vrot.lane.b32.xlu1 %v10569_v48, %s5304_s0 }
 0x115   :  { %v6792_v29 = vpop.permute.xlu0 %4371 }
 0x116   :  { %10571 = vst [vmem:[#allocation186_spill] sm:$0xff] %v6792_v29  ;;  %v6794_v26 = vpop.permute.xlu1 %4376 }
 0x117   :  { %10572 = vst [vmem:[#allocation187_spill] sm:$0xff] %v6794_v26  ;;  %4661 = vrot.lane.b32.xlu0 %v10573_v61, %s5304_s0  ;;  %v10580_v61 = vld [vmem:[#allocation91_spill] sm:$0xff] }
 0x118   :  { %4666 = vrot.lane.b32.xlu1 %v6790_v10, %s5304_s0  ;;  %v10581_v10 = vld [vmem:[#allocation92_spill] sm:$0xff] }
 0x119   :  { %v6800_v9 = vpop.permute.xlu0 %4381 }
 0x11a   :  { %10574 = vst [vmem:[#allocation188_spill] sm:$0xff] %v6800_v9  ;;  %v6802_v58 = vpop.permute.xlu1 %4386  ;;  %v4044_v9 = vunpack.i.h.bf16 %v10582_v27 }
 0x11b   :  { %10575 = vst [vmem:[#allocation189_spill] sm:$0xff] %v6802_v58  ;;  %4671 = vrot.lane.b32.xlu0 %v10576_v21, %s5305_s19  ;;  %v4043_v58 = vunpack.i.l.bf16 %v10582_v27  ;;  %v10584_v21 = vld [vmem:[#allocation56_spill] sm:$0xff]  ;;  %v10589_v27 = vld [vmem:[#allocation94_spill] sm:$0xff] }
 0x11c   :  { %4676 = vrot.lane.b32.xlu1 %v10577_v39, %s5305_s19  ;;  %v4054_v29 = vunpack.i.h.bf16 %v10584_v21  ;;  %v4053_v53 = vunpack.i.l.bf16 %v10584_v21 }
 0x11d   :  { %v6808_v8 = vpop.permute.xlu0 %4391  ;;  %v2313_v21 = vsel %vm2312_vm3, %v10591_v33, %v4043_v58  ;;  %v10669_v33 = vld [vmem:[#allocation112_spill] sm:$0xff] }
 0x11e   :  { %10578 = vst [vmem:[#allocation89_spill] sm:$0xff] %v6808_v8  ;;  %v6810_v48 = vpop.permute.xlu1 %4396 }
 0x11f   :  { %10579 = vst [vmem:[#allocation90_spill] sm:$0xff] %v6810_v48  ;;  %4681 = vrot.lane.b32.xlu0 %v10580_v61, %s5305_s19  ;;  %v10586_v48 = vld [vmem:[#allocation60_spill] sm:$0xff] }
 0x120   :  { %4686 = vrot.lane.b32.xlu1 %v10581_v10, %s5305_s19  ;;  %v4049_v3 = vunpack.i.h.bf16 %v10586_v48  ;;  %v4048_v59 = vunpack.i.l.bf16 %v10586_v48  ;;  %v4059_v10 = vunpack.i.h.bf16 %v10588_v47  ;;  %v6841_v48 = vsel %vm2312_vm3, %v5360_v15, %v4054_v29  ;;  %v10598_v29 = vld [vmem:[#allocation95_spill] sm:$0xff] }
 0x121   :  { %v6818_v26 = vpop.permute.xlu0 %4401  ;;  %10593 = vst [vmem:[#allocation60_spill] sm:$0xff] %v6841_v48 }
 0x122   :  { %10583 = vst [vmem:[#allocation40_spill] sm:$0xff] %v6818_v26  ;;  %v6822_v8 = vpop.permute.xlu1 %4406  ;;  %v10590_v26 = vld [vmem:[#allocation2_spill] sm:$0xff]  ;;  %v6857_v58 = vsel %vm2312_vm3, %v10439_v17, %v4048_v59  ;;  %v6876_v59 = vsel %vm2312_vm3, %v5432_v56, %v4064_v23  ;;  %v4084_v56 = vunpack.i.h.bf16 %v6358_v49  ;;  %v4083_v23 = vunpack.i.l.bf16 %v6358_v49 }
 0x123   :  { %10585 = vst [vmem:[#allocation56_spill] sm:$0xff] %v6822_v8  ;;  %4691 = vrot.lane.b32.xlu0 %v10587_v37, %s5305_s19  ;;  %v2314_v34 = vsel %vm2312_vm3, %v10590_v26, %v4044_v9  ;;  %v4058_v8 = vunpack.i.l.bf16 %v10588_v47  ;;  %v6845_v37 = vsel %vm2312_vm3, %v5363_v16, %v4053_v53  ;;  %v10595_v9 = vld [vmem:[#allocation75_spill] sm:$0xff]  ;;  %v6853_v47 = vsel %vm2312_vm3, %v5370_v19, %v4049_v3  ;;  %v10600_v19 = vld [vmem:[#allocation96_spill] sm:$0xff] }
 0x124   :  { %4696 = vrot.lane.b32.xlu1 %v10589_v27, %s5305_s19  ;;  %10594 = vst [vmem:[#allocation67_spill] sm:$0xff] %v6845_v37  ;;  %v4063_v27 = vunpack.i.l.bf16 %v10592_v52  ;;  %v4069_v26 = vunpack.i.h.bf16 %v10595_v9  ;;  %10596 = vst [vmem:[#allocation71_spill] sm:$0xff] %v6853_v47  ;;  %v4068_v15 = vunpack.i.l.bf16 %v10595_v9  ;;  %v6864_v16 = vsel %vm2312_vm3, %v5420_v50, %v4059_v10  ;;  %v10664_v37 = vld [vmem:[#allocation59_spill] sm:$0xff] }
 0x125   :  { %v6837_v32 = vpop.permute.xlu0 %4411  ;;  %10597 = vst [vmem:[#allocation75_spill] sm:$0xff] %v6857_v58  ;;  %10599 = vst [vmem:[#allocation95_spill] sm:$0xff] %v6864_v16  ;;  %v4074_v53 = vunpack.i.h.bf16 %v6334_v13  ;;  %v4073_v52 = vunpack.i.l.bf16 %v6334_v13  ;;  %v6872_v17 = vsel %vm2312_vm3, %v5423_v51, %v4058_v8  ;;  %v4079_v3 = vunpack.i.h.bf16 %v6346_v1  ;;  %v5295_v13 = vld [vmem:[%s9900_s1] sm:$0xff]   ;;  %v10653_v16 = vld [vmem:[#allocation47_spill] sm:$0xff] }
 0x126   :  { %v6849_v61 = vpop.permute.xlu1 %4416  ;;  %10601 = vst [vmem:[#allocation96_spill] sm:$0xff] %v6872_v17  ;;  %10602 = vst [vmem:[#allocation190_spill] sm:$0xff] %v6876_v59  ;;  %v4078_v50 = vunpack.i.l.bf16 %v6346_v1  ;;  %v6887_v9 = vsel %vm2312_vm3, %v5437_v57, %v4063_v27  ;;  %v6891_v51 = vsel %vm2312_vm3, %v5444_v60, %v4069_v26  ;;  %v6899_v1 = vsel %vm2312_vm3, %v5462_v6, %v4068_v15  ;;  %v10606_v57 = vld [vmem:[#allocation97_spill] sm:$0xff]  ;;  %v10609_v6 = vld [vmem:[#allocation98_spill] sm:$0xff] }
 0x127   :  { %4701 = vrot.lane.b32.xlu0 %v10598_v29, %s5305_s19  ;;  %10603 = vst [vmem:[#allocation191_spill] sm:$0xff] %v6887_v9  ;;  %10604 = vst [vmem:[#allocation192_spill] sm:$0xff] %v6891_v51  ;;  %v4199_v59 = vunpack.i.h.bf16 %v6602_v2  ;;  %v4198_v17 = vunpack.i.l.bf16 %v6602_v2  ;;  %3953 = vmatprep.subr.bf16.mxu0 %v5295_v13  ;;  %v6907_v60 = vsel %vm2312_vm3, %v5492_v35, %v4074_v53  ;;  %v4089_v35 = vunpack.i.h.bf16 %v6366_v62  ;;  %v10649_v51 = vld [vmem:[#allocation39_spill] sm:$0xff] }
 0x128   :  { %4706 = vrot.lane.b32.xlu1 %v10600_v19, %s5305_s19  ;;  %10605 = vst [vmem:[#allocation193_spill] sm:$0xff] %v6899_v1  ;;  %10607 = vst [vmem:[#allocation97_spill] sm:$0xff] %v6907_v60  ;;  %v6911_v26 = vsel %vm2312_vm3, %v5495_v36, %v4073_v52  ;;  %3954 = vmatpush3.bf16.msra.mxu0 %v5295_v13  ;;  %v6917_v49 = vsel %vm2312_vm3, %v5504_v43, %v4079_v3  ;;  %v4088_v27 = vunpack.i.l.bf16 %v6366_v62  ;;  %v5296_v36 = vld [vmem:[%s9900_s1 + $0x8] sm:$0xff]  }
 0x129   :  { %v6880_v10 = vpop.permute.xlu0 %4421  ;;  %10608 = vst [vmem:[#allocation194_spill] sm:$0xff] %v6911_v26  ;;  %10610 = vst [vmem:[#allocation98_spill] sm:$0xff] %v6917_v49  ;;  %v6921_v2 = vsel %vm2312_vm3, %v5509_v44, %v4078_v50  ;;  %4023 = vmatprep.subr.bf16.mxu1 %v5295_v13  ;;  %v6930_v53 = vsel %vm2312_vm3, %v5528_v63, %v4084_v56  ;;  %v6934_v43 = vsel %vm2312_vm3, %v5531_v0, %v4083_v23 }
 0x12a   :  { %v6895_v8 = vpop.permute.xlu1 %4426  ;;  %10611 = vst [vmem:[#allocation195_spill] sm:$0xff] %v6921_v2  ;;  %10612 = vst [vmem:[#allocation196_spill] sm:$0xff] %v6930_v53  ;;  %4026 = vmatpush3.bf16.msra.mxu1 %v5295_v13  ;;  %v6939_v62 = vsel %vm2375_vm4, %v2314_v34, %v4199_v59  ;;  %v6942_v50 = vsel %vm2375_vm4, %v2313_v21, %v4198_v17  ;;  %v10616_v2 = vld [vmem:[#allocation20_spill] sm:$0xff]  ;;  %3955 = vmatprep.subr.bf16.mxu0 %v5296_v36  ;;  %v4094_v59 = vunpack.i.h.bf16 %v6372_v45 }
 0x12b   :  { %4711 = vrot.lane.b32.xlu0 %v10606_v57, %s5305_s19  ;;  %10613 = vst [vmem:[#allocation197_spill] sm:$0xff] %v6934_v43  ;;  %10614 = vst [vmem:[#allocation198_spill] sm:$0xff] %v6939_v62  ;;  %v10619_v34 = vld [vmem:[#allocation24_spill] sm:$0xff]  ;;  %v6959_v21 = vsel %vm2312_vm3, %v5562_v40, %v4089_v35  ;;  %v6963_v17 = vsel %vm2312_vm3, %v5565_v41, %v4088_v27  ;;  %v4093_v56 = vunpack.i.l.bf16 %v6372_v45  ;;  %4024 = vmatprep.subr.bf16.mxu1 %v5296_v36  ;;  %v10645_v43 = vld [vmem:[#allocation30_spill] sm:$0xff] }
 0x12c   :  { %4716 = vrot.lane.b32.xlu1 %v10609_v6, %s5305_s19  ;;  %10615 = vst [vmem:[#allocation199_spill] sm:$0xff] %v6942_v50  ;;  %3956 = vmatpush3.bf16.msra.mxu0 %v5296_v36  ;;  %10620 = vst [vmem:[#allocation202_spill] sm:$0xff] %v6959_v21  ;;  %v4104_v40 = vunpack.i.h.bf16 %v6391_v18  ;;  %v4103_v35 = vunpack.i.l.bf16 %v6391_v18  ;;  %v4109_v41 = vunpack.i.h.bf16 %v6399_v28  ;;  %v4108_v45 = vunpack.i.l.bf16 %v6399_v28  ;;  %v10624_v27 = vld [vmem:[#allocation28_spill] sm:$0xff] }
 0x12d   :  { %v4432_v15 = vpop.permute.xlu0 %4431  ;;  %10621 = vst [vmem:[#allocation203_spill] sm:$0xff] %v6963_v17  ;;  %v4119_v18 = vunpack.i.h.bf16 %v6427_v31  ;;  %v6991_v28 = vsel %vm2312_vm3, %v5576_v54, %v4094_v59  ;;  %v4118_v21 = vunpack.i.l.bf16 %v6427_v31  ;;  %v4154_v49 = vunpack.i.h.bf16 %v10645_v43 }
 0x12e   :  { %v4434_v44 = vunpack.i.h.bf16 %v4432_v15  ;;  %v4433_v52 = vunpack.i.l.bf16 %v4432_v15  ;;  %v6936_v3 = vpop.permute.xlu1 %4436  ;;  %v5297_v15 = vld [vmem:[%s9900_s1 + $0x10] ss:$0 sps:$4 sm:$0x33]   ;;  %4027 = vmatpush3.bf16.msra.mxu1 %v5296_v36  ;;  %s5306_s1 = smov 24   ;;  %10625 = vst [vmem:[#allocation206_spill] sm:$0xff] %v6991_v28  ;;  %v6995_v36 = vsel %vm2312_vm3, %v5579_v55, %v4093_v56  ;;  %v7009_v54 = vsel %vm2312_vm3, %v5629_v14, %v4104_v40  ;;  %v10630_v56 = vld [vmem:[#allocation18_spill] sm:$0xff] }
 0x12f   :  { %4721 = vrot.lane.b32.xlu0 %v10616_v2, %s5305_s19  ;;  %4029 = vmatprep.subr.msk.bf16.mxu0 %vm2977_vm6, %v5297_v15  ;;  %v2979_v63 = vsel %vm2977_vm6, %v5297_v15, 0  ;;  %10626 = vst [vmem:[#allocation207_spill] sm:$0xff] %v6995_v36  ;;  %v4123_v55 = vunpack.i.l.bf16 %v6429_v24  ;;  %v7016_v31 = vsel %vm2312_vm3, %v5632_v11, %v4103_v35  ;;  %v10632_v14 = vld [vmem:[#allocation110_spill] sm:$0xff]  ;;  %v10633_v40 = vld [vmem:[#allocation23_spill] sm:$0xff]  ;;  %v10644_v36 = vld [vmem:[#allocation128_spill] sm:$0xff]  ;;  %v4159_v60 = vunpack.i.h.bf16 %v6518_v42 }
 0x130   :  { %v6949_v0 = vsel %vm2438_vm5, %v6939_v62, %v4434_v44  ;;  %v6953_v13 = vsel %vm2438_vm5, %v6942_v50, %v4433_v52  ;;  %4726 = vrot.lane.b32.xlu1 %v10619_v34, %s5305_s19  ;;  %v4099_v44 = vunpack.i.h.bf16 %v6384_v7  ;;  %v4114_v50 = vunpack.i.h.bf16 %v6413_v4  ;;  %3958 = vmatpush3.bf16.msra.mxu0 %v2979_v63  ;;  %v10635_v11 = vld [vmem:[#allocation26_spill] sm:$0xff] }
 0x131   :  { %10617 = vst [vmem:[#allocation200_spill] sm:$0xff] %v6949_v0  ;;  %10618 = vst [vmem:[#allocation201_spill] sm:$0xff] %v6953_v13  ;;  %v6967_v23 = vpop.permute.xlu0 %4441  ;;  %v4113_v62 = vunpack.i.l.bf16 %v6413_v4  ;;  %v4124_v4 = vunpack.i.h.bf16 %v6429_v24  ;;  %4030 = vmatprep.subr.msk.bf16.mxu1 %vm2977_vm6, %v5297_v15  ;;  %v7020_v15 = vsel %vm2312_vm3, %v10630_v56, %v4109_v41  ;;  %v7038_v35 = vsel %vm2312_vm3, %v10635_v11, %v4119_v18  ;;  %v10636_v41 = vld [vmem:[#allocation27_spill] sm:$0xff]  ;;  %v10637_v56 = vld [vmem:[#allocation118_spill] sm:$0xff] }
 0x132   :  { %10622 = vst [vmem:[#allocation204_spill] sm:$0xff] %v6967_v23  ;;  %v6975_v52 = vpop.permute.xlu1 %4446  ;;  %4028 = vmatpush3.bf16.msra.mxu1 %v2979_v63  ;;  %v7030_v24 = vsel %vm2312_vm3, %v10633_v40, %v4114_v50  ;;  %v10634_v63 = vld [vmem:[#allocation22_spill] sm:$0xff]  ;;  %v10639_v18 = vld [vmem:[#allocation31_spill] sm:$0xff] }
 0x133   :  { %10623 = vst [vmem:[#allocation205_spill] sm:$0xff] %v6975_v52  ;;  %4731 = vrot.lane.b32.xlu0 %v10624_v27, %s5305_s19  ;;  %v7034_v17 = vsel %vm2312_vm3, %v10634_v63, %v4113_v62  ;;  %v7048_v50 = vsel %vm2312_vm3, %v10461_v12, %v4124_v4  ;;  %v4128_v62 = vunpack.i.l.bf16 %v10637_v56  ;;  %v7056_v40 = vsel %vm2312_vm3, %v10639_v18, %v4123_v55  ;;  %v10640_v63 = vld [vmem:[#allocation120_spill] sm:$0xff]  ;;  %v10643_v4 = vld [vmem:[#allocation125_spill] sm:$0xff]  ;;  %v10671_v27 = vld [vmem:[#allocation142_spill] sm:$0xff] }
 0x134   :  { %4736 = vrot.lane.b32.xlu1 %v6382_v38, %s5306_s1  ;;  %v7004_v38 = vsel %vm2312_vm3, %v5600_v22, %v4099_v44  ;;  %v10631_v22 = vld [vmem:[#allocation19_spill] sm:$0xff]  ;;  %v4133_v11 = vunpack.i.l.bf16 %v10640_v63  ;;  %v4144_v28 = vunpack.i.h.bf16 %v10643_v4  ;;  %v4149_v55 = vunpack.i.h.bf16 %v10644_v36 }
 0x135   :  { %v6999_v53 = vpop.permute.xlu0 %4451  ;;  %10628 = vst [vmem:[#allocation209_spill] sm:$0xff] %v7004_v38  ;;  %v7024_v44 = vsel %vm2312_vm3, %v10631_v22, %v4108_v45  ;;  %v7044_v45 = vsel %vm2312_vm3, %v10636_v41, %v4118_v21  ;;  %v4129_v22 = vunpack.i.h.bf16 %v10637_v56  ;;  %v10641_v21 = vld [vmem:[#allocation123_spill] sm:$0xff]  ;;  %v4143_v56 = vunpack.i.l.bf16 %v10643_v4 }
 0x136   :  { %10627 = vst [vmem:[#allocation208_spill] sm:$0xff] %v6999_v53  ;;  %v7012_v59 = vpop.permute.xlu1 %4456  ;;  %v4139_v41 = vunpack.i.h.bf16 %v10641_v21  ;;  %v4138_v12 = vunpack.i.l.bf16 %v10641_v21  ;;  %v4148_v18 = vunpack.i.l.bf16 %v10644_v36  ;;  %v10646_v21 = vld [vmem:[#allocation35_spill] sm:$0xff]  ;;  %v10648_v36 = vld [vmem:[#allocation38_spill] sm:$0xff] }
 0x137   :  { %10629 = vst [vmem:[#allocation210_spill] sm:$0xff] %v7012_v59  ;;  %4741 = vrot.lane.b32.xlu0 %v10632_v14, %s5306_s1  ;;  %v7079_v4 = vsel %vm2312_vm3, %v10646_v21, %v4128_v62  ;;  %v4158_v62 = vunpack.i.l.bf16 %v6518_v42  ;;  %v10678_v53 = vld [vmem:[#allocation66_spill] sm:$0xff] }
 0x138   :  { %4746 = vrot.lane.b32.xlu1 %v10509_v25, %s5307_s26  ;;  %v4134_v25 = vunpack.i.h.bf16 %v10640_v63  ;;  %v7075_v63 = vsel %vm2312_vm3, %v10464_v30, %v4129_v22  ;;  %v10650_v30 = vld [vmem:[#allocation44_spill] sm:$0xff] }
 0x139   :  { %v7052_v14 = vpop.permute.xlu0 %4461  ;;  %v7095_v22 = vsel %vm2312_vm3, %v10650_v30, %v4139_v41  ;;  %v10656_v41 = vld [vmem:[#allocation50_spill] sm:$0xff]  ;;  %v10657_v30 = vld [vmem:[#allocation51_spill] sm:$0xff] }
 0x13a   :  { %10638 = vst [vmem:[#allocation18_spill] sm:$0xff] %v7052_v14  ;;  %v7061_v38 = vpop.permute.xlu1 %4466  ;;  %v7087_v1 = vsel %vm2312_vm3, %v10648_v36, %v4134_v25  ;;  %v7106_v25 = vsel %vm2312_vm3, %v10653_v16, %v4144_v28  ;;  %v10654_v36 = vld [vmem:[#allocation46_spill] sm:$0xff]  ;;  %v7116_v42 = vsel %vm2312_vm3, %v10656_v41, %v4149_v55  ;;  %v7120_v48 = vsel %vm2312_vm3, %v10657_v30, %v4148_v18  ;;  %v10659_v16 = vld [vmem:[#allocation111_spill] sm:$0xff] }
 0x13b   :  { %10642 = vst [vmem:[#allocation19_spill] sm:$0xff] %v7061_v38  ;;  %4751 = vrot.lane.b32.xlu0 %v10512_v20, %s5307_s26  ;;  %v4153_v20 = vunpack.i.l.bf16 %v10645_v43  ;;  %v10652_v43 = vld [vmem:[#allocation41_spill] sm:$0xff]  ;;  %v10660_v28 = vld [vmem:[#allocation55_spill] sm:$0xff] }
 0x13c   :  { %4756 = vrot.lane.b32.xlu1 %v10577_v39, %s5308_s27  ;;  %v7091_v39 = vsel %vm2312_vm3, %v10649_v51, %v4133_v11  ;;  %v7102_v9 = vsel %vm2312_vm3, %v10652_v43, %v4138_v12  ;;  %v7110_v51 = vsel %vm2312_vm3, %v10654_v36, %v4143_v56  ;;  %v10655_v11 = vld [vmem:[#allocation91_spill] sm:$0xff]  ;;  %v10658_v12 = vld [vmem:[#allocation54_spill] sm:$0xff] }
 0x13d   :  { %v7083_v26 = vpop.permute.xlu0 %4471  ;;  %v7124_v43 = vsel %vm2312_vm3, %v10658_v12, %v4154_v49  ;;  %v7130_v56 = vsel %vm2312_vm3, %v10660_v28, %v4153_v20  ;;  %v10661_v36 = vld [vmem:[#allocation58_spill] sm:$0xff]  ;;  %v10662_v55 = vld [vmem:[#allocation131_spill] sm:$0xff]  ;;  %v7142_v49 = vsel %vm2312_vm3, %v10664_v37, %v4158_v62  ;;  %v10665_v12 = vld [vmem:[#allocation132_spill] sm:$0xff] }
 0x13e   :  { %10647 = vst [vmem:[#allocation110_spill] sm:$0xff] %v7083_v26  ;;  %v7098_v21 = vpop.permute.xlu1 %4476  ;;  %v4164_v41 = vunpack.i.h.bf16 %v10662_v55  ;;  %v4163_v18 = vunpack.i.l.bf16 %v10662_v55  ;;  %v4168_v47 = vunpack.i.l.bf16 %v10665_v12  ;;  %v10666_v20 = vld [vmem:[#allocation135_spill] sm:$0xff]  ;;  %v10673_v26 = vld [vmem:[#allocation62_spill] sm:$0xff] }
 0x13f   :  { %10651 = vst [vmem:[#allocation23_spill] sm:$0xff] %v7098_v21  ;;  %4761 = vrot.lane.b32.xlu0 %v10655_v11, %s5308_s27  ;;  %v7134_v11 = vsel %vm2312_vm3, %v10661_v36, %v4159_v60  ;;  %v4174_v28 = vunpack.i.h.bf16 %v10666_v20  ;;  %v4173_v60 = vunpack.i.l.bf16 %v10666_v20  ;;  %v10668_v36 = vld [vmem:[#allocation138_spill] sm:$0xff]  ;;  %v4189_v21 = vunpack.i.h.bf16 %v10671_v27  ;;  %v10674_v20 = vld [vmem:[#allocation63_spill] sm:$0xff] }
 0x140   :  { %4766 = vrot.lane.b32.xlu1 %v10659_v16, %s5306_s1  ;;  %v4169_v16 = vunpack.i.h.bf16 %v10665_v12  ;;  %v4179_v7 = vunpack.i.h.bf16 %v10668_v36  ;;  %v4178_v55 = vunpack.i.l.bf16 %v10668_v36  ;;  %v10672_v12 = vld [vmem:[#allocation9_spill] sm:$0xff]  ;;  %v7165_v34 = vsel %vm2312_vm3, %v10674_v20, %v4163_v18 }
 0x141   :  { %v7138_v30 = vpop.permute.xlu0 %4481  ;;  %v4188_v36 = vunpack.i.l.bf16 %v10671_v27  ;;  %v10681_v27 = vld [vmem:[#allocation70_spill] sm:$0xff] }
 0x142   :  { %10663 = vst [vmem:[#allocation22_spill] sm:$0xff] %v7138_v30  ;;  %v7147_v58 = vpop.permute.xlu1 %4486  ;;  %v10670_v30 = vld [vmem:[#allocation139_spill] sm:$0xff]  ;;  %v7188_v0 = vsel %vm2312_vm3, %v10681_v27, %v4173_v60  ;;  %v10687_v60 = vld [vmem:[#allocation81_spill] sm:$0xff] }
 0x143   :  { %10667 = vst [vmem:[#allocation26_spill] sm:$0xff] %v7147_v58  ;;  %4771 = vrot.lane.b32.xlu0 %v10669_v33, %s5306_s1  ;;  %v4184_v37 = vunpack.i.h.bf16 %v10670_v30  ;;  %v4183_v62 = vunpack.i.l.bf16 %v10670_v30  ;;  %v7161_v58 = vsel %vm2312_vm3, %v10673_v26, %v4164_v41  ;;  %v10675_v33 = vld [vmem:[#allocation145_spill] sm:$0xff]  ;;  %v7210_v27 = vsel %vm2312_vm3, %v10687_v60, %v4189_v21 }
 0x144   :  { %4776 = vrot.lane.b32.xlu1 %v10672_v12, %s5307_s26  ;;  %v4194_v38 = vunpack.i.h.bf16 %v10675_v33  ;;  %v10677_v30 = vld [vmem:[#allocation65_spill] sm:$0xff]  ;;  %v7177_v12 = vsel %vm2312_vm3, %v10678_v53, %v4168_v47  ;;  %v4193_v18 = vunpack.i.l.bf16 %v10675_v33  ;;  %v10684_v53 = vld [vmem:[#allocation10_spill] sm:$0xff] }
 0x145   :  { %v7169_v14 = vpop.permute.xlu0 %4491  ;;  %v7173_v59 = vsel %vm2312_vm3, %v10677_v30, %v4169_v16  ;;  %v10679_v26 = vld [vmem:[#allocation69_spill] sm:$0xff] }
 0x146   :  { %10676 = vst [vmem:[#allocation27_spill] sm:$0xff] %v7169_v14  ;;  %v7181_v41 = vsel %vm2312_vm3, %v10679_v26, %v4174_v28  ;;  %v7184_v20 = vpop.permute.xlu1 %4496  ;;  %v10682_v14 = vld [vmem:[#allocation74_spill] sm:$0xff]  ;;  %v10683_v30 = vld [vmem:[#allocation73_spill] sm:$0xff] }
 0x147   :  { %10680 = vst [vmem:[#allocation118_spill] sm:$0xff] %v7184_v20  ;;  %v7192_v16 = vsel %vm2312_vm3, %v10682_v14, %v4179_v7  ;;  %v7196_v47 = vsel %vm2312_vm3, %v10683_v30, %v4178_v55  ;;  %4781 = vrot.lane.b32.xlu0 %v10684_v53, %s5307_s26  ;;  %v10685_v28 = vld [vmem:[#allocation77_spill] sm:$0xff]  ;;  %v10686_v26 = vld [vmem:[#allocation78_spill] sm:$0xff]  ;;  %v10688_v7 = vld [vmem:[#allocation92_spill] sm:$0xff] }
 0x148   :  { %v7202_v33 = vsel %vm2312_vm3, %v10685_v28, %v4184_v37  ;;  %v7206_v20 = vsel %vm2312_vm3, %v10686_v26, %v4183_v62  ;;  %4786 = vrot.lane.b32.xlu1 %v10688_v7, %s5308_s27  ;;  %v10689_v14 = vld [vmem:[#allocation82_spill] sm:$0xff]  ;;  %v10690_v30 = vld [vmem:[#allocation84_spill] sm:$0xff]  ;;  %v10693_v28 = vld [vmem:[#allocation85_spill] sm:$0xff] }
 0x149   :  { %v7216_v55 = vsel %vm2312_vm3, %v10689_v14, %v4188_v36  ;;  %v7220_v53 = vsel %vm2312_vm3, %v10690_v30, %v4194_v38  ;;  %v7222_v37 = vpop.permute.xlu0 %4501  ;;  %v7226_v62 = vsel %vm2312_vm3, %v10693_v28, %v4193_v18  ;;  %v10697_v7 = vld [vmem:[#allocation160_spill] sm:$0xff]  ;;  %v10698_v14 = vld [vmem:[#allocation93_spill] sm:$0xff]  ;;  %v10701_v28 = vld [vmem:[#allocation162_spill] sm:$0xff] }
 0x14a   :  { %10691 = vst [vmem:[#allocation31_spill] sm:$0xff] %v7220_v53  ;;  %10692 = vst [vmem:[#allocation120_spill] sm:$0xff] %v7222_v37  ;;  %v7230_v13 = vpop.permute.xlu1 %4506  ;;  %v4259_v52 = vunpack.i.h.bf16 %v10697_v7  ;;  %v4258_v36 = vunpack.i.l.bf16 %v10697_v7  ;;  %v10699_v38 = vld [vmem:[#allocation113_spill] sm:$0xff]  ;;  %v4268_v21 = vunpack.i.l.bf16 %v10701_v28  ;;  %v4269_v60 = vunpack.i.h.bf16 %v10701_v28 }
 0x14b   :  { %10694 = vst [vmem:[#allocation123_spill] sm:$0xff] %v7226_v62  ;;  %10696 = vst [vmem:[#allocation125_spill] sm:$0xff] %v7230_v13  ;;  %4791 = vrot.lane.b32.xlu0 %v10698_v14, %s5308_s27  ;;  %v10700_v30 = vld [vmem:[#allocation161_spill] sm:$0xff] }
 0x14c   :  { %4796 = vrot.lane.b32.xlu1 %v10699_v38, %s5306_s1  ;;  %v4264_v53 = vunpack.i.h.bf16 %v10700_v30  ;;  %v4263_v18 = vunpack.i.l.bf16 %v10700_v30  ;;  %v7248_v7 = vsel %vm2375_vm4, %v7016_v31, %v4258_v36  ;;  %v7252_v14 = vsel %vm2375_vm4, %v7009_v54, %v4259_v52  ;;  %v10704_v38 = vld [vmem:[#allocation164_spill] sm:$0xff]  ;;  %v10705_v30 = vld [vmem:[#allocation114_spill] sm:$0xff] }
 0x14d   :  { %v7241_v62 = vpop.permute.xlu0 %4511  ;;  %v4274_v13 = vunpack.i.h.bf16 %v10704_v38  ;;  %v4273_v37 = vunpack.i.l.bf16 %v10704_v38  ;;  %v7272_v54 = vsel %vm2375_vm4, %v7034_v17, %v4268_v21  ;;  %v10708_v38 = vld [vmem:[#allocation166_spill] sm:$0xff]  ;;  %v10711_v21 = vld [vmem:[#allocation12_spill] sm:$0xff] }
 0x14e   :  { %10702 = vst [vmem:[#allocation128_spill] sm:$0xff] %v7241_v62  ;;  %v7244_v26 = vpop.permute.xlu1 %4516  ;;  %v10706_v62 = vld [vmem:[#allocation165_spill] sm:$0xff]  ;;  %v7264_v31 = vsel %vm2375_vm4, %v7020_v15, %v4264_v53  ;;  %v7268_v52 = vsel %vm2375_vm4, %v7024_v44, %v4263_v18  ;;  %v10709_v15 = vld [vmem:[#allocation167_spill] sm:$0xff] }
 0x14f   :  { %10703 = vst [vmem:[#allocation30_spill] sm:$0xff] %v7244_v26  ;;  %4801 = vrot.lane.b32.xlu0 %v10705_v30, %s5306_s1  ;;  %v4279_v2 = vunpack.i.h.bf16 %v10706_v62  ;;  %v4278_v28 = vunpack.i.l.bf16 %v10706_v62  ;;  %v10707_v26 = vld [vmem:[#allocation11_spill] sm:$0xff]  ;;  %v7278_v62 = vsel %vm2375_vm4, %v7030_v24, %v4269_v60  ;;  %v4283_v30 = vunpack.i.l.bf16 %v10708_v38 }
 0x150   :  { %4806 = vrot.lane.b32.xlu1 %v10707_v26, %s5307_s26  ;;  %v4284_v26 = vunpack.i.h.bf16 %v10708_v38  ;;  %v4288_v53 = vunpack.i.l.bf16 %v10709_v15  ;;  %v7287_v44 = vsel %vm2375_vm4, %v7038_v35, %v4274_v13  ;;  %v4289_v17 = vunpack.i.h.bf16 %v10709_v15  ;;  %v10712_v38 = vld [vmem:[#allocation169_spill] sm:$0xff]  ;;  %v10713_v35 = vld [vmem:[#allocation94_spill] sm:$0xff] }
 0x151   :  { %v7274_v36 = vpop.permute.xlu0 %4521  ;;  %v7294_v24 = vsel %vm2375_vm4, %v7044_v45, %v4273_v37  ;;  %v7298_v60 = vsel %vm2375_vm4, %v7056_v40, %v4278_v28  ;;  %v7302_v18 = vsel %vm2375_vm4, %v7048_v50, %v4279_v2  ;;  %v4294_v13 = vunpack.i.h.bf16 %v10712_v38 }
 0x152   :  { %v7283_v23 = vpop.permute.xlu1 %4526  ;;  %v4293_v15 = vunpack.i.l.bf16 %v10712_v38  ;;  %v7314_v40 = vsel %vm2375_vm4, %v7075_v63, %v4284_v26  ;;  %v7318_v2 = vsel %vm2375_vm4, %v7079_v4, %v4283_v30  ;;  %v7322_v50 = vsel %vm2375_vm4, %v7091_v39, %v4288_v53  ;;  %v10718_v63 = vld [vmem:[#allocation172_spill] sm:$0xff]  ;;  %v10719_v30 = vld [vmem:[#allocation115_spill] sm:$0xff] }
 0x153   :  { %10710 = vst [vmem:[#allocation35_spill] sm:$0xff] %v7283_v23  ;;  %4811 = vrot.lane.b32.xlu0 %v10711_v21, %s5307_s26  ;;  %v10714_v21 = vld [vmem:[#allocation170_spill] sm:$0xff]  ;;  %v7328_v38 = vsel %vm2375_vm4, %v7087_v1, %v4289_v17  ;;  %v4308_v26 = vunpack.i.l.bf16 %v10718_v63  ;;  %v7337_v4 = vsel %vm2375_vm4, %v7095_v22, %v4294_v13  ;;  %v4309_v39 = vunpack.i.h.bf16 %v10718_v63  ;;  %v10720_v17 = vld [vmem:[#allocation37_spill] sm:$0xff] }
 0x154   :  { %4816 = vrot.lane.b32.xlu1 %v10713_v35, %s5308_s27  ;;  %v4299_v23 = vunpack.i.h.bf16 %v10714_v21  ;;  %v4298_v45 = vunpack.i.l.bf16 %v10714_v21  ;;  %v10717_v35 = vld [vmem:[#allocation171_spill] sm:$0xff]  ;;  %v7344_v1 = vsel %vm2375_vm4, %v7102_v9, %v4293_v15  ;;  %v4314_v22 = vunpack.i.h.bf16 %v10720_v17  ;;  %v10722_v63 = vld [vmem:[#allocation173_spill] sm:$0xff]  ;;  %v10724_v15 = vld [vmem:[#allocation116_spill] sm:$0xff] }
 0x155   :  { %v7310_v37 = vpop.permute.xlu0 %4531  ;;  %v4304_v21 = vunpack.i.h.bf16 %v10717_v35 }
 0x156   :  { %10715 = vst [vmem:[#allocation38_spill] sm:$0xff] %v7310_v37  ;;  %v7324_v28 = vpop.permute.xlu1 %4536  ;;  %v4303_v37 = vunpack.i.l.bf16 %v10717_v35  ;;  %v7348_v53 = vsel %vm2375_vm4, %v7110_v51, %v4298_v45  ;;  %v4313_v35 = vunpack.i.l.bf16 %v10720_v17  ;;  %v7378_v45 = vsel %vm2375_vm4, %v7124_v43, %v4309_v39  ;;  %v10725_v17 = vld [vmem:[#allocation174_spill] sm:$0xff] }
 0x157   :  { %10716 = vst [vmem:[#allocation39_spill] sm:$0xff] %v7324_v28  ;;  %4821 = vrot.lane.b32.xlu0 %v10598_v29, %s5308_s27  ;;  %v7352_v29 = vsel %vm2375_vm4, %v7106_v25, %v4299_v23  ;;  %v4318_v28 = vunpack.i.l.bf16 %v10722_v63  ;;  %v7364_v51 = vsel %vm2375_vm4, %v7116_v42, %v4304_v21  ;;  %v7372_v25 = vsel %vm2375_vm4, %v7130_v56, %v4308_v26  ;;  %v10726_v21 = vld [vmem:[#allocation175_spill] sm:$0xff] }
 0x158   :  { %4826 = vrot.lane.b32.xlu1 %v10719_v30, %s5306_s1  ;;  %v4319_v30 = vunpack.i.h.bf16 %v10722_v63  ;;  %v7368_v23 = vsel %vm2375_vm4, %v7120_v48, %v4303_v37  ;;  %v4324_v63 = vunpack.i.h.bf16 %v10725_v17  ;;  %v4323_v42 = vunpack.i.l.bf16 %v10725_v17  ;;  %v10727_v48 = vld [vmem:[#allocation13_spill] sm:$0xff] }
 0x159   :  { %v7355_v13 = vpop.permute.xlu0 %4541  ;;  %v7387_v56 = vsel %vm2375_vm4, %v7134_v11, %v4314_v22  ;;  %v4329_v37 = vunpack.i.h.bf16 %v10726_v21  ;;  %v7394_v43 = vsel %vm2375_vm4, %v7142_v49, %v4313_v35  ;;  %v7398_v39 = vsel %vm2375_vm4, %v7165_v34, %v4318_v28  ;;  %v10729_v11 = vld [vmem:[#allocation176_spill] sm:$0xff]  ;;  %v10731_v49 = vld [vmem:[#allocation14_spill] sm:$0xff] }
 0x15a   :  { %10721 = vst [vmem:[#allocation44_spill] sm:$0xff] %v7355_v13  ;;  %v7360_v9 = vpop.permute.xlu1 %4546  ;;  %v4334_v22 = vunpack.i.h.bf16 %v10729_v11  ;;  %v7414_v34 = vsel %vm2375_vm4, %v7173_v59, %v4324_v63  ;;  %v4413_v59 = vunpack.i.l.bf16 %v6837_v32 }
 0x15b   :  { %10723 = vst [vmem:[#allocation41_spill] sm:$0xff] %v7360_v9  ;;  %4831 = vrot.lane.b32.xlu0 %v10724_v15, %s5306_s1  ;;  %v4328_v9 = vunpack.i.l.bf16 %v10726_v21  ;;  %v7402_v15 = vsel %vm2375_vm4, %v7161_v58, %v4319_v30  ;;  %v4333_v21 = vunpack.i.l.bf16 %v10729_v11  ;;  %v7418_v58 = vsel %vm2375_vm4, %v7177_v12, %v4323_v42  ;;  %v10732_v11 = vld [vmem:[#allocation163_spill] sm:$0xff] }
 0x15c   :  { %4836 = vrot.lane.b32.xlu1 %v10727_v48, %s5307_s26  ;;  %v10730_v48 = vld [vmem:[#allocation177_spill] sm:$0xff]  ;;  %v7428_v35 = vsel %vm2375_vm4, %v7181_v41, %v4329_v37  ;;  %v4414_v30 = vunpack.i.h.bf16 %v6837_v32  ;;  %v1555_v12 = vrot.slane %v10732_v11, 2  ;;  %v4419_v42 = vunpack.i.h.bf16 %v6849_v61 }
 0x15d   :  { %v7390_v26 = vpop.permute.xlu0 %4551  ;;  %v4338_v13 = vunpack.i.l.bf16 %v10730_v48  ;;  %v7422_v28 = vsel %vm2375_vm4, %v7188_v0, %v4328_v9  ;;  %v4418_v0 = vunpack.i.l.bf16 %v6849_v61  ;;  %v7445_v41 = vsel %vm2375_vm4, %v7196_v47, %v4333_v21  ;;  %v10734_v61 = vld [vmem:[#allocation178_spill] sm:$0xff] }
 0x15e   :  { %10728 = vst [vmem:[#allocation47_spill] sm:$0xff] %v7390_v26  ;;  %v7404_v17 = vpop.permute.xlu1 %4556  ;;  %v4339_v26 = vunpack.i.h.bf16 %v10730_v48  ;;  %v4344_v48 = vunpack.i.h.bf16 %v10734_v61  ;;  %v10736_v47 = vrot.slane %v6485_v5, 2  ;;  %v10737_v21 = vrot.slane %v6488_v46, 2 }
 0x15f   :  { %4841 = vrot.lane.b32.xlu0 %v10731_v49, %s5307_s26  ;;  %v7449_v32 = vsel %vm2375_vm4, %v7206_v20, %v4338_v13  ;;  %v10738_v13 = vld [vmem:[#allocation179_spill] sm:$0xff]  ;;  %v2466_v46 = vsel %vm2438_vm5, %v7264_v31, %v4419_v42  ;;  %v4429_v5 = vunpack.i.h.bf16 %v6895_v8  ;;  %v10743_v42 = vld [vmem:[#allocation16_spill] sm:$0xff] }
 0x160   :  { %4846 = vrot.lane.b32.xlu1 %v10600_v19, %s5308_s27  ;;  %v7441_v19 = vsel %vm2375_vm4, %v7192_v16, %v4334_v22  ;;  %v7453_v37 = vsel %vm2375_vm4, %v7202_v33, %v4339_v26  ;;  %v4343_v16 = vunpack.i.l.bf16 %v10734_v61  ;;  %v10735_v22 = vld [vmem:[#allocation117_spill] sm:$0xff]  ;;  %v1554_v20 = vsel %vm812_vm2, %v10737_v21, %v10736_v47 }
 0x161   :  { %v7432_v63 = vpop.permute.xlu0 %4561  ;;  %v2463_v33 = vsel %vm2438_vm5, %v7248_v7, %v4413_v59  ;;  %v10739_v11 = vmov %v10736_v47  ;;  %v4423_v7 = vunpack.i.l.bf16 %v6880_v10 }
 0x162   :  { %v7437_v9 = vpop.permute.xlu1 %4566  ;;  %v1556_v61 = vsel %vm812_vm2, %v10739_v11, %v1555_v12  ;;  %v4428_v12 = vunpack.i.l.bf16 %v6895_v8  ;;  %v4439_v8 = vunpack.i.h.bf16 %v6936_v3 }
 0x163   :  { %10733 = vst [vmem:[#allocation46_spill] sm:$0xff] %v7437_v9  ;;  %4851 = vrot.lane.b32.xlu0 %v10606_v57, %s5308_s27  ;;  %v2464_v57 = vsel %vm2438_vm5, %v7252_v14, %v4414_v30  ;;  %v4424_v9 = vunpack.i.h.bf16 %v6880_v10  ;;  %v10740_v30 = vld [vmem:[#allocation119_spill] sm:$0xff]  ;;  %v7499_v11 = vpack.i.bf16 %v1556_v61, %v1554_v20 }
 0x164   :  { %4856 = vrot.lane.b32.xlu1 %v10735_v22, %s5306_s1  ;;  %v2465_v22 = vsel %vm2438_vm5, %v7268_v52, %v4418_v0  ;;  %v2469_v20 = vsel %vm2438_vm5, %v7294_v24, %v4428_v12  ;;  %v10751_v12 = vld [vmem:[#allocation204_spill] sm:$0xff] }
 0x165   :  { %v4572_v26 = vpop.permute.xlu0 %4571 }
 0x166   :  { %v4574_v47 = vunpack.i.h.bf16 %v4572_v26  ;;  %v4573_v21 = vunpack.i.l.bf16 %v4572_v26  ;;  %v4577_v49 = vpop.permute.xlu1 %4576 }
 0x167   :  { %v4579_v59 = vunpack.i.h.bf16 %v4577_v49  ;;  %v4578_v14 = vunpack.i.l.bf16 %v4577_v49  ;;  %4861 = vrot.lane.b32.xlu0 %v10740_v30, %s5306_s1  ;;  %v2467_v30 = vsel %vm2438_vm5, %v7272_v54, %v4423_v7  ;;  %v7523_v54 = vsel %vm2375_vm4, %v7210_v27, %v4344_v48 }
 0x168   :  { %v7485_v52 = vsel %vm2503_vm7, %v2463_v33, %v4573_v21  ;;  %v7488_v31 = vsel %vm2503_vm7, %v2464_v57, %v4574_v47  ;;  %4866 = vrot.lane.b32.xlu1 %v10743_v42, %s5307_s26  ;;  %v4438_v33 = vunpack.i.l.bf16 %v6936_v3  ;;  %v2470_v3 = vsel %vm2438_vm5, %v7287_v44, %v4429_v5 }
 0x169   :  { %10741 = vst [vmem:[#allocation91_spill] sm:$0xff] %v7485_v52  ;;  %10742 = vst [vmem:[#allocation50_spill] sm:$0xff] %v7488_v31  ;;  %v7494_v0 = vsel %vm2503_vm7, %v2465_v22, %v4578_v14  ;;  %v7497_v49 = vsel %vm2503_vm7, %v2466_v46, %v4579_v59  ;;  %v4582_v26 = vpop.permute.xlu0 %4581  ;;  %v2468_v22 = vsel %vm2438_vm5, %v7278_v62, %v4424_v9  ;;  %v10746_v46 = vld [vmem:[#allocation17_spill] sm:$0xff] }
 0x16a   :  { %10744 = vst [vmem:[#allocation51_spill] sm:$0xff] %v7494_v0  ;;  %10745 = vst [vmem:[#allocation54_spill] sm:$0xff] %v7497_v49  ;;  %v4584_v57 = vunpack.i.h.bf16 %v4582_v26  ;;  %v4583_v47 = vunpack.i.l.bf16 %v4582_v26  ;;  %v4587_v21 = vpop.permute.xlu1 %4586  ;;  %v7527_v62 = vsel %vm2375_vm4, %v7216_v55, %v4343_v16  ;;  %v2473_v7 = vsel %vm2438_vm5, %v7298_v60, %v4438_v33  ;;  %v10754_v60 = vld [vmem:[#allocation201_spill] sm:$0xff] }
 0x16b   :  { %v4589_v14 = vunpack.i.h.bf16 %v4587_v21  ;;  %v4588_v42 = vunpack.i.l.bf16 %v4587_v21  ;;  %4871 = vrot.lane.b32.xlu0 %v10746_v46, %s5307_s26  ;;  %v4444_v26 = vunpack.i.h.bf16 %v10751_v12  ;;  %v4443_v55 = vunpack.i.l.bf16 %v10751_v12  ;;  %v10753_v21 = vld [vmem:[#allocation205_spill] sm:$0xff] }
 0x16c   :  { %v7514_v61 = vsel %vm2503_vm7, %v2467_v30, %v4583_v47  ;;  %v7517_v59 = vsel %vm2503_vm7, %v2468_v22, %v4584_v57  ;;  %4876 = vrot.lane.b32.xlu1 %v10609_v6, %s5308_s27  ;;  %v2474_v6 = vsel %vm2438_vm5, %v7302_v18, %v4439_v8  ;;  %v10752_v47 = vld [vmem:[#allocation20_spill] sm:$0xff]  ;;  %v4449_v30 = vunpack.i.h.bf16 %v10753_v21 }
 0x16d   :  { %10747 = vst [vmem:[#allocation111_spill] sm:$0xff] %v7514_v61  ;;  %10748 = vst [vmem:[#allocation55_spill] sm:$0xff] %v7517_v59  ;;  %v7530_v24 = vsel %vm2503_vm7, %v2469_v20, %v4588_v42  ;;  %v7533_v44 = vsel %vm2503_vm7, %v2470_v3, %v4589_v14  ;;  %v4592_v9 = vpop.permute.xlu0 %4591  ;;  %v4448_v22 = vunpack.i.l.bf16 %v10753_v21  ;;  %v10756_v18 = vld [vmem:[#allocation200_spill] sm:$0xff]  ;;  %v10758_v14 = vld [vmem:[#allocation121_spill] sm:$0xff] }
 0x16e   :  { %10749 = vst [vmem:[#allocation58_spill] sm:$0xff] %v7530_v24  ;;  %10750 = vst [vmem:[#allocation131_spill] sm:$0xff] %v7533_v44  ;;  %v4594_v5 = vunpack.i.h.bf16 %v4592_v9  ;;  %v4593_v27 = vunpack.i.l.bf16 %v4592_v9  ;;  %v4597_v48 = vpop.permute.xlu1 %4596  ;;  %v10759_v42 = vld [vmem:[#allocation208_spill] sm:$0xff] }
 0x16f   :  { %v4599_v16 = vunpack.i.h.bf16 %v4597_v48  ;;  %v4598_v57 = vunpack.i.l.bf16 %v4597_v48  ;;  %4881 = vrot.lane.b32.xlu0 %v10752_v47, %s5308_s27  ;;  %v4454_v46 = vunpack.i.h.bf16 %v10759_v42  ;;  %v4453_v20 = vunpack.i.l.bf16 %v10759_v42  ;;  %v10876_v24 = vld [vmem:[#allocation56_spill] sm:$0xff] }
 0x170   :  { %v7547_v33 = vsel %vm2503_vm7, %v10754_v60, %v4593_v27  ;;  %v7551_v8 = vsel %vm2503_vm7, %v10756_v18, %v4594_v5  ;;  %4886 = vrot.lane.b32.xlu1 %v10758_v14, %s5306_s1  ;;  %v10762_v27 = vld [vmem:[#allocation210_spill] sm:$0xff]  ;;  %v2475_v18 = vsel %vm2438_vm5, %v7318_v2, %v4443_v55  ;;  %v2476_v14 = vsel %vm2438_vm5, %v7314_v40, %v4444_v26  ;;  %v10766_v2 = vld [vmem:[#allocation21_spill] sm:$0xff] }
 0x171   :  { %10755 = vst [vmem:[#allocation59_spill] sm:$0xff] %v7547_v33  ;;  %10757 = vst [vmem:[#allocation132_spill] sm:$0xff] %v7551_v8  ;;  %v7558_v3 = vsel %vm2503_vm7, %v2473_v7, %v4598_v57  ;;  %v7561_v9 = vsel %vm2503_vm7, %v2474_v6, %v4599_v16  ;;  %v4602_v48 = vpop.permute.xlu0 %4601  ;;  %v4459_v12 = vunpack.i.h.bf16 %v10762_v27  ;;  %v4458_v47 = vunpack.i.l.bf16 %v10762_v27  ;;  %v10763_v57 = vld [vmem:[#allocation122_spill] sm:$0xff]  ;;  %v10875_v33 = vld [vmem:[#allocation40_spill] sm:$0xff] }
 0x172   :  { %10760 = vst [vmem:[#allocation135_spill] sm:$0xff] %v7558_v3  ;;  %10761 = vst [vmem:[#allocation138_spill] sm:$0xff] %v7561_v9  ;;  %v4604_v5 = vunpack.i.h.bf16 %v4602_v48  ;;  %v4603_v21 = vunpack.i.l.bf16 %v4602_v48  ;;  %v4607_v60 = vpop.permute.xlu1 %4606  ;;  %v2477_v6 = vsel %vm2438_vm5, %v7322_v50, %v4448_v22  ;;  %v2478_v16 = vsel %vm2438_vm5, %v7328_v38, %v4449_v30  ;;  %v10865_v3 = vld [vmem:[#allocation199_spill] sm:$0xff] }
 0x173   :  { %v4609_v42 = vunpack.i.h.bf16 %v4607_v60  ;;  %v4608_v7 = vunpack.i.l.bf16 %v4607_v60  ;;  %4891 = vrot.lane.b32.xlu0 %v10763_v57, %s5306_s1  ;;  %v2479_v40 = vsel %vm2438_vm5, %v7344_v1, %v4453_v20  ;;  %v2480_v26 = vsel %vm2438_vm5, %v7337_v4, %v4454_v46  ;;  %v10769_v1 = vld [vmem:[#allocation18_spill] sm:$0xff] }
 0x174   :  { %v7576_v48 = vsel %vm2503_vm7, %v2475_v18, %v4603_v21  ;;  %v7579_v27 = vsel %vm2503_vm7, %v2476_v14, %v4604_v5  ;;  %4896 = vrot.lane.b32.xlu1 %v10766_v2, %s5307_s26  ;;  %v2481_v30 = vsel %vm2438_vm5, %v7348_v53, %v4458_v47  ;;  %v2482_v22 = vsel %vm2438_vm5, %v7352_v29, %v4459_v12  ;;  %v10770_v14 = vld [vmem:[#allocation25_spill] sm:$0xff]  ;;  %v10774_v12 = vld [vmem:[#allocation24_spill] sm:$0xff]  ;;  %v10775_v47 = vld [vmem:[#allocation110_spill] sm:$0xff] }
 0x175   :  { %10764 = vst [vmem:[#allocation112_spill] sm:$0xff] %v7576_v48  ;;  %10765 = vst [vmem:[#allocation139_spill] sm:$0xff] %v7579_v27  ;;  %v7588_v50 = vsel %vm2503_vm7, %v2477_v6, %v4608_v7  ;;  %v7591_v38 = vsel %vm2503_vm7, %v2478_v16, %v4609_v42  ;;  %v4612_v55 = vpop.permute.xlu0 %4611  ;;  %v4464_v20 = vunpack.i.h.bf16 %v10769_v1  ;;  %v4463_v4 = vunpack.i.l.bf16 %v10769_v1  ;;  %v10771_v42 = vld [vmem:[#allocation19_spill] sm:$0xff]  ;;  %v10862_v27 = vld [vmem:[#allocation209_spill] sm:$0xff] }
 0x176   :  { %10767 = vst [vmem:[#allocation142_spill] sm:$0xff] %v7588_v50  ;;  %10768 = vst [vmem:[#allocation9_spill] sm:$0xff] %v7591_v38  ;;  %v4614_v5 = vunpack.i.h.bf16 %v4612_v55  ;;  %v4613_v21 = vunpack.i.l.bf16 %v4612_v55  ;;  %v4617_v60 = vpop.permute.xlu1 %4616  ;;  %v4469_v7 = vunpack.i.h.bf16 %v10771_v42  ;;  %v4468_v57 = vunpack.i.l.bf16 %v10771_v42  ;;  %v10778_v1 = vld [vmem:[#allocation23_spill] sm:$0xff]  ;;  %v10863_v48 = vld [vmem:[#allocation186_spill] sm:$0xff] }
 0x177   :  { %v4619_v46 = vunpack.i.h.bf16 %v4617_v60  ;;  %v4618_v18 = vunpack.i.l.bf16 %v4617_v60  ;;  %4901 = vrot.lane.b32.xlu0 %v10770_v14, %s5307_s26  ;;  %v4474_v6 = vunpack.i.h.bf16 %v10775_v47  ;;  %v4473_v16 = vunpack.i.l.bf16 %v10775_v47 }
 0x178   :  { %v7604_v53 = vsel %vm2503_vm7, %v2479_v40, %v4613_v21  ;;  %v7607_v29 = vsel %vm2503_vm7, %v2480_v26, %v4614_v5  ;;  %4906 = vrot.lane.b32.xlu1 %v10774_v12, %s5308_s27  ;;  %v4479_v40 = vunpack.i.h.bf16 %v10778_v1  ;;  %v4478_v21 = vunpack.i.l.bf16 %v10778_v1 }
 0x179   :  { %10772 = vst [vmem:[#allocation62_spill] sm:$0xff] %v7604_v53  ;;  %10773 = vst [vmem:[#allocation63_spill] sm:$0xff] %v7607_v29  ;;  %v7614_v2 = vsel %vm2503_vm7, %v2481_v30, %v4618_v18  ;;  %v7617_v55 = vsel %vm2503_vm7, %v2482_v22, %v4619_v46  ;;  %v4622_v60 = vpop.permute.xlu0 %4621  ;;  %v2483_v42 = vsel %vm2438_vm5, %v7368_v23, %v4463_v4  ;;  %v10779_v18 = vld [vmem:[#allocation28_spill] sm:$0xff]  ;;  %v10782_v23 = vld [vmem:[#allocation99_spill] sm:$0xff]  ;;  %v4403_v44 = vunpack.i.l.bf16 %v10875_v33 }
 0x17a   :  { %10776 = vst [vmem:[#allocation145_spill] sm:$0xff] %v7614_v2  ;;  %10777 = vst [vmem:[#allocation65_spill] sm:$0xff] %v7617_v55  ;;  %v4624_v26 = vunpack.i.h.bf16 %v4622_v60  ;;  %v4623_v5 = vunpack.i.l.bf16 %v4622_v60  ;;  %v4627_v14 = vpop.permute.xlu1 %4626  ;;  %v2484_v12 = vsel %vm2438_vm5, %v7364_v51, %v4464_v20  ;;  %v2485_v22 = vsel %vm2438_vm5, %v7372_v25, %v4468_v57  ;;  %v10857_v55 = vld [vmem:[#allocation87_spill] sm:$0xff]  ;;  %v10859_v2 = vld [vmem:[#allocation184_spill] sm:$0xff] }
 0x17b   :  { %v4629_v47 = vunpack.i.h.bf16 %v4627_v14  ;;  %v4628_v30 = vunpack.i.l.bf16 %v4627_v14  ;;  %4911 = vrot.lane.b32.xlu0 %v10779_v18, %s5308_s27  ;;  %v2486_v46 = vsel %vm2438_vm5, %v7378_v45, %v4469_v7  ;;  %v2487_v51 = vsel %vm2438_vm5, %v7394_v43, %v4473_v16  ;;  %v10785_v43 = vld [vmem:[#allocation22_spill] sm:$0xff] }
 0x17c   :  { %v7632_v60 = vsel %vm2503_vm7, %v2483_v42, %v4623_v5  ;;  %v7635_v1 = vsel %vm2503_vm7, %v2484_v12, %v4624_v26  ;;  %4916 = vrot.lane.b32.xlu1 %v10782_v23, %s5305_s19  ;;  %v2488_v20 = vsel %vm2438_vm5, %v7387_v56, %v4474_v6  ;;  %v2489_v7 = vsel %vm2438_vm5, %v7398_v39, %v4478_v21  ;;  %v10786_v12 = vld [vmem:[#allocation124_spill] sm:$0xff]  ;;  %v10791_v21 = vld [vmem:[#allocation27_spill] sm:$0xff] }
 0x17d   :  { %10780 = vst [vmem:[#allocation66_spill] sm:$0xff] %v7632_v60  ;;  %10781 = vst [vmem:[#allocation69_spill] sm:$0xff] %v7635_v1  ;;  %v7644_v25 = vsel %vm2503_vm7, %v2485_v22, %v4628_v30  ;;  %v7647_v45 = vsel %vm2503_vm7, %v2486_v46, %v4629_v47  ;;  %v4632_v4 = vpop.permute.xlu0 %4631  ;;  %v2490_v57 = vsel %vm2438_vm5, %v7402_v15, %v4479_v40  ;;  %v4484_v16 = vunpack.i.h.bf16 %v10785_v43  ;;  %v10787_v47 = vld [vmem:[#allocation26_spill] sm:$0xff]  ;;  %v10856_v1 = vld [vmem:[#allocation183_spill] sm:$0xff] }
 0x17e   :  { %10783 = vst [vmem:[#allocation70_spill] sm:$0xff] %v7644_v25  ;;  %10784 = vst [vmem:[#allocation74_spill] sm:$0xff] %v7647_v45  ;;  %v4634_v26 = vunpack.i.h.bf16 %v4632_v4  ;;  %v4633_v5 = vunpack.i.l.bf16 %v4632_v4  ;;  %v4637_v14 = vpop.permute.xlu1 %4636  ;;  %v4483_v56 = vunpack.i.l.bf16 %v10785_v43  ;;  %v4489_v30 = vunpack.i.h.bf16 %v10787_v47  ;;  %v10790_v40 = vld [vmem:[#allocation126_spill] sm:$0xff] }
 0x17f   :  { %v4639_v6 = vunpack.i.h.bf16 %v4637_v14  ;;  %v4638_v42 = vunpack.i.l.bf16 %v4637_v14  ;;  %4921 = vrot.lane.b32.xlu0 %v10786_v12, %s5306_s1  ;;  %v4488_v18 = vunpack.i.l.bf16 %v10787_v47  ;;  %v4494_v22 = vunpack.i.h.bf16 %v10791_v21  ;;  %v10794_v12 = vld [vmem:[#allocation118_spill] sm:$0xff] }
 0x180   :  { %v7660_v39 = vsel %vm2503_vm7, %v2487_v51, %v4633_v5  ;;  %v7663_v15 = vsel %vm2503_vm7, %v2488_v20, %v4634_v26  ;;  %4926 = vrot.lane.b32.xlu1 %v10790_v40, %s5306_s1  ;;  %v4493_v46 = vunpack.i.l.bf16 %v10791_v21  ;;  %v4499_v51 = vunpack.i.h.bf16 %v10794_v12 }
 0x181   :  { %10788 = vst [vmem:[#allocation73_spill] sm:$0xff] %v7660_v39  ;;  %10789 = vst [vmem:[#allocation10_spill] sm:$0xff] %v7663_v15  ;;  %v7670_v4 = vsel %vm2503_vm7, %v2489_v7, %v4638_v42  ;;  %v7673_v14 = vsel %vm2503_vm7, %v2490_v57, %v4639_v6  ;;  %v4642_v43 = vpop.permute.xlu0 %4641  ;;  %v4498_v5 = vunpack.i.l.bf16 %v10794_v12  ;;  %v2491_v40 = vsel %vm2438_vm5, %v7418_v58, %v4483_v56  ;;  %v10795_v42 = vld [vmem:[#allocation29_spill] sm:$0xff] }
 0x182   :  { %10792 = vst [vmem:[#allocation77_spill] sm:$0xff] %v7670_v4  ;;  %10793 = vst [vmem:[#allocation78_spill] sm:$0xff] %v7673_v14  ;;  %v4644_v20 = vunpack.i.h.bf16 %v4642_v43  ;;  %v4643_v26 = vunpack.i.l.bf16 %v4642_v43  ;;  %v4647_v47 = vpop.permute.xlu1 %4646  ;;  %v2492_v21 = vsel %vm2438_vm5, %v7414_v34, %v4484_v16  ;;  %v2493_v57 = vsel %vm2438_vm5, %v7422_v28, %v4488_v18  ;;  %v10798_v58 = vld [vmem:[#allocation33_spill] sm:$0xff]  ;;  %v10840_v14 = vld [vmem:[#allocation8_spill] sm:$0xff] }
 0x183   :  { %v4649_v10 = vunpack.i.h.bf16 %v4647_v47  ;;  %v4648_v7 = vunpack.i.l.bf16 %v4647_v47  ;;  %4931 = vrot.lane.b32.xlu0 %v10795_v42, %s5307_s26  ;;  %v2494_v6 = vsel %vm2438_vm5, %v7428_v35, %v4489_v30  ;;  %v2495_v34 = vsel %vm2438_vm5, %v7445_v41, %v4493_v46  ;;  %v10801_v41 = vld [vmem:[#allocation120_spill] sm:$0xff]  ;;  %v10807_v42 = vld [vmem:[#allocation123_spill] sm:$0xff] }
 0x184   :  { %v7688_v43 = vsel %vm2503_vm7, %v2491_v40, %v4643_v26  ;;  %v7691_v12 = vsel %vm2503_vm7, %v2492_v21, %v4644_v20  ;;  %4936 = vrot.lane.b32.xlu1 %v10798_v58, %s5307_s26  ;;  %v2496_v16 = vsel %vm2438_vm5, %v7441_v19, %v4494_v22  ;;  %v2497_v30 = vsel %vm2438_vm5, %v7449_v32, %v4498_v5 }
 0x185   :  { %10796 = vst [vmem:[#allocation81_spill] sm:$0xff] %v7688_v43  ;;  %10797 = vst [vmem:[#allocation92_spill] sm:$0xff] %v7691_v12  ;;  %v7700_v28 = vsel %vm2503_vm7, %v2493_v57, %v4648_v7  ;;  %v7703_v35 = vsel %vm2503_vm7, %v2494_v6, %v4649_v10  ;;  %v4652_v56 = vpop.permute.xlu0 %4651  ;;  %v2498_v18 = vsel %vm2438_vm5, %v7453_v37, %v4499_v51  ;;  %v4504_v46 = vunpack.i.h.bf16 %v10801_v41  ;;  %v10802_v10 = vld [vmem:[#allocation125_spill] sm:$0xff]  ;;  %v10805_v51 = vld [vmem:[#allocation36_spill] sm:$0xff] }
 0x186   :  { %10799 = vst [vmem:[#allocation82_spill] sm:$0xff] %v7700_v28  ;;  %10800 = vst [vmem:[#allocation84_spill] sm:$0xff] %v7703_v35  ;;  %v4654_v20 = vunpack.i.h.bf16 %v4652_v56  ;;  %v4653_v26 = vunpack.i.l.bf16 %v4652_v56  ;;  %v4657_v47 = vpop.permute.xlu1 %4656  ;;  %v4503_v19 = vunpack.i.l.bf16 %v10801_v41  ;;  %v4509_v21 = vunpack.i.h.bf16 %v10802_v10  ;;  %v10809_v6 = vld [vmem:[#allocation31_spill] sm:$0xff]  ;;  %v10839_v12 = vld [vmem:[#allocation190_spill] sm:$0xff] }
 0x187   :  { %v4659_v22 = vunpack.i.h.bf16 %v4657_v47  ;;  %v4658_v40 = vunpack.i.l.bf16 %v4657_v47  ;;  %4941 = vrot.lane.b32.xlu0 %v10782_v23, %s5308_s27  ;;  %v4508_v7 = vunpack.i.l.bf16 %v10802_v10  ;;  %v10806_v5 = vunpack.i.l.bf16 %v10738_v13  ;;  %v10812_v41 = vld [vmem:[#allocation3_spill] sm:$0xff]  ;;  %v10813_v10 = vld [vmem:[#allocation2_spill] sm:$0xff] }
 0x188   :  { %v7716_v32 = vsel %vm2503_vm7, %v2495_v34, %v4653_v26  ;;  %v7719_v37 = vsel %vm2503_vm7, %v2496_v16, %v4654_v20  ;;  %4946 = vrot.lane.b32.xlu1 %v10805_v51, %s5308_s27  ;;  %v10808_v23 = vunpack.i.h.bf16 %v10738_v13  ;;  %v2500_v13 = vsel %vm2438_vm5, %v7523_v54, %v4504_v46  ;;  %v10818_v46 = vld [vmem:[#allocation15_spill] sm:$0xff] }
 0x189   :  { %10803 = vst [vmem:[#allocation85_spill] sm:$0xff] %v7716_v32  ;;  %10804 = vst [vmem:[#allocation160_spill] sm:$0xff] %v7719_v37  ;;  %v2436_v57 = vsel %vm2375_vm4, %v10807_v42, %v10806_v5  ;;  %v7732_v56 = vsel %vm2503_vm7, %v2497_v30, %v4658_v40  ;;  %v7735_v34 = vsel %vm2503_vm7, %v2498_v18, %v4659_v22  ;;  %v4662_v16 = vpop.permute.xlu0 %4661  ;;  %v10836_v32 = vld [vmem:[#allocation95_spill] sm:$0xff]  ;;  %v4244_v4 = vunpack.i.h.bf16 %v10840_v14 }
 0x18a   :  { %v2437_v58 = vsel %vm2375_vm4, %v10809_v6, %v10808_v23  ;;  %10810 = vst [vmem:[#allocation93_spill] sm:$0xff] %v7732_v56  ;;  %10811 = vst [vmem:[#allocation113_spill] sm:$0xff] %v7735_v34  ;;  %v4664_v20 = vunpack.i.h.bf16 %v4662_v16  ;;  %v4663_v26 = vunpack.i.l.bf16 %v4662_v16  ;;  %v4667_v47 = vpop.permute.xlu1 %4666  ;;  %v4965_v37 = vpack.i.bf16 %v10813_v10, %v10812_v41  ;;  %v10825_v41 = vld [vmem:[#allocation154_spill] sm:$0xff]  ;;  %v10835_v56 = vld [vmem:[#allocation60_spill] sm:$0xff] }
 0x18b   :  { %v2499_v5 = vsel %vm2438_vm5, %v7527_v62, %v4503_v19  ;;  %v4669_v42 = vunpack.i.h.bf16 %v4667_v47  ;;  %v4668_v23 = vunpack.i.l.bf16 %v4667_v47  ;;  %4951 = vrot.lane.b32.xlu0 %v10805_v51, %s5305_s19  ;;  %v2501_v30 = vsel %vm2438_vm5, %v2436_v57, %v4508_v7  ;;  %v10816_v62 = vld [vmem:[#allocation5_spill] sm:$0xff]  ;;  %v10819_v51 = vld [vmem:[#allocation151_spill] sm:$0xff] }
 0x18c   :  { %v2502_v18 = vsel %vm2438_vm5, %v2437_v58, %v4509_v21  ;;  %v7748_v22 = vsel %vm2503_vm7, %v2499_v5, %v4663_v26  ;;  %v7751_v40 = vsel %vm2503_vm7, %v2500_v13, %v4664_v20  ;;  %4956 = vrot.lane.b32.xlu1 %v7499_v11, %s5305_s19  ;;  %v10817_v54 = vunpack.i.l.bf16 %v10816_v62  ;;  %v10822_v58 = vld [vmem:[#allocation148_spill] sm:$0xff]  ;;  %v10824_v20 = vld [vmem:[#allocation75_spill] sm:$0xff] }
 0x18d   :  { %10814 = vst [vmem:[#allocation161_spill] sm:$0xff] %v7748_v22  ;;  %10815 = vst [vmem:[#allocation162_spill] sm:$0xff] %v7751_v40  ;;  %v4208_v6 = vunpack.i.l.bf16 %v10819_v51  ;;  %v7763_v7 = vsel %vm2503_vm7, %v2501_v30, %v4668_v23  ;;  %v7766_v21 = vsel %vm2503_vm7, %v2502_v18, %v4669_v42  ;;  %v7768_v57 = vpop.permute.xlu0 %4671  ;;  %v10823_v16 = vunpack.i.l.bf16 %v10822_v58  ;;  %v10827_v42 = vld [vmem:[#allocation71_spill] sm:$0xff]  ;;  %v10834_v22 = vld [vmem:[#allocation6_spill] sm:$0xff] }
 0x18e   :  { %v7759_v19 = vsel %vm2312_vm3, %v10818_v46, %v10817_v54  ;;  %10820 = vst [vmem:[#allocation164_spill] sm:$0xff] %v7763_v7  ;;  %10821 = vst [vmem:[#allocation114_spill] sm:$0xff] %v7766_v21  ;;  %v4209_v47 = vunpack.i.h.bf16 %v10819_v51  ;;  %v4214_v10 = vunpack.i.h.bf16 %v10825_v41  ;;  %v4213_v5 = vunpack.i.l.bf16 %v10825_v41  ;;  %v7779_v13 = vpop.permute.xlu1 %4676  ;;  %v10828_v18 = vld [vmem:[#allocation155_spill] sm:$0xff]  ;;  %v10830_v51 = vld [vmem:[#allocation156_spill] sm:$0xff] }
 0x18f   :  { %v7774_v26 = vsel %vm2375_vm4, %v10824_v20, %v10823_v16  ;;  %v10826_v23 = vunpack.i.h.bf16 %v10822_v58  ;;  %v4219_v62 = vunpack.i.h.bf16 %v10828_v18  ;;  %v4218_v54 = vunpack.i.l.bf16 %v10828_v18  ;;  %v10829_v46 = vld [vmem:[#allocation127_spill] sm:$0xff]  ;;  %v10831_v41 = vld [vmem:[#allocation157_spill] sm:$0xff] }
 0x190   :  { %4961 = vrot.lane.b32.xlu0 %v10829_v46, %s5306_s1  ;;  %v4224_v16 = vunpack.i.h.bf16 %v10830_v51  ;;  %v4223_v20 = vunpack.i.l.bf16 %v10830_v51  ;;  %v4229_v21 = vunpack.i.h.bf16 %v10831_v41  ;;  %v4228_v7 = vunpack.i.l.bf16 %v10831_v41  ;;  %4966 = vrot.lane.b32.xlu1 %v4965_v37, %s5306_s1  ;;  %v10832_v58 = vld [vmem:[#allocation67_spill] sm:$0xff]  ;;  %v10837_v41 = vld [vmem:[#allocation96_spill] sm:$0xff] }
 0x191   :  { %v7785_v30 = vsel %vm2375_vm4, %v10827_v42, %v10826_v23  ;;  %v2380_v23 = vsel %vm2375_vm4, %v10832_v58, %v4208_v6  ;;  %v10833_v42 = vld [vmem:[#allocation7_spill] sm:$0xff]  ;;  %v4238_v34 = vunpack.i.l.bf16 %v10834_v22  ;;  %v7801_v46 = vpop.permute.xlu0 %4681  ;;  %v2381_v51 = vsel %vm2375_vm4, %v10835_v56, %v4209_v47  ;;  %v10841_v56 = vld [vmem:[#allocation168_spill] sm:$0xff] }
 0x192   :  { %v4234_v40 = vunpack.i.h.bf16 %v10833_v42  ;;  %v4233_v18 = vunpack.i.l.bf16 %v10833_v42  ;;  %v2383_v35 = vsel %vm2375_vm4, %v10836_v32, %v4214_v10  ;;  %v2382_v37 = vsel %vm2375_vm4, %v10837_v41, %v4213_v5  ;;  %v7810_v6 = vpop.permute.xlu1 %4686  ;;  %v10838_v58 = vld [vmem:[#allocation191_spill] sm:$0xff]  ;;  %v10842_v32 = vld [vmem:[#allocation192_spill] sm:$0xff]  ;;  %v10843_v10 = vld [vmem:[#allocation193_spill] sm:$0xff] }
 0x193   :  { %v4239_v28 = vunpack.i.h.bf16 %v10834_v22  ;;  %v2384_v42 = vsel %vm2375_vm4, %v10838_v58, %v4218_v54  ;;  %v7816_v43 = vsel %vm2375_vm4, %v10839_v12, %v4219_v62  ;;  %v7823_v47 = vsel %vm2375_vm4, %v10842_v32, %v4224_v16  ;;  %v10844_v5 = vld [vmem:[#allocation194_spill] sm:$0xff]  ;;  %v10845_v41 = vld [vmem:[#allocation97_spill] sm:$0xff]  ;;  %v10846_v62 = vld [vmem:[#allocation4_spill] sm:$0xff] }
 0x194   :  { %4971 = vrot.lane.b32.xlu0 %v10841_v56, %s5307_s26  ;;  %v7827_v22 = vsel %vm2375_vm4, %v10843_v10, %v4223_v20  ;;  %v7831_v54 = vsel %vm2375_vm4, %v10844_v5, %v4228_v7  ;;  %v7835_v12 = vsel %vm2375_vm4, %v10845_v41, %v4229_v21  ;;  %4976 = vrot.lane.b32.xlu1 %v10846_v62, %s5307_s26  ;;  %v10847_v58 = vld [vmem:[#allocation98_spill] sm:$0xff]  ;;  %v10848_v16 = vld [vmem:[#allocation195_spill] sm:$0xff]  ;;  %v10849_v20 = vld [vmem:[#allocation197_spill] sm:$0xff]  ;;  %v4243_v7 = vunpack.i.l.bf16 %v10840_v14 }
 0x195   :  { %v7841_v56 = vsel %vm2375_vm4, %v10847_v58, %v4234_v40  ;;  %v7845_v32 = vsel %vm2375_vm4, %v10848_v16, %v4233_v18  ;;  %v7849_v10 = vsel %vm2375_vm4, %v10849_v20, %v4238_v34  ;;  %v7852_v5 = vpop.permute.xlu0 %4691  ;;  %v10850_v21 = vld [vmem:[#allocation196_spill] sm:$0xff]  ;;  %v10851_v62 = vld [vmem:[#allocation158_spill] sm:$0xff]  ;;  %v10852_v58 = vld [vmem:[#allocation159_spill] sm:$0xff]  ;;  %v4364_v60 = vunpack.i.h.bf16 %v10856_v1 }
 0x196   :  { %v7856_v41 = vsel %vm2375_vm4, %v10850_v21, %v4239_v28  ;;  %v4249_v15 = vunpack.i.h.bf16 %v10851_v62  ;;  %v4248_v40 = vunpack.i.l.bf16 %v10851_v62  ;;  %v4254_v39 = vunpack.i.h.bf16 %v10852_v58  ;;  %v7861_v18 = vpop.permute.xlu1 %4696  ;;  %v10853_v16 = vld [vmem:[#allocation202_spill] sm:$0xff]  ;;  %v10854_v20 = vld [vmem:[#allocation181_spill] sm:$0xff] }
 0x197   :  { %v7865_v34 = vsel %vm2375_vm4, %v10853_v16, %v4244_v4  ;;  %v4253_v14 = vunpack.i.l.bf16 %v10852_v58  ;;  %v4354_v45 = vunpack.i.h.bf16 %v10854_v20  ;;  %v4353_v25 = vunpack.i.l.bf16 %v10854_v20  ;;  %v10855_v28 = vld [vmem:[#allocation182_spill] sm:$0xff]  ;;  %v10858_v4 = vld [vmem:[#allocation203_spill] sm:$0xff] }
 0x198   :  { %4981 = vrot.lane.b32.xlu0 %v7499_v11, %s5308_s27  ;;  %v4359_v21 = vunpack.i.h.bf16 %v10855_v28  ;;  %v4358_v62 = vunpack.i.l.bf16 %v10855_v28  ;;  %4986 = vrot.lane.b32.xlu1 %v10857_v55, %s5308_s27  ;;  %v2394_v16 = vsel %vm2375_vm4, %v10858_v4, %v4243_v7  ;;  %v4363_v58 = vunpack.i.l.bf16 %v10856_v1  ;;  %v10860_v11 = vld [vmem:[#allocation207_spill] sm:$0xff]  ;;  %v10861_v28 = vld [vmem:[#allocation206_spill] sm:$0xff] }
 0x199   :  { %v4369_v29 = vunpack.i.h.bf16 %v10859_v2  ;;  %v4368_v20 = vunpack.i.l.bf16 %v10859_v2  ;;  %v7882_v53 = vpop.permute.xlu0 %4701  ;;  %v2396_v38 = vsel %vm2375_vm4, %v10860_v11, %v4248_v40  ;;  %v2397_v50 = vsel %vm2375_vm4, %v10861_v28, %v4249_v15  ;;  %v10864_v2 = vld [vmem:[#allocation198_spill] sm:$0xff]  ;;  %v10866_v15 = vld [vmem:[#allocation32_spill] sm:$0xff]  ;;  %v10872_v28 = vld [vmem:[#allocation89_spill] sm:$0xff] }
 0x19a   :  { %v7890_v55 = vsel %vm2375_vm4, %v10862_v27, %v4254_v39  ;;  %v4373_v7 = vunpack.i.l.bf16 %v10863_v48  ;;  %v7893_v4 = vpop.permute.xlu1 %4706  ;;  %v2398_v1 = vsel %vm2375_vm4, %v7759_v19, %v4253_v14  ;;  %v7899_v9 = vsel %vm2438_vm5, %v10864_v2, %v4354_v45  ;;  %v10867_v45 = vld [vmem:[#allocation45_spill] sm:$0xff]  ;;  %v10869_v11 = vld [vmem:[#allocation188_spill] sm:$0xff]  ;;  %v10873_v2 = vld [vmem:[#allocation90_spill] sm:$0xff] }
 0x19b   :  { %v7903_v40 = vsel %vm2438_vm5, %v10865_v3, %v4353_v25  ;;  %v7909_v27 = vsel %vm2438_vm5, %v7774_v26, %v4358_v62  ;;  %v7913_v39 = vsel %vm2438_vm5, %v7785_v30, %v4359_v21  ;;  %v7916_v19 = vsel %vm2438_vm5, %v2381_v51, %v4364_v60  ;;  %v10868_v60 = vld [vmem:[#allocation187_spill] sm:$0xff] }
 0x19c   :  { %4991 = vrot.lane.b32.xlu0 %v10866_v15, %s5305_s19  ;;  %4996 = vrot.lane.b32.xlu1 %v10867_v45, %s5305_s19  ;;  %v7921_v3 = vsel %vm2438_vm5, %v2380_v23, %v4363_v58  ;;  %v7924_v25 = vsel %vm2438_vm5, %v2382_v37, %v4368_v20  ;;  %v7927_v14 = vsel %vm2438_vm5, %v2383_v35, %v4369_v29  ;;  %v4374_v26 = vunpack.i.h.bf16 %v10863_v48  ;;  %v10870_v20 = vld [vmem:[#allocation189_spill] sm:$0xff]  ;;  %v10871_v48 = vld [vmem:[#allocation34_spill] sm:$0xff] }
 0x19d   :  { %v7930_v62 = vpop.permute.xlu0 %4711  ;;  %v7933_v30 = vsel %vm2438_vm5, %v2384_v42, %v4373_v7  ;;  %v4379_v51 = vunpack.i.h.bf16 %v10868_v60  ;;  %v4378_v21 = vunpack.i.l.bf16 %v10868_v60  ;;  %v4383_v23 = vunpack.i.l.bf16 %v10869_v11  ;;  %v10874_v60 = vld [vmem:[#allocation129_spill] sm:$0xff] }
 0x19e   :  { %v7938_v58 = vpop.permute.xlu1 %4716  ;;  %v4384_v37 = vunpack.i.h.bf16 %v10869_v11  ;;  %v4389_v29 = vunpack.i.h.bf16 %v10870_v20  ;;  %v4388_v35 = vunpack.i.l.bf16 %v10870_v20  ;;  %v4394_v42 = vunpack.i.h.bf16 %v10872_v28 }
 0x19f   :  { %v4393_v7 = vunpack.i.l.bf16 %v10872_v28  ;;  %v4398_v15 = vunpack.i.l.bf16 %v10873_v2  ;;  %v4399_v8 = vunpack.i.h.bf16 %v10873_v2  ;;  %v4404_v11 = vunpack.i.h.bf16 %v10875_v33 }
 0x1a0   :  { %5001 = vrot.lane.b32.xlu0 %v10871_v48, %s5306_s1  ;;  %5006 = vrot.lane.b32.xlu1 %v10874_v60, %s5306_s1  ;;  %v4408_v20 = vunpack.i.l.bf16 %v10876_v24  ;;  %v7958_v48 = vsel %vm2438_vm5, %v7816_v43, %v4374_v26  ;;  %v7962_v28 = vsel %vm2438_vm5, %v7827_v22, %v4378_v21  ;;  %v7966_v60 = vsel %vm2438_vm5, %v7823_v47, %v4379_v51  ;;  %v10877_v47 = vld [vmem:[#allocation42_spill] sm:$0xff] }
 0x1a1   :  { %v7954_v59 = vpop.permute.xlu0 %4721  ;;  %v7970_v2 = vsel %vm2438_vm5, %v7831_v54, %v4383_v23  ;;  %v7976_v61 = vsel %vm2438_vm5, %v7835_v12, %v4384_v37  ;;  %v7980_v43 = vsel %vm2438_vm5, %v7845_v32, %v4388_v35  ;;  %v7984_v22 = vsel %vm2438_vm5, %v7841_v56, %v4389_v29  ;;  %v10878_v32 = vld [vmem:[#allocation43_spill] sm:$0xff]  ;;  %v10880_v23 = vld [vmem:[#allocation128_spill] sm:$0xff] }
 0x1a2   :  { %v7972_v33 = vpop.permute.xlu1 %4726  ;;  %v7990_v54 = vsel %vm2438_vm5, %v7849_v10, %v4393_v7  ;;  %v7994_v26 = vsel %vm2438_vm5, %v7856_v41, %v4394_v42  ;;  %v7997_v12 = vsel %vm2438_vm5, %v2394_v16, %v4398_v15  ;;  %v8003_v56 = vsel %vm2438_vm5, %v7865_v34, %v4399_v8  ;;  %v10881_v8 = vld [vmem:[#allocation48_spill] sm:$0xff] }
 0x1a3   :  { %v8006_v51 = vsel %vm2438_vm5, %v2396_v38, %v4403_v44  ;;  %v8009_v10 = vsel %vm2438_vm5, %v2397_v50, %v4404_v11  ;;  %v8012_v21 = vsel %vm2438_vm5, %v2398_v1, %v4408_v20  ;;  %v4513_v37 = vunpack.i.l.bf16 %v10880_v23  ;;  %v10882_v1 = vld [vmem:[#allocation30_spill] sm:$0xff] }
 0x1a4   :  { %5011 = vrot.lane.b32.xlu0 %v10877_v47, %s5307_s26  ;;  %5016 = vrot.lane.b32.xlu1 %v10878_v32, %s5307_s26  ;;  %v4514_v44 = vunpack.i.h.bf16 %v10880_v23  ;;  %v4674_v50 = vunpack.i.h.bf16 %v7768_v57  ;;  %v4673_v38 = vunpack.i.l.bf16 %v7768_v57  ;;  %v4518_v29 = vunpack.i.l.bf16 %v10882_v1  ;;  %v10883_v32 = vld [vmem:[#allocation52_spill] sm:$0xff] }
 0x1a5   :  { %v8014_v41 = vpop.permute.xlu0 %4731  ;;  %v4519_v15 = vunpack.i.h.bf16 %v10882_v1  ;;  %v4678_v57 = vunpack.i.l.bf16 %v7779_v13 }
 0x1a6   :  { %10879 = vst [vmem:[#allocation165_spill] sm:$0xff] %v8014_v41  ;;  %v4737_v16 = vpop.permute.xlu1 %4736  ;;  %v2505_v11 = vsel %vm2503_vm7, %v7899_v9, %v4514_v44 }
 0x1a7   :  { %v4739_v35 = vunpack.i.h.bf16 %v4737_v16  ;;  %v4738_v42 = vunpack.i.l.bf16 %v4737_v16  ;;  %v2570_v23 = vsel %vm2568_vm8, %v2505_v11, %v4674_v50 }
 0x1a8   :  { %5021 = vrot.lane.b32.xlu0 %v10867_v45, %s5308_s27  ;;  %5026 = vrot.lane.b32.xlu1 %v10881_v8, %s5308_s27  ;;  %v2504_v45 = vsel %vm2503_vm7, %v7903_v40, %v4513_v37  ;;  %v4679_v40 = vunpack.i.h.bf16 %v7779_v13  ;;  %v2507_v13 = vsel %vm2503_vm7, %v7913_v39, %v4519_v15 }
 0x1a9   :  { %v4742_v34 = vpop.permute.xlu0 %4741  ;;  %v2569_v16 = vsel %vm2568_vm8, %v2504_v45, %v4673_v38  ;;  %v10884_v38 = vld [vmem:[#allocation130_spill] sm:$0xff] }
 0x1aa   :  { %v4747_v7 = vpop.permute.xlu1 %4746  ;;  %v4743_v37 = vunpack.i.l.bf16 %v4742_v34  ;;  %v4744_v49 = vunpack.i.h.bf16 %v4742_v34  ;;  %v2634_v44 = vsel %vm2633_vm9, %v2569_v16, %v4738_v42 }
 0x1ab   :  { %v4749_v20 = vunpack.i.h.bf16 %v4747_v7  ;;  %v4748_v47 = vunpack.i.l.bf16 %v4747_v7  ;;  %v2635_v7 = vsel %vm2633_vm9, %v2570_v23, %v4739_v35  ;;  %v2572_v35 = vsel %vm2568_vm8, %v2507_v13, %v4679_v40  ;;  %v10886_v40 = vld [vmem:[#allocation49_spill] sm:$0xff] }
 0x1ac   :  { %5031 = vrot.lane.b32.xlu0 %v10881_v8, %s5305_s19  ;;  %5036 = vrot.lane.b32.xlu1 %v10883_v32, %s5305_s19  ;;  %v2506_v8 = vsel %vm2503_vm7, %v7909_v27, %v4518_v29  ;;  %v10885_v27 = vld [vmem:[#allocation133_spill] sm:$0xff]  ;;  %v2637_v39 = vsel %vm2633_vm9, %v2572_v35, %v4744_v49 }
 0x1ad   :  { %v4752_v1 = vpop.permute.xlu0 %4751  ;;  %v2571_v50 = vsel %vm2568_vm8, %v2506_v8, %v4678_v57  ;;  %v2699_v34 = vsel %vm2698_vm10, %v2634_v44, %v4748_v47  ;;  %v2700_v29 = vsel %vm2698_vm10, %v2635_v7, %v4749_v20  ;;  %v4523_v8 = vunpack.i.l.bf16 %v7274_v36  ;;  %v10887_v49 = vld [vmem:[#allocation53_spill] sm:$0xff]  ;;  %v10888_v7 = vld [vmem:[#allocation35_spill] sm:$0xff] }
 0x1ae   :  { %v4757_v9 = vpop.permute.xlu1 %4756  ;;  %v4754_v0 = vunpack.i.h.bf16 %v4752_v1  ;;  %v4753_v31 = vunpack.i.l.bf16 %v4752_v1  ;;  %v2636_v42 = vsel %vm2633_vm9, %v2571_v50, %v4743_v37  ;;  %v4524_v37 = vunpack.i.h.bf16 %v7274_v36 }
 0x1af   :  { %v4759_v52 = vunpack.i.h.bf16 %v4757_v9  ;;  %v4758_v41 = vunpack.i.l.bf16 %v4757_v9  ;;  %v4684_v9 = vunpack.i.h.bf16 %v7801_v46 }
 0x1b0   :  { %5041 = vrot.lane.b32.xlu0 %v10884_v38, %s5306_s1  ;;  %5046 = vrot.lane.b32.xlu1 %v10885_v27, %s5306_s1  ;;  %v2701_v47 = vsel %vm2698_vm10, %v2636_v42, %v4753_v31  ;;  %v2702_v20 = vsel %vm2698_vm10, %v2637_v39, %v4754_v0  ;;  %v4683_v31 = vunpack.i.l.bf16 %v7801_v46  ;;  %v4528_v38 = vunpack.i.l.bf16 %v10888_v7 }
 0x1b1   :  { %v4762_v45 = vpop.permute.xlu0 %4761  ;;  %v2764_v11 = vsel %vm2763_vm11, %v2699_v34, %v4758_v41  ;;  %v2765_v16 = vsel %vm2763_vm11, %v2700_v29, %v4759_v52  ;;  %v2508_v27 = vsel %vm2503_vm7, %v7921_v3, %v4523_v8  ;;  %v4529_v34 = vunpack.i.h.bf16 %v10888_v7 }
 0x1b2   :  { %v4764_v15 = vunpack.i.h.bf16 %v4762_v45  ;;  %v4763_v57 = vunpack.i.l.bf16 %v4762_v45  ;;  %v4767_v23 = vpop.permute.xlu1 %4766  ;;  %v2828_v1 = vpack.c.bf16 %v2765_v16, %v2764_v11  ;;  %v2509_v46 = vsel %vm2503_vm7, %v7916_v19, %v4524_v37  ;;  %v10889_v45 = vld [vmem:[#allocation100_spill] sm:$0xff] }
 0x1b3   :  { %v4769_v13 = vunpack.i.h.bf16 %v4767_v23  ;;  %v4768_v50 = vunpack.i.l.bf16 %v4767_v23  ;;  %v4688_v29 = vunpack.i.l.bf16 %v7810_v6  ;;  %v2573_v11 = vsel %vm2568_vm8, %v2508_v27, %v4683_v31 }
 0x1b4   :  { %5051 = vrot.lane.b32.xlu0 %v10886_v40, %s5307_s26  ;;  %v2766_v41 = vsel %vm2763_vm11, %v2701_v47, %v4763_v57  ;;  %v2767_v52 = vsel %vm2763_vm11, %v2702_v20, %v4764_v15  ;;  %5056 = vrot.lane.b32.xlu1 %v10887_v49, %s5307_s26  ;;  %v2574_v3 = vsel %vm2568_vm8, %v2509_v46, %v4684_v9  ;;  %v4689_v16 = vunpack.i.h.bf16 %v7810_v6 }
 0x1b5   :  { %3959 = vmatprep.mubr.msk.bf16.mxu0 %vm2880_vm12, %v2828_v1  ;;  %v4772_v44 = vpop.permute.xlu0 %4771  ;;  %v2829_v0 = vpack.c.bf16 %v2767_v52, %v2766_v41  ;;  %v2510_v15 = vsel %vm2503_vm7, %v7924_v25, %v4528_v38  ;;  %v2638_v19 = vsel %vm2633_vm9, %v2573_v11, %v4768_v50  ;;  %v2639_v57 = vsel %vm2633_vm9, %v2574_v3, %v4769_v13  ;;  %v10890_v52 = vld [vmem:[#allocation101_spill] sm:$0xff] }
 0x1b6   :  { %v4777_v36 = vpop.permute.xlu1 %4776  ;;  %v4773_v39 = vunpack.i.l.bf16 %v4772_v44  ;;  %v4774_v23 = vunpack.i.h.bf16 %v4772_v44  ;;  %v2511_v6 = vsel %vm2503_vm7, %v7927_v14, %v4529_v34  ;;  %v2575_v37 = vsel %vm2568_vm8, %v2510_v15, %v4688_v29 }
 0x1b7   :  { %3960 = vmatmul.mubr.msk.bf16.vlgmr.msra.gmra.mrb[0].mxu0 %vm2880_vm12, %v2829_v0  ;;  %v4779_v35 = vunpack.i.h.bf16 %v4777_v36  ;;  %v4778_v42 = vunpack.i.l.bf16 %v4777_v36  ;;  %v2576_v49 = vsel %vm2568_vm8, %v2511_v6, %v4689_v16  ;;  %v10891_v36 = vld [vmem:[#allocation38_spill] sm:$0xff]  ;;  %v10894_v16 = vld [vmem:[#allocation136_spill] sm:$0xff]  ;;  %v4698_v6 = vunpack.i.l.bf16 %v7861_v18 }
 0x1b8   :  { %5061 = vrot.lane.b32.xlu0 %v10883_v32, %s5308_s27  ;;  %5066 = vrot.lane.b32.xlu1 %v10889_v45, %s5308_s27  ;;  %v2640_v9 = vsel %vm2633_vm9, %v2575_v37, %v4773_v39  ;;  %v2641_v14 = vsel %vm2633_vm9, %v2576_v49, %v4774_v23  ;;  %v4534_v27 = vunpack.i.h.bf16 %v10891_v36  ;;  %v4533_v34 = vunpack.i.l.bf16 %v10891_v36 }
 0x1b9   :  { %v4782_v32 = vpop.permute.xlu0 %4781  ;;  %v2703_v25 = vsel %vm2698_vm10, %v2638_v19, %v4778_v42  ;;  %v2704_v41 = vsel %vm2698_vm10, %v2639_v57, %v4779_v35  ;;  %v10892_v35 = vld [vmem:[#allocation134_spill] sm:$0xff]  ;;  %v10893_v42 = vld [vmem:[#allocation39_spill] sm:$0xff]  ;;  %v4694_v39 = vunpack.i.h.bf16 %v7852_v5 }
 0x1ba   :  { %v4787_v1 = vpop.permute.xlu1 %4786  ;;  %v4784_v8 = vunpack.i.h.bf16 %v4782_v32  ;;  %v4783_v47 = vunpack.i.l.bf16 %v4782_v32  ;;  %v4693_v32 = vunpack.i.l.bf16 %v7852_v5  ;;  %v4539_v57 = vunpack.i.h.bf16 %v10893_v42 }
 0x1bb   :  { %v4789_v20 = vunpack.i.h.bf16 %v4787_v1  ;;  %v4788_v40 = vunpack.i.l.bf16 %v4787_v1 }
 0x1bc   :  { %5071 = vrot.lane.b32.xlu0 %v10889_v45, %s5305_s19  ;;  %5076 = vrot.lane.b32.xlu1 %v10890_v52, %s5305_s19  ;;  %v2705_v46 = vsel %vm2698_vm10, %v2640_v9, %v4783_v47  ;;  %v2706_v29 = vsel %vm2698_vm10, %v2641_v14, %v4784_v8  ;;  %v4538_v45 = vunpack.i.l.bf16 %v10893_v42  ;;  %v2512_v47 = vsel %vm2503_vm7, %v7933_v30, %v4533_v34 }
 0x1bd   :  { %v2768_v31 = vsel %vm2763_vm11, %v2703_v25, %v4788_v40  ;;  %v2769_v44 = vsel %vm2763_vm11, %v2704_v41, %v4789_v20  ;;  %v4792_v0 = vpop.permute.xlu0 %4791  ;;  %v2513_v20 = vsel %vm2503_vm7, %v7958_v48, %v4534_v27  ;;  %v10895_v40 = vld [vmem:[#allocation57_spill] sm:$0xff]  ;;  %v2577_v30 = vsel %vm2568_vm8, %v2512_v47, %v4693_v32  ;;  %v10897_v27 = vld [vmem:[#allocation44_spill] sm:$0xff] }
 0x1be   :  { %v4794_v7 = vunpack.i.h.bf16 %v4792_v0  ;;  %v4793_v38 = vunpack.i.l.bf16 %v4792_v0  ;;  %v4797_v13 = vpop.permute.xlu1 %4796  ;;  %v2830_v50 = vpack.c.bf16 %v2769_v44, %v2768_v31  ;;  %v2514_v5 = vsel %vm2503_vm7, %v7962_v28, %v4538_v45  ;;  %v10896_v41 = vld [vmem:[#allocation61_spill] sm:$0xff] }
 0x1bf   :  { %v4799_v23 = vunpack.i.h.bf16 %v4797_v13  ;;  %v4798_v1 = vunpack.i.l.bf16 %v4797_v13  ;;  %v2578_v49 = vsel %vm2568_vm8, %v2513_v20, %v4694_v39  ;;  %v4699_v48 = vunpack.i.h.bf16 %v7861_v18 }
 0x1c0   :  { %5081 = vrot.lane.b32.xlu0 %v10892_v35, %s5306_s1  ;;  %v2770_v11 = vsel %vm2763_vm11, %v2705_v46, %v4793_v38  ;;  %v2771_v3 = vsel %vm2763_vm11, %v2706_v29, %v4794_v7  ;;  %5086 = vrot.lane.b32.xlu1 %v10894_v16, %s5306_s1  ;;  %v2515_v44 = vsel %vm2503_vm7, %v7966_v60, %v4539_v57  ;;  %v4544_v18 = vunpack.i.h.bf16 %v10897_v27  ;;  %v10898_v29 = vld [vmem:[#allocation102_spill] sm:$0xff]  ;;  %v10899_v57 = vld [vmem:[#allocation41_spill] sm:$0xff] }
 0x1c1   :  { %3963 = vmatprep.mubr.msk.bf16.mxu0 %vm2880_vm12, %v2830_v50  ;;  %v4802_v15 = vpop.permute.xlu0 %4801  ;;  %v2831_v19 = vpack.c.bf16 %v2771_v3, %v2770_v11  ;;  %v2642_v28 = vsel %vm2633_vm9, %v2577_v30, %v4798_v1  ;;  %v2643_v0 = vsel %vm2633_vm9, %v2578_v49, %v4799_v23  ;;  %v2579_v34 = vsel %vm2568_vm8, %v2514_v5, %v4698_v6  ;;  %v10900_v5 = vld [vmem:[#allocation103_spill] sm:$0xff] }
 0x1c2   :  { %v4807_v8 = vpop.permute.xlu1 %4806  ;;  %v4803_v9 = vunpack.i.l.bf16 %v4802_v15  ;;  %v4804_v14 = vunpack.i.h.bf16 %v4802_v15  ;;  %v2580_v35 = vsel %vm2568_vm8, %v2515_v44, %v4699_v48  ;;  %v4548_v23 = vunpack.i.l.bf16 %v10899_v57 }
 0x1c3   :  { %3964 = vmatmul.mubr.msk.bf16.gmra.mrb[4].mxu0 %vm2880_vm12, %v2831_v19  ;;  %v4809_v37 = vunpack.i.h.bf16 %v4807_v8  ;;  %v4808_v25 = vunpack.i.l.bf16 %v4807_v8  ;;  %v4543_v19 = vunpack.i.l.bf16 %v10897_v27  ;;  %v4549_v47 = vunpack.i.h.bf16 %v10899_v57 }
 0x1c4   :  { %5091 = vrot.lane.b32.xlu0 %v10895_v40, %s5307_s26  ;;  %5096 = vrot.lane.b32.xlu1 %v10896_v41, %s5307_s26  ;;  %v2644_v42 = vsel %vm2633_vm9, %v2579_v34, %v4803_v9  ;;  %v2645_v3 = vsel %vm2633_vm9, %v2580_v35, %v4804_v14  ;;  %v4704_v6 = vunpack.i.h.bf16 %v7882_v53  ;;  %v2518_v44 = vsel %vm2503_vm7, %v7980_v43, %v4548_v23 }
 0x1c5   :  { %v4812_v31 = vpop.permute.xlu0 %4811  ;;  %v2707_v46 = vsel %vm2698_vm10, %v2642_v28, %v4808_v25  ;;  %v2708_v60 = vsel %vm2698_vm10, %v2643_v0, %v4809_v37  ;;  %v4703_v37 = vunpack.i.l.bf16 %v7882_v53  ;;  %v2516_v9 = vsel %vm2503_vm7, %v7970_v2, %v4543_v19  ;;  %v10901_v28 = vld [vmem:[#allocation137_spill] sm:$0xff]  ;;  %v10902_v2 = vld [vmem:[#allocation140_spill] sm:$0xff] }
 0x1c6   :  { %v4817_v7 = vpop.permute.xlu1 %4816  ;;  %v4814_v38 = vunpack.i.h.bf16 %v4812_v31  ;;  %v4813_v13 = vunpack.i.l.bf16 %v4812_v31  ;;  %v2517_v31 = vsel %vm2503_vm7, %v7976_v61, %v4544_v18  ;;  %v2519_v53 = vsel %vm2503_vm7, %v7984_v22, %v4549_v47 }
 0x1c7   :  { %v4819_v50 = vunpack.i.h.bf16 %v4817_v7  ;;  %v4818_v36 = vunpack.i.l.bf16 %v4817_v7  ;;  %v4708_v0 = vunpack.i.l.bf16 %v7893_v4  ;;  %v2581_v61 = vsel %vm2568_vm8, %v2516_v9, %v4703_v37 }
 0x1c8   :  { %5101 = vrot.lane.b32.xlu0 %v10890_v52, %s5308_s27  ;;  %5106 = vrot.lane.b32.xlu1 %v10898_v29, %s5308_s27  ;;  %v2709_v1 = vsel %vm2698_vm10, %v2644_v42, %v4813_v13  ;;  %v2710_v8 = vsel %vm2698_vm10, %v2645_v3, %v4814_v38  ;;  %v2582_v38 = vsel %vm2568_vm8, %v2517_v31, %v4704_v6  ;;  %v4709_v43 = vunpack.i.h.bf16 %v7893_v4 }
 0x1c9   :  { %v2772_v45 = vsel %vm2763_vm11, %v2707_v46, %v4818_v36  ;;  %v2773_v11 = vsel %vm2763_vm11, %v2708_v60, %v4819_v50  ;;  %v4822_v52 = vpop.permute.xlu0 %4821  ;;  %v10903_v36 = vld [vmem:[#allocation47_spill] sm:$0xff]  ;;  %v2583_v4 = vsel %vm2568_vm8, %v2518_v44, %v4708_v0  ;;  %v4558_v6 = vunpack.i.l.bf16 %v7404_v17 }
 0x1ca   :  { %v2832_v16 = vpack.c.bf16 %v2773_v11, %v2772_v45  ;;  %v4824_v39 = vunpack.i.h.bf16 %v4822_v52  ;;  %v4823_v32 = vunpack.i.l.bf16 %v4822_v52  ;;  %v4827_v15 = vpop.permute.xlu1 %4826  ;;  %v4554_v27 = vunpack.i.h.bf16 %v10903_v36  ;;  %v10904_v45 = vld [vmem:[#allocation64_spill] sm:$0xff] }
 0x1cb   :  { %v4829_v30 = vunpack.i.h.bf16 %v4827_v15  ;;  %v4828_v49 = vunpack.i.l.bf16 %v4827_v15  ;;  %v4553_v11 = vunpack.i.l.bf16 %v10903_v36  ;;  %v4713_v9 = vunpack.i.l.bf16 %v7930_v62 }
 0x1cc   :  { %5111 = vrot.lane.b32.xlu0 %v10898_v29, %s5305_s19  ;;  %v2774_v20 = vsel %vm2763_vm11, %v2709_v1, %v4823_v32  ;;  %v2775_v40 = vsel %vm2763_vm11, %v2710_v8, %v4824_v39  ;;  %5116 = vrot.lane.b32.xlu1 %v10900_v5, %s5305_s19  ;;  %v2584_v39 = vsel %vm2568_vm8, %v2519_v53, %v4709_v43  ;;  %v4719_v43 = vunpack.i.h.bf16 %v7938_v58 }
 0x1cd   :  { %3967 = vmatprep.mubr.msk.bf16.mxu0 %vm2880_vm12, %v2832_v16  ;;  %v2833_v25 = vpack.c.bf16 %v2775_v40, %v2774_v20  ;;  %v4832_v41 = vpop.permute.xlu0 %4831  ;;  %v2646_v18 = vsel %vm2633_vm9, %v2581_v61, %v4828_v49  ;;  %v2647_v22 = vsel %vm2633_vm9, %v2582_v38, %v4829_v30  ;;  %v10905_v16 = vld [vmem:[#allocation68_spill] sm:$0xff]  ;;  %v4559_v40 = vunpack.i.h.bf16 %v7404_v17  ;;  %v10907_v38 = vld [vmem:[#allocation79_spill] sm:$0xff] }
 0x1ce   :  { %v4837_v48 = vpop.permute.xlu1 %4836  ;;  %v4833_v13 = vunpack.i.l.bf16 %v4832_v41  ;;  %v4834_v34 = vunpack.i.h.bf16 %v4832_v41  ;;  %v4409_v41 = vunpack.i.h.bf16 %v10876_v24  ;;  %v4714_v17 = vunpack.i.h.bf16 %v7930_v62 }
 0x1cf   :  { %3968 = vmatmul.mubr.msk.bf16.gmra.mrb[8].mxu0 %vm2880_vm12, %v2833_v25  ;;  %v4839_v14 = vunpack.i.h.bf16 %v4837_v48  ;;  %v4838_v7 = vunpack.i.l.bf16 %v4837_v48  ;;  %v10906_v48 = vld [vmem:[#allocation104_spill] sm:$0xff]  ;;  %v2521_v24 = vsel %vm2503_vm7, %v7994_v26, %v4554_v27  ;;  %v4563_v62 = vunpack.i.l.bf16 %v7432_v63 }
 0x1d0   :  { %5121 = vrot.lane.b32.xlu0 %v10901_v28, %s5306_s1  ;;  %5126 = vrot.lane.b32.xlu1 %v10902_v2, %s5306_s1  ;;  %v2648_v32 = vsel %vm2633_vm9, %v2583_v4, %v4833_v13  ;;  %v2649_v23 = vsel %vm2633_vm9, %v2584_v39, %v4834_v34  ;;  %v4564_v2 = vunpack.i.h.bf16 %v7432_v63  ;;  %v10910_v4 = vld [vmem:[#allocation143_spill] sm:$0xff] }
 0x1d1   :  { %v4842_v50 = vpop.permute.xlu0 %4841  ;;  %v2711_v52 = vsel %vm2698_vm10, %v2646_v18, %v4838_v7  ;;  %v2712_v3 = vsel %vm2698_vm10, %v2647_v22, %v4839_v14  ;;  %v2522_v14 = vsel %vm2503_vm7, %v7997_v12, %v4558_v6  ;;  %v2523_v7 = vsel %vm2503_vm7, %v8003_v56, %v4559_v40  ;;  %v10911_v40 = vld [vmem:[#allocation72_spill] sm:$0xff] }
 0x1d2   :  { %v4847_v46 = vpop.permute.xlu1 %4846  ;;  %v4844_v60 = vunpack.i.h.bf16 %v4842_v50  ;;  %v4843_v29 = vunpack.i.l.bf16 %v4842_v50  ;;  %v2586_v56 = vsel %vm2568_vm8, %v2521_v24, %v4714_v17 }
 0x1d3   :  { %v4849_v35 = vunpack.i.h.bf16 %v4847_v46  ;;  %v4848_v42 = vunpack.i.l.bf16 %v4847_v46 }
 0x1d4   :  { %5131 = vrot.lane.b32.xlu0 %v10904_v45, %s5307_s26  ;;  %5136 = vrot.lane.b32.xlu1 %v10905_v16, %s5307_s26  ;;  %v2713_v37 = vsel %vm2698_vm10, %v2648_v32, %v4843_v29  ;;  %v2714_v25 = vsel %vm2698_vm10, %v2649_v23, %v4844_v60  ;;  %v10908_v29 = vld [vmem:[#allocation141_spill] sm:$0xff] }
 0x1d5   :  { %v2776_v15 = vsel %vm2763_vm11, %v2711_v52, %v4848_v42  ;;  %v2777_v19 = vsel %vm2763_vm11, %v2712_v3, %v4849_v35  ;;  %v4852_v57 = vpop.permute.xlu0 %4851  ;;  %v10909_v35 = vld [vmem:[#allocation46_spill] sm:$0xff]  ;;  %v2588_v52 = vsel %vm2568_vm8, %v2523_v7, %v4719_v43 }
 0x1d6   :  { %v2834_v1 = vpack.c.bf16 %v2777_v19, %v2776_v15  ;;  %v4854_v8 = vunpack.i.h.bf16 %v4852_v57  ;;  %v4853_v47 = vunpack.i.l.bf16 %v4852_v57  ;;  %v4857_v20 = vpop.permute.xlu1 %4856  ;;  %v4569_v42 = vunpack.i.h.bf16 %v10909_v35 }
 0x1d7   :  { %v4859_v28 = vunpack.i.h.bf16 %v4857_v20  ;;  %v4858_v53 = vunpack.i.l.bf16 %v4857_v20 }
 0x1d8   :  { %5141 = vrot.lane.b32.xlu0 %v10900_v5, %s5308_s27  ;;  %v2778_v30 = vsel %vm2763_vm11, %v2713_v37, %v4853_v47  ;;  %v2779_v49 = vsel %vm2763_vm11, %v2714_v25, %v4854_v8  ;;  %5146 = vrot.lane.b32.xlu1 %v10906_v48, %s5308_s27  ;;  %v2520_v5 = vsel %vm2503_vm7, %v7990_v54, %v4553_v11  ;;  %v4718_v54 = vunpack.i.l.bf16 %v7938_v58  ;;  %v10912_v25 = vld [vmem:[#allocation76_spill] sm:$0xff] }
 0x1d9   :  { %3971 = vmatprep.mubr.msk.bf16.mxu0 %vm2880_vm12, %v2834_v1  ;;  %v2835_v31 = vpack.c.bf16 %v2779_v49, %v2778_v30  ;;  %v4862_v44 = vpop.permute.xlu0 %4861  ;;  %v2585_v12 = vsel %vm2568_vm8, %v2520_v5, %v4713_v9  ;;  %v2651_v27 = vsel %vm2633_vm9, %v2586_v56, %v4859_v28  ;;  %v4568_v8 = vunpack.i.l.bf16 %v10909_v35 }
 0x1da   :  { %v4867_v0 = vpop.permute.xlu1 %4866  ;;  %v4863_v13 = vunpack.i.l.bf16 %v4862_v44  ;;  %v2650_v36 = vsel %vm2633_vm9, %v2585_v12, %v4858_v53  ;;  %v4864_v63 = vunpack.i.h.bf16 %v4862_v44  ;;  %v2587_v45 = vsel %vm2568_vm8, %v2522_v14, %v4718_v54 }
 0x1db   :  { %3972 = vmatmul.mubr.msk.bf16.gmra.mrb[12].mxu0 %vm2880_vm12, %v2835_v31  ;;  %v4869_v26 = vunpack.i.h.bf16 %v4867_v0  ;;  %v4868_v61 = vunpack.i.l.bf16 %v4867_v0  ;;  %v2462_v30 = vsel %vm2438_vm5, %v7890_v55, %v4409_v41  ;;  %v4724_v49 = vunpack.i.h.bf16 %v7954_v59  ;;  %v10913_v0 = vld [vmem:[#allocation105_spill] sm:$0xff] }
 0x1dc   :  { %5151 = vrot.lane.b32.xlu0 %v10906_v48, %s5305_s19  ;;  %5156 = vrot.lane.b32.xlu1 %v10907_v38, %s5305_s19  ;;  %v2652_v3 = vsel %vm2633_vm9, %v2587_v45, %v4863_v13  ;;  %v2653_v15 = vsel %vm2633_vm9, %v2588_v52, %v4864_v63  ;;  %v4723_v48 = vunpack.i.l.bf16 %v7954_v59  ;;  %v2524_v31 = vsel %vm2503_vm7, %v8006_v51, %v4563_v62 }
 0x1dd   :  { %v4872_v50 = vpop.permute.xlu0 %4871  ;;  %v2715_v58 = vsel %vm2698_vm10, %v2650_v36, %v4868_v61  ;;  %v2716_v11 = vsel %vm2698_vm10, %v2651_v27, %v4869_v26  ;;  %v2525_v44 = vsel %vm2503_vm7, %v8009_v10, %v4564_v2  ;;  %v2526_v53 = vsel %vm2503_vm7, %v8012_v21, %v4568_v8  ;;  %v10914_v36 = vld [vmem:[#allocation106_spill] sm:$0xff] }
 0x1de   :  { %v4877_v18 = vpop.permute.xlu1 %4876  ;;  %v4874_v22 = vunpack.i.h.bf16 %v4872_v50  ;;  %v4873_v34 = vunpack.i.l.bf16 %v4872_v50  ;;  %v2527_v55 = vsel %vm2503_vm7, %v2462_v30, %v4569_v42  ;;  %v4728_v59 = vunpack.i.l.bf16 %v7972_v33 }
 0x1df   :  { %v4879_v46 = vunpack.i.h.bf16 %v4877_v18  ;;  %v4878_v60 = vunpack.i.l.bf16 %v4877_v18  ;;  %v2589_v10 = vsel %vm2568_vm8, %v2524_v31, %v4723_v48  ;;  %v2590_v14 = vsel %vm2568_vm8, %v2525_v44, %v4724_v49  ;;  %v10921_v31 = vld [vmem:[#allocation50_spill] sm:$0xff] }
 0x1e0   :  { %5161 = vrot.lane.b32.xlu0 %v10908_v29, %s5306_s1  ;;  %5166 = vrot.lane.b32.xlu1 %v10910_v4, %s5306_s1  ;;  %v2717_v47 = vsel %vm2698_vm10, %v2652_v3, %v4873_v34  ;;  %v2718_v20 = vsel %vm2698_vm10, %v2653_v15, %v4874_v22  ;;  %v4729_v21 = vunpack.i.h.bf16 %v7972_v33  ;;  %v2591_v13 = vsel %vm2568_vm8, %v2526_v53, %v4728_v59  ;;  %v10916_v3 = vld [vmem:[#allocation146_spill] sm:$0xff]  ;;  %v10917_v15 = vld [vmem:[#allocation80_spill] sm:$0xff]  ;;  %v10923_v53 = vld [vmem:[#allocation51_spill] sm:$0xff] }
 0x1e1   :  { %v2780_v16 = vsel %vm2763_vm11, %v2715_v58, %v4878_v60  ;;  %v2781_v39 = vsel %vm2763_vm11, %v2716_v11, %v4879_v46  ;;  %v4882_v32 = vpop.permute.xlu0 %4881  ;;  %v10915_v11 = vld [vmem:[#allocation144_spill] sm:$0xff]  ;;  %v10924_v59 = vld [vmem:[#allocation54_spill] sm:$0xff] }
 0x1e2   :  { %v2836_v19 = vpack.c.bf16 %v2781_v39, %v2780_v16  ;;  %v4884_v57 = vunpack.i.h.bf16 %v4882_v32  ;;  %v4883_v23 = vunpack.i.l.bf16 %v4882_v32  ;;  %v4887_v1 = vpop.permute.xlu1 %4886  ;;  %v2592_v27 = vsel %vm2568_vm8, %v2527_v55, %v4729_v21 }
 0x1e3   :  { %v4889_v5 = vunpack.i.h.bf16 %v4887_v1  ;;  %v4888_v24 = vunpack.i.l.bf16 %v4887_v1  ;;  %v10919_v1 = vld [vmem:[#allocation83_spill] sm:$0xff] }
 0x1e4   :  { %5171 = vrot.lane.b32.xlu0 %v10911_v40, %s5307_s26  ;;  %v2782_v6 = vsel %vm2763_vm11, %v2717_v47, %v4883_v23  ;;  %v2783_v37 = vsel %vm2763_vm11, %v2718_v20, %v4884_v57  ;;  %5176 = vrot.lane.b32.xlu1 %v10912_v25, %s5307_s26 }
 0x1e5   :  { %3975 = vmatprep.mubr.msk.bf16.mxu0 %vm2880_vm12, %v2836_v19  ;;  %v2837_v17 = vpack.c.bf16 %v2783_v37, %v2782_v6  ;;  %v4892_v9 = vpop.permute.xlu0 %4891  ;;  %v2654_v62 = vsel %vm2633_vm9, %v2589_v10, %v4888_v24  ;;  %v2655_v54 = vsel %vm2633_vm9, %v2590_v14, %v4889_v5  ;;  %v10918_v19 = vld [vmem:[#allocation165_spill] sm:$0xff] }
 0x1e6   :  { %v4897_v28 = vpop.permute.xlu1 %4896  ;;  %v4893_v7 = vunpack.i.l.bf16 %v4892_v9  ;;  %v4894_v26 = vunpack.i.h.bf16 %v4892_v9  ;;  %v4734_v57 = vunpack.i.h.bf16 %v10918_v19  ;;  %v4733_v23 = vunpack.i.l.bf16 %v10918_v19 }
 0x1e7   :  { %3976 = vmatmul.mubr.msk.bf16.gmra.mrb[16].mxu0 %vm2880_vm12, %v2837_v17  ;;  %v4899_v41 = vunpack.i.h.bf16 %v4897_v28  ;;  %v4898_v51 = vunpack.i.l.bf16 %v4897_v28  ;;  %v10920_v17 = vld [vmem:[#allocation91_spill] sm:$0xff] }
 0x1e8   :  { %5181 = vrot.lane.b32.xlu0 %v10907_v38, %s5308_s27  ;;  %5186 = vrot.lane.b32.xlu1 %v10913_v0, %s5308_s27  ;;  %v2656_v63 = vsel %vm2633_vm9, %v2591_v13, %v4893_v7  ;;  %v2657_v46 = vsel %vm2633_vm9, %v2592_v27, %v4894_v26  ;;  %v2593_v9 = vsel %vm2568_vm8, %v10920_v17, %v4733_v23  ;;  %v10922_v28 = vld [vmem:[#allocation107_spill] sm:$0xff] }
 0x1e9   :  { %v4902_v2 = vpop.permute.xlu0 %4901  ;;  %v2719_v50 = vsel %vm2698_vm10, %v2654_v62, %v4898_v51  ;;  %v2720_v33 = vsel %vm2698_vm10, %v2655_v54, %v4899_v41  ;;  %v2594_v44 = vsel %vm2568_vm8, %v10921_v31, %v4734_v57 }
 0x1ea   :  { %v4907_v61 = vpop.permute.xlu1 %4906  ;;  %v4904_v38 = vunpack.i.h.bf16 %v4902_v2  ;;  %v4903_v12 = vunpack.i.l.bf16 %v4902_v2 }
 0x1eb   :  { %v4909_v56 = vunpack.i.h.bf16 %v4907_v61  ;;  %v4908_v43 = vunpack.i.l.bf16 %v4907_v61 }
 0x1ec   :  { %5191 = vrot.lane.b32.xlu0 %v10913_v0, %s5305_s19  ;;  %5196 = vrot.lane.b32.xlu1 %v10914_v36, %s5305_s19  ;;  %v2721_v45 = vsel %vm2698_vm10, %v2656_v63, %v4903_v12  ;;  %v2722_v58 = vsel %vm2698_vm10, %v2657_v46, %v4904_v38 }
 0x1ed   :  { %v2784_v18 = vsel %vm2763_vm11, %v2719_v50, %v4908_v43  ;;  %v2785_v22 = vsel %vm2763_vm11, %v2720_v33, %v4909_v56  ;;  %v4912_v34 = vpop.permute.xlu0 %4911  ;;  %v10925_v50 = vld [vmem:[#allocation108_spill] sm:$0xff] }
 0x1ee   :  { %v2838_v60 = vpack.c.bf16 %v2785_v22, %v2784_v18  ;;  %v4914_v29 = vunpack.i.h.bf16 %v4912_v34  ;;  %v4913_v35 = vunpack.i.l.bf16 %v4912_v34  ;;  %v4917_v42 = vpop.permute.xlu1 %4916  ;;  %v10926_v34 = vld [vmem:[#allocation150_spill] sm:$0xff] }
 0x1ef   :  { %v4919_v8 = vunpack.i.h.bf16 %v4917_v42  ;;  %v4918_v47 = vunpack.i.l.bf16 %v4917_v42  ;;  %v1557_v46 = vrot.slane %v10926_v34, 2  ;;  %v10929_v42 = vld [vmem:[#allocation180_spill] sm:$0xff] }
 0x1f0   :  { %5201 = vrot.lane.b32.xlu0 %v10915_v11, %s5306_s1  ;;  %v2786_v4 = vsel %vm2763_vm11, %v2721_v45, %v4913_v35  ;;  %v2787_v52 = vsel %vm2763_vm11, %v2722_v58, %v4914_v29  ;;  %5206 = vrot.lane.b32.xlu1 %v10916_v3, %s5306_s1  ;;  %v10928_v35 = vld [vmem:[#allocation147_spill] sm:$0xff]  ;;  %v1560_v45 = vrot.slane %v10929_v42, 2  ;;  %v10930_v58 = vld [vmem:[#allocation152_spill] sm:$0xff] }
 0x1f1   :  { %3979 = vmatprep.mubr.msk.bf16.mxu0 %vm2880_vm12, %v2838_v60  ;;  %v2839_v16 = vpack.c.bf16 %v2787_v52, %v2786_v4  ;;  %v4922_v39 = vpop.permute.xlu0 %4921  ;;  %v2595_v55 = vsel %vm2568_vm8, %v10923_v53, %v4918_v47  ;;  %v2596_v41 = vsel %vm2568_vm8, %v10924_v59, %v4919_v8  ;;  %v10927_v60 = vld [vmem:[#allocation149_spill] sm:$0xff]  ;;  %v10931_v52 = vld [vmem:[#allocation86_spill] sm:$0xff] }
 0x1f2   :  { %v4927_v32 = vpop.permute.xlu1 %4926  ;;  %v4924_v20 = vunpack.i.h.bf16 %v4922_v39  ;;  %v4923_v40 = vunpack.i.l.bf16 %v4922_v39  ;;  %v1558_v29 = vrot.slane %v10927_v60, 2 }
 0x1f3   :  { %3980 = vmatmul.mubr.msk.bf16.gmra.mrb[20].mxu0 %vm2880_vm12, %v2839_v16  ;;  %v4929_v37 = vunpack.i.h.bf16 %v4927_v32  ;;  %v4928_v25 = vunpack.i.l.bf16 %v4927_v32 }
 0x1f4   :  { %5211 = vrot.lane.b32.xlu0 %v10917_v15, %s5307_s26  ;;  %5216 = vrot.lane.b32.xlu1 %v10919_v1, %s5307_s26  ;;  %v2658_v51 = vsel %vm2633_vm9, %v2593_v9, %v4923_v40  ;;  %v2659_v0 = vsel %vm2633_vm9, %v2594_v44, %v4924_v20  ;;  %v1559_v3 = vsel %vm812_vm2, %v1557_v46, %v1558_v29  ;;  %v10932_v15 = vld [vmem:[#allocation88_spill] sm:$0xff]  ;;  %v10935_v44 = vld [vmem:[#allocation109_spill] sm:$0xff] }
 0x1f5   :  { %v4932_v6 = vpop.permute.xlu0 %4931  ;;  %v2660_v14 = vsel %vm2633_vm9, %v2595_v55, %v4928_v25  ;;  %v2661_v21 = vsel %vm2633_vm9, %v2596_v41, %v4929_v37  ;;  %v1561_v16 = vsel %vm812_vm2, %v1558_v29, %v1560_v45 }
 0x1f6   :  { %v4937_v30 = vpop.permute.xlu1 %4936  ;;  %v4934_v49 = vunpack.i.h.bf16 %v4932_v6  ;;  %v4933_v48 = vunpack.i.l.bf16 %v4932_v6  ;;  %v5275_v6 = vpack.i.bf16 %v1561_v16, %v1559_v3 }
 0x1f7   :  { %v4939_v5 = vunpack.i.h.bf16 %v4937_v30  ;;  %v4938_v24 = vunpack.i.l.bf16 %v4937_v30  ;;  %v10933_v30 = vld [vmem:[#allocation111_spill] sm:$0xff] }
 0x1f8   :  { %5221 = vrot.lane.b32.xlu0 %v10914_v36, %s5308_s27  ;;  %5226 = vrot.lane.b32.xlu1 %v10922_v28, %s5308_s27  ;;  %v2723_v54 = vsel %vm2698_vm10, %v2658_v51, %v4933_v48  ;;  %v2724_v26 = vsel %vm2698_vm10, %v2659_v0, %v4934_v49  ;;  %v10934_v48 = vld [vmem:[#allocation55_spill] sm:$0xff] }
 0x1f9   :  { %v4942_v10 = vpop.permute.xlu0 %4941  ;;  %v2725_v12 = vsel %vm2698_vm10, %v2660_v14, %v4938_v24  ;;  %v2726_v56 = vsel %vm2698_vm10, %v2661_v21, %v4939_v5  ;;  %v10936_v5 = vld [vmem:[#allocation58_spill] sm:$0xff] }
 0x1fa   :  { %v4944_v7 = vunpack.i.h.bf16 %v4942_v10  ;;  %v4943_v2 = vunpack.i.l.bf16 %v4942_v10  ;;  %v4947_v62 = vpop.permute.xlu1 %4946 }
 0x1fb   :  { %v4949_v61 = vunpack.i.h.bf16 %v4947_v62  ;;  %v4948_v38 = vunpack.i.l.bf16 %v4947_v62 }
 0x1fc   :  { %5231 = vrot.lane.b32.xlu0 %v10922_v28, %s5305_s19  ;;  %v2788_v43 = vsel %vm2763_vm11, %v2723_v54, %v4943_v2  ;;  %v2789_v13 = vsel %vm2763_vm11, %v2724_v26, %v4944_v7  ;;  %5236 = vrot.lane.b32.xlu1 %v10925_v50, %s5305_s19  ;;  %v10937_v28 = vld [vmem:[#allocation131_spill] sm:$0xff] }
 0x1fd   :  { %v2840_v33 = vpack.c.bf16 %v2789_v13, %v2788_v43  ;;  %v2790_v36 = vsel %vm2763_vm11, %v2725_v12, %v4948_v38  ;;  %v2791_v27 = vsel %vm2763_vm11, %v2726_v56, %v4949_v61  ;;  %v4952_v63 = vpop.permute.xlu0 %4951 }
 0x1fe   :  { %v2841_v18 = vpack.c.bf16 %v2791_v27, %v2790_v36  ;;  %v4957_v22 = vpop.permute.xlu1 %4956  ;;  %v4954_v39 = vunpack.i.h.bf16 %v4952_v63  ;;  %v4953_v32 = vunpack.i.l.bf16 %v4952_v63  ;;  %v10938_v27 = vld [vmem:[#allocation153_spill] sm:$0xff] }
 0x1ff   :  { %3983 = vmatprep.mubr.msk.bf16.mxu0 %vm2880_vm12, %v2840_v33  ;;  %v4959_v19 = vunpack.i.h.bf16 %v4957_v22  ;;  %v4958_v57 = vunpack.i.l.bf16 %v4957_v22  ;;  %v10939_v63 = vld [vmem:[#allocation185_spill] sm:$0xff] }
 0x200   :  { %5241 = vrot.lane.b32.xlu0 %v10928_v35, %s5306_s1  ;;  %5246 = vrot.lane.b32.xlu1 %v10930_v58, %s5306_s1  ;;  %v2597_v49 = vsel %vm2568_vm8, %v10933_v30, %v4953_v32  ;;  %v2598_v17 = vsel %vm2568_vm8, %v10934_v48, %v4954_v39  ;;  %v10940_v39 = vld [vmem:[#allocation59_spill] sm:$0xff] }
 0x201   :  { %3984 = vmatmul.mubr.msk.bf16.gmra.mrb[24].mxu0 %vm2880_vm12, %v2841_v18  ;;  %v2599_v24 = vsel %vm2568_vm8, %v10936_v5, %v4958_v57  ;;  %v2600_v53 = vsel %vm2568_vm8, %v10937_v28, %v4959_v19 }
 0x202   :  { %v4962_v11 = vpop.permute.xlu0 %4961  ;;  %v8341_v4 = vpop.permute.xlu1 %4966 }
 0x203   :  { %v4964_v23 = vunpack.i.h.bf16 %v4962_v11  ;;  %v4963_v1 = vunpack.i.l.bf16 %v4962_v11  ;;  %v4969_v47 = vunpack.i.h.bf16 %v8341_v4  ;;  %v4968_v20 = vunpack.i.l.bf16 %v8341_v4 }
 0x204   :  { %5251 = vrot.lane.b32.xlu0 %v10931_v52, %s5307_s26  ;;  %5256 = vrot.lane.b32.xlu1 %v10932_v15, %s5307_s26  ;;  %v10941_v15 = vld [vmem:[#allocation132_spill] sm:$0xff] }
 0x205   :  { %v2662_v55 = vsel %vm2633_vm9, %v2597_v49, %v4963_v1  ;;  %v2663_v59 = vsel %vm2633_vm9, %v2598_v17, %v4964_v23  ;;  %v2664_v51 = vsel %vm2633_vm9, %v2599_v24, %v4968_v20  ;;  %v2665_v0 = vsel %vm2633_vm9, %v2600_v53, %v4969_v47  ;;  %v10942_v1 = vld [vmem:[#allocation135_spill] sm:$0xff] }
 0x206   :  { %v4972_v8 = vpop.permute.xlu0 %4971  ;;  %v8351_v40 = vpop.permute.xlu1 %4976 }
 0x207   :  { %v4974_v37 = vunpack.i.h.bf16 %v4972_v8  ;;  %v4973_v25 = vunpack.i.l.bf16 %v4972_v8  ;;  %v4979_v9 = vunpack.i.h.bf16 %v8351_v40  ;;  %v4978_v31 = vunpack.i.l.bf16 %v8351_v40 }
 0x208   :  { %5261 = vrot.lane.b32.xlu0 %v10925_v50, %s5308_s27  ;;  %5266 = vrot.lane.b32.xlu1 %v10935_v44, %s5308_s27 }
 0x209   :  { %v2727_v7 = vsel %vm2698_vm10, %v2662_v55, %v4973_v25  ;;  %v2728_v2 = vsel %vm2698_vm10, %v2663_v59, %v4974_v37  ;;  %v2729_v26 = vsel %vm2698_vm10, %v2664_v51, %v4978_v31  ;;  %v2730_v61 = vsel %vm2698_vm10, %v2665_v0, %v4979_v9 }
 0x20a   :  { %v4982_v41 = vpop.permute.xlu0 %4981  ;;  %v8375_v21 = vpop.permute.xlu1 %4986 }
 0x20b   :  { %v4984_v10 = vunpack.i.h.bf16 %v4982_v41  ;;  %v4983_v14 = vunpack.i.l.bf16 %v4982_v41  ;;  %v4989_v62 = vunpack.i.h.bf16 %v8375_v21  ;;  %v4988_v54 = vunpack.i.l.bf16 %v8375_v21 }
 0x20c   :  { %5271 = vrot.lane.b32.xlu0 %v10935_v44, %s5305_s19  ;;  %5276 = vrot.lane.b32.xlu1 %v5275_v6, %s5305_s19 }
 0x20d   :  { %v2792_v38 = vsel %vm2763_vm11, %v2727_v7, %v4983_v14  ;;  %v2793_v12 = vsel %vm2763_vm11, %v2728_v2, %v4984_v10  ;;  %v2794_v43 = vsel %vm2763_vm11, %v2729_v26, %v4988_v54  ;;  %v2795_v13 = vsel %vm2763_vm11, %v2730_v61, %v4989_v62 }
 0x20e   :  { %v2842_v56 = vpack.c.bf16 %v2793_v12, %v2792_v38  ;;  %v4992_v50 = vpop.permute.xlu0 %4991  ;;  %v2843_v33 = vpack.c.bf16 %v2795_v13, %v2794_v43  ;;  %v4997_v36 = vpop.permute.xlu1 %4996 }
 0x20f   :  { %v4994_v34 = vunpack.i.h.bf16 %v4992_v50  ;;  %v4993_v46 = vunpack.i.l.bf16 %v4992_v50  ;;  %v4999_v60 = vunpack.i.h.bf16 %v4997_v36  ;;  %v4998_v29 = vunpack.i.l.bf16 %v4997_v36 }
 0x210   :  { %5281 = vrot.lane.b32.xlu0 %v10938_v27, %s5306_s1  ;;  %3987 = vmatprep.mubr.msk.bf16.mxu0 %vm2880_vm12, %v2842_v56 }
 0x211   :  { %5286 = vrot.lane.b32.xlu1 %v10939_v63, %s5307_s26  ;;  %3988 = vmatmul.mubr.msk.bf16.gmra.mrb[28].mxu0 %vm2880_vm12, %v2843_v33  ;;  %v2601_v32 = vsel %vm2568_vm8, %v10940_v39, %v4993_v46  ;;  %v2602_v19 = vsel %vm2568_vm8, %v10941_v15, %v4994_v34  ;;  %v2603_v8 = vsel %vm2568_vm8, %v10942_v1, %v4998_v29  ;;  %v10944_v29 = vld [vmem:[#allocation112_spill] sm:$0xff] }
 0x212   :  { %v5002_v18 = vpop.permute.xlu0 %5001  ;;  %v5007_v22 = vpop.permute.xlu1 %5006 }
 0x213   :  { %v5004_v35 = vunpack.i.h.bf16 %v5002_v18  ;;  %v5003_v42 = vunpack.i.l.bf16 %v5002_v18  ;;  %v5009_v58 = vunpack.i.h.bf16 %v5007_v22  ;;  %v5008_v11 = vunpack.i.l.bf16 %v5007_v22 }
 0x214   :  { %5291 = vrot.lane.b32.xlu0 %v5275_v6, %s5308_s27  ;;  %v10943_v6 = vld [vmem:[#allocation138_spill] sm:$0xff] }
 0x215   :  { %v2604_v37 = vsel %vm2568_vm8, %v10943_v6, %v4999_v60  ;;  %v2666_v25 = vsel %vm2633_vm9, %v2601_v32, %v5003_v42  ;;  %v2667_v30 = vsel %vm2633_vm9, %v2602_v19, %v5004_v35  ;;  %v2668_v48 = vsel %vm2633_vm9, %v2603_v8, %v5008_v11  ;;  %v10945_v42 = vld [vmem:[#allocation139_spill] sm:$0xff] }
 0x216   :  { %v5012_v45 = vpop.permute.xlu0 %5011  ;;  %v5017_v52 = vpop.permute.xlu1 %5016  ;;  %v2669_v17 = vsel %vm2633_vm9, %v2604_v37, %v5009_v58 }
 0x217   :  { %v5014_v3 = vunpack.i.h.bf16 %v5012_v45  ;;  %v5013_v16 = vunpack.i.l.bf16 %v5012_v45  ;;  %v5019_v57 = vunpack.i.h.bf16 %v5017_v52  ;;  %v5018_v23 = vunpack.i.l.bf16 %v5017_v52  ;;  %v10946_v52 = vld [vmem:[#allocation142_spill] sm:$0xff] }
 0x219   :  { %v2731_v55 = vsel %vm2698_vm10, %v2666_v25, %v5013_v16  ;;  %v2732_v59 = vsel %vm2698_vm10, %v2667_v30, %v5014_v3  ;;  %v2733_v41 = vsel %vm2698_vm10, %v2668_v48, %v5018_v23  ;;  %v2734_v51 = vsel %vm2698_vm10, %v2669_v17, %v5019_v57  ;;  %v10947_v16 = vld [vmem:[#allocation9_spill] sm:$0xff] }
 0x21a   :  { %v5022_v49 = vpop.permute.xlu0 %5021  ;;  %v5027_v24 = vpop.permute.xlu1 %5026 }
 0x21b   :  { %v5024_v44 = vunpack.i.h.bf16 %v5022_v49  ;;  %v5023_v5 = vunpack.i.l.bf16 %v5022_v49  ;;  %v5029_v28 = vunpack.i.h.bf16 %v5027_v24  ;;  %v5028_v53 = vunpack.i.l.bf16 %v5027_v24 }
 0x21d   :  { %v2796_v0 = vsel %vm2763_vm11, %v2731_v55, %v5023_v5  ;;  %v2797_v10 = vsel %vm2763_vm11, %v2732_v59, %v5024_v44  ;;  %v2798_v14 = vsel %vm2763_vm11, %v2733_v41, %v5028_v53  ;;  %v2799_v7 = vsel %vm2763_vm11, %v2734_v51, %v5029_v28 }
 0x21e   :  { %v5032_v2 = vpop.permute.xlu0 %5031  ;;  %v2844_v26 = vpack.c.bf16 %v2797_v10, %v2796_v0  ;;  %v2845_v61 = vpack.c.bf16 %v2799_v7, %v2798_v14  ;;  %v5037_v38 = vpop.permute.xlu1 %5036 }
 0x21f   :  { %v5034_v43 = vunpack.i.h.bf16 %v5032_v2  ;;  %v5033_v13 = vunpack.i.l.bf16 %v5032_v2  ;;  %v5039_v50 = vunpack.i.h.bf16 %v5037_v38  ;;  %v5038_v33 = vunpack.i.l.bf16 %v5037_v38 }
 0x220   :  { %3991 = vmatprep.mubr.msk.bf16.mxu1 %vm2880_vm12, %v2844_v26 }
 0x221   :  { %3992 = vmatmul.mubr.msk.bf16.vlgmr.msra.gmra.mrb[0].mxu1 %vm2880_vm12, %v2845_v61  ;;  %v2605_v35 = vsel %vm2568_vm8, %v10944_v29, %v5033_v13  ;;  %v2606_v45 = vsel %vm2568_vm8, %v10945_v42, %v5034_v43  ;;  %v2607_v3 = vsel %vm2568_vm8, %v10946_v52, %v5038_v33  ;;  %v2608_v39 = vsel %vm2568_vm8, %v10947_v16, %v5039_v50  ;;  %v10948_v33 = vld [vmem:[#allocation62_spill] sm:$0xff] }
 0x222   :  { %v5042_v12 = vpop.permute.xlu0 %5041  ;;  %v5047_v56 = vpop.permute.xlu1 %5046 }
 0x223   :  { %v5044_v36 = vunpack.i.h.bf16 %v5042_v12  ;;  %v5043_v27 = vunpack.i.l.bf16 %v5042_v12  ;;  %v5049_v18 = vunpack.i.h.bf16 %v5047_v56  ;;  %v5048_v22 = vunpack.i.l.bf16 %v5047_v56 }
 0x225   :  { %v2670_v32 = vsel %vm2633_vm9, %v2605_v35, %v5043_v27  ;;  %v2671_v15 = vsel %vm2633_vm9, %v2606_v45, %v5044_v36  ;;  %v2672_v57 = vsel %vm2633_vm9, %v2607_v3, %v5048_v22  ;;  %v2673_v23 = vsel %vm2633_vm9, %v2608_v39, %v5049_v18  ;;  %v10949_v27 = vld [vmem:[#allocation63_spill] sm:$0xff] }
 0x226   :  { %v5052_v63 = vpop.permute.xlu0 %5051  ;;  %v5057_v34 = vpop.permute.xlu1 %5056 }
 0x227   :  { %v5054_v46 = vunpack.i.h.bf16 %v5052_v63  ;;  %v5053_v60 = vunpack.i.l.bf16 %v5052_v63  ;;  %v5059_v58 = vunpack.i.h.bf16 %v5057_v34  ;;  %v5058_v11 = vunpack.i.l.bf16 %v5057_v34  ;;  %v10950_v34 = vld [vmem:[#allocation145_spill] sm:$0xff] }
 0x229   :  { %v2735_v37 = vsel %vm2698_vm10, %v2670_v32, %v5053_v60  ;;  %v2736_v25 = vsel %vm2698_vm10, %v2671_v15, %v5054_v46  ;;  %v2737_v48 = vsel %vm2698_vm10, %v2672_v57, %v5058_v11  ;;  %v2738_v17 = vsel %vm2698_vm10, %v2673_v23, %v5059_v58  ;;  %v10951_v60 = vld [vmem:[#allocation65_spill] sm:$0xff] }
 0x22a   :  { %v5062_v19 = vpop.permute.xlu0 %5061  ;;  %v5067_v6 = vpop.permute.xlu1 %5066 }
 0x22b   :  { %v5064_v1 = vunpack.i.h.bf16 %v5062_v19  ;;  %v5063_v8 = vunpack.i.l.bf16 %v5062_v19  ;;  %v5069_v30 = vunpack.i.h.bf16 %v5067_v6  ;;  %v5068_v49 = vunpack.i.l.bf16 %v5067_v6 }
 0x22d   :  { %v2800_v44 = vsel %vm2763_vm11, %v2735_v37, %v5063_v8  ;;  %v2801_v5 = vsel %vm2763_vm11, %v2736_v25, %v5064_v1  ;;  %v2802_v28 = vsel %vm2763_vm11, %v2737_v48, %v5068_v49  ;;  %v2803_v53 = vsel %vm2763_vm11, %v2738_v17, %v5069_v30 }
 0x22e   :  { %v2846_v24 = vpack.c.bf16 %v2801_v5, %v2800_v44  ;;  %v5072_v55 = vpop.permute.xlu0 %5071  ;;  %v2847_v59 = vpack.c.bf16 %v2803_v53, %v2802_v28  ;;  %v5077_v41 = vpop.permute.xlu1 %5076 }
 0x22f   :  { %v5074_v10 = vunpack.i.h.bf16 %v5072_v55  ;;  %v5073_v14 = vunpack.i.l.bf16 %v5072_v55  ;;  %v5079_v7 = vunpack.i.h.bf16 %v5077_v41  ;;  %v5078_v2 = vunpack.i.l.bf16 %v5077_v41 }
 0x230   :  { %3995 = vmatprep.mubr.msk.bf16.mxu1 %vm2880_vm12, %v2846_v24 }
 0x231   :  { %3996 = vmatmul.mubr.msk.bf16.gmra.mrb[4].mxu1 %vm2880_vm12, %v2847_v59  ;;  %v2609_v36 = vsel %vm2568_vm8, %v10948_v33, %v5073_v14  ;;  %v2610_v63 = vsel %vm2568_vm8, %v10949_v27, %v5074_v10  ;;  %v2611_v46 = vsel %vm2568_vm8, %v10950_v34, %v5078_v2  ;;  %v2612_v29 = vsel %vm2568_vm8, %v10951_v60, %v5079_v7  ;;  %v10952_v2 = vld [vmem:[#allocation66_spill] sm:$0xff] }
 0x232   :  { %v5082_v51 = vpop.permute.xlu0 %5081  ;;  %v5087_v0 = vpop.permute.xlu1 %5086 }
 0x233   :  { %v5084_v26 = vunpack.i.h.bf16 %v5082_v51  ;;  %v5083_v61 = vunpack.i.l.bf16 %v5082_v51  ;;  %v5089_v12 = vunpack.i.h.bf16 %v5087_v0  ;;  %v5088_v56 = vunpack.i.l.bf16 %v5087_v0 }
 0x235   :  { %v2674_v35 = vsel %vm2633_vm9, %v2609_v36, %v5083_v61  ;;  %v2675_v42 = vsel %vm2633_vm9, %v2610_v63, %v5084_v26  ;;  %v2676_v58 = vsel %vm2633_vm9, %v2611_v46, %v5088_v56  ;;  %v2677_v11 = vsel %vm2633_vm9, %v2612_v29, %v5089_v12  ;;  %v10953_v61 = vld [vmem:[#allocation69_spill] sm:$0xff] }
 0x236   :  { %v5092_v38 = vpop.permute.xlu0 %5091  ;;  %v5097_v43 = vpop.permute.xlu1 %5096 }
 0x237   :  { %v5094_v13 = vunpack.i.h.bf16 %v5092_v38  ;;  %v5093_v50 = vunpack.i.l.bf16 %v5092_v38  ;;  %v5099_v18 = vunpack.i.h.bf16 %v5097_v43  ;;  %v5098_v22 = vunpack.i.l.bf16 %v5097_v43  ;;  %v10954_v43 = vld [vmem:[#allocation70_spill] sm:$0xff] }
 0x239   :  { %v2739_v39 = vsel %vm2698_vm10, %v2674_v35, %v5093_v50  ;;  %v2740_v32 = vsel %vm2698_vm10, %v2675_v42, %v5094_v13  ;;  %v2741_v57 = vsel %vm2698_vm10, %v2676_v58, %v5098_v22  ;;  %v2742_v23 = vsel %vm2698_vm10, %v2677_v11, %v5099_v18  ;;  %v10955_v50 = vld [vmem:[#allocation74_spill] sm:$0xff] }
 0x23a   :  { %v5102_v45 = vpop.permute.xlu0 %5101  ;;  %v5107_v16 = vpop.permute.xlu1 %5106 }
 0x23b   :  { %v5104_v52 = vunpack.i.h.bf16 %v5102_v45  ;;  %v5103_v3 = vunpack.i.l.bf16 %v5102_v45  ;;  %v5109_v15 = vunpack.i.h.bf16 %v5107_v16  ;;  %v5108_v19 = vunpack.i.l.bf16 %v5107_v16 }
 0x23d   :  { %v2804_v1 = vsel %vm2763_vm11, %v2739_v39, %v5103_v3  ;;  %v2805_v8 = vsel %vm2763_vm11, %v2740_v32, %v5104_v52  ;;  %v2806_v37 = vsel %vm2763_vm11, %v2741_v57, %v5108_v19  ;;  %v2807_v25 = vsel %vm2763_vm11, %v2742_v23, %v5109_v15 }
 0x23e   :  { %v2848_v6 = vpack.c.bf16 %v2805_v8, %v2804_v1  ;;  %v5112_v30 = vpop.permute.xlu0 %5111  ;;  %v2849_v49 = vpack.c.bf16 %v2807_v25, %v2806_v37  ;;  %v5117_v48 = vpop.permute.xlu1 %5116 }
 0x23f   :  { %v5114_v5 = vunpack.i.h.bf16 %v5112_v30  ;;  %v5113_v24 = vunpack.i.l.bf16 %v5112_v30  ;;  %v5119_v28 = vunpack.i.h.bf16 %v5117_v48  ;;  %v5118_v53 = vunpack.i.l.bf16 %v5117_v48 }
 0x240   :  { %3999 = vmatprep.mubr.msk.bf16.mxu1 %vm2880_vm12, %v2848_v6 }
 0x241   :  { %4000 = vmatmul.mubr.msk.bf16.gmra.mrb[8].mxu1 %vm2880_vm12, %v2849_v49  ;;  %v2613_v26 = vsel %vm2568_vm8, %v10952_v2, %v5113_v24  ;;  %v2614_v38 = vsel %vm2568_vm8, %v10953_v61, %v5114_v5  ;;  %v2615_v13 = vsel %vm2568_vm8, %v10954_v43, %v5118_v53  ;;  %v2616_v33 = vsel %vm2568_vm8, %v10955_v50, %v5119_v28  ;;  %v10956_v53 = vld [vmem:[#allocation73_spill] sm:$0xff] }
 0x242   :  { %v5122_v17 = vpop.permute.xlu0 %5121  ;;  %v5127_v44 = vpop.permute.xlu1 %5126 }
 0x243   :  { %v5124_v55 = vunpack.i.h.bf16 %v5122_v17  ;;  %v5123_v59 = vunpack.i.l.bf16 %v5122_v17  ;;  %v5129_v51 = vunpack.i.h.bf16 %v5127_v44  ;;  %v5128_v0 = vunpack.i.l.bf16 %v5127_v44 }
 0x245   :  { %v2678_v36 = vsel %vm2633_vm9, %v2613_v26, %v5123_v59  ;;  %v2679_v27 = vsel %vm2633_vm9, %v2614_v38, %v5124_v55  ;;  %v2680_v18 = vsel %vm2633_vm9, %v2615_v13, %v5128_v0  ;;  %v2681_v22 = vsel %vm2633_vm9, %v2616_v33, %v5129_v51  ;;  %v10957_v59 = vld [vmem:[#allocation10_spill] sm:$0xff] }
 0x246   :  { %v5132_v41 = vpop.permute.xlu0 %5131  ;;  %v5137_v10 = vpop.permute.xlu1 %5136 }
 0x247   :  { %v5134_v14 = vunpack.i.h.bf16 %v5132_v41  ;;  %v5133_v7 = vunpack.i.l.bf16 %v5132_v41  ;;  %v5139_v12 = vunpack.i.h.bf16 %v5137_v10  ;;  %v5138_v56 = vunpack.i.l.bf16 %v5137_v10  ;;  %v10958_v10 = vld [vmem:[#allocation77_spill] sm:$0xff] }
 0x249   :  { %v2743_v29 = vsel %vm2698_vm10, %v2678_v36, %v5133_v7  ;;  %v2744_v35 = vsel %vm2698_vm10, %v2679_v27, %v5134_v14  ;;  %v2745_v58 = vsel %vm2698_vm10, %v2680_v18, %v5138_v56  ;;  %v2746_v11 = vsel %vm2698_vm10, %v2681_v22, %v5139_v12  ;;  %v10959_v7 = vld [vmem:[#allocation78_spill] sm:$0xff] }
 0x24a   :  { %v5142_v63 = vpop.permute.xlu0 %5141  ;;  %v5147_v60 = vpop.permute.xlu1 %5146 }
 0x24b   :  { %v5144_v34 = vunpack.i.h.bf16 %v5142_v63  ;;  %v5143_v46 = vunpack.i.l.bf16 %v5142_v63  ;;  %v5149_v42 = vunpack.i.h.bf16 %v5147_v60  ;;  %v5148_v45 = vunpack.i.l.bf16 %v5147_v60 }
 0x24d   :  { %v2808_v52 = vsel %vm2763_vm11, %v2743_v29, %v5143_v46  ;;  %v2809_v3 = vsel %vm2763_vm11, %v2744_v35, %v5144_v34  ;;  %v2810_v39 = vsel %vm2763_vm11, %v2745_v58, %v5148_v45  ;;  %v2811_v32 = vsel %vm2763_vm11, %v2746_v11, %v5149_v42 }
 0x24e   :  { %v2850_v16 = vpack.c.bf16 %v2809_v3, %v2808_v52  ;;  %v5152_v15 = vpop.permute.xlu0 %5151  ;;  %v2851_v19 = vpack.c.bf16 %v2811_v32, %v2810_v39  ;;  %v5157_v57 = vpop.permute.xlu1 %5156 }
 0x24f   :  { %v5154_v8 = vunpack.i.h.bf16 %v5152_v15  ;;  %v5153_v6 = vunpack.i.l.bf16 %v5152_v15  ;;  %v5159_v37 = vunpack.i.h.bf16 %v5157_v57  ;;  %v5158_v25 = vunpack.i.l.bf16 %v5157_v57 }
 0x250   :  { %4003 = vmatprep.mubr.msk.bf16.mxu1 %vm2880_vm12, %v2850_v16 }
 0x251   :  { %4004 = vmatmul.mubr.msk.bf16.gmra.mrb[12].mxu1 %vm2880_vm12, %v2851_v19  ;;  %v2617_v55 = vsel %vm2568_vm8, %v10956_v53, %v5153_v6  ;;  %v2618_v41 = vsel %vm2568_vm8, %v10957_v59, %v5154_v8  ;;  %v2619_v14 = vsel %vm2568_vm8, %v10958_v10, %v5158_v25  ;;  %v2620_v2 = vsel %vm2568_vm8, %v10959_v7, %v5159_v37  ;;  %v10960_v25 = vld [vmem:[#allocation81_spill] sm:$0xff] }
 0x252   :  { %v5162_v23 = vpop.permute.xlu0 %5161  ;;  %v5167_v1 = vpop.permute.xlu1 %5166 }
 0x253   :  { %v5164_v30 = vunpack.i.h.bf16 %v5162_v23  ;;  %v5163_v49 = vunpack.i.l.bf16 %v5162_v23  ;;  %v5169_v17 = vunpack.i.h.bf16 %v5167_v1  ;;  %v5168_v44 = vunpack.i.l.bf16 %v5167_v1 }
 0x255   :  { %v2682_v26 = vsel %vm2633_vm9, %v2617_v55, %v5163_v49  ;;  %v2683_v61 = vsel %vm2633_vm9, %v2618_v41, %v5164_v30  ;;  %v2684_v12 = vsel %vm2633_vm9, %v2619_v14, %v5168_v44  ;;  %v2685_v56 = vsel %vm2633_vm9, %v2620_v2, %v5169_v17  ;;  %v10961_v49 = vld [vmem:[#allocation92_spill] sm:$0xff] }
 0x256   :  { %v5172_v48 = vpop.permute.xlu0 %5171  ;;  %v5177_v5 = vpop.permute.xlu1 %5176 }
 0x257   :  { %v5174_v24 = vunpack.i.h.bf16 %v5172_v48  ;;  %v5173_v28 = vunpack.i.l.bf16 %v5172_v48  ;;  %v5179_v51 = vunpack.i.h.bf16 %v5177_v5  ;;  %v5178_v0 = vunpack.i.l.bf16 %v5177_v5  ;;  %v10962_v5 = vld [vmem:[#allocation82_spill] sm:$0xff] }
 0x259   :  { %v2747_v33 = vsel %vm2698_vm10, %v2682_v26, %v5173_v28  ;;  %v2748_v36 = vsel %vm2698_vm10, %v2683_v61, %v5174_v24  ;;  %v2749_v18 = vsel %vm2698_vm10, %v2684_v12, %v5178_v0  ;;  %v2750_v22 = vsel %vm2698_vm10, %v2685_v56, %v5179_v51  ;;  %v10963_v28 = vld [vmem:[#allocation84_spill] sm:$0xff] }
 0x25a   :  { %v5182_v38 = vpop.permute.xlu0 %5181  ;;  %v5187_v50 = vpop.permute.xlu1 %5186 }
 0x25b   :  { %v5184_v43 = vunpack.i.h.bf16 %v5182_v38  ;;  %v5183_v13 = vunpack.i.l.bf16 %v5182_v38  ;;  %v5189_v27 = vunpack.i.h.bf16 %v5187_v50  ;;  %v5188_v63 = vunpack.i.l.bf16 %v5187_v50 }
 0x25d   :  { %v2812_v34 = vsel %vm2763_vm11, %v2747_v33, %v5183_v13  ;;  %v2813_v46 = vsel %vm2763_vm11, %v2748_v36, %v5184_v43  ;;  %v2814_v29 = vsel %vm2763_vm11, %v2749_v18, %v5188_v63  ;;  %v2815_v35 = vsel %vm2763_vm11, %v2750_v22, %v5189_v27 }
 0x25e   :  { %v2852_v60 = vpack.c.bf16 %v2813_v46, %v2812_v34  ;;  %v5192_v42 = vpop.permute.xlu0 %5191  ;;  %v2853_v45 = vpack.c.bf16 %v2815_v35, %v2814_v29  ;;  %v5197_v58 = vpop.permute.xlu1 %5196 }
 0x25f   :  { %v5194_v3 = vunpack.i.h.bf16 %v5192_v42  ;;  %v5193_v16 = vunpack.i.l.bf16 %v5192_v42  ;;  %v5199_v39 = vunpack.i.h.bf16 %v5197_v58  ;;  %v5198_v32 = vunpack.i.l.bf16 %v5197_v58 }
 0x260   :  { %4007 = vmatprep.mubr.msk.bf16.mxu1 %vm2880_vm12, %v2852_v60 }
 0x261   :  { %4008 = vmatmul.mubr.msk.bf16.gmra.mrb[16].mxu1 %vm2880_vm12, %v2853_v45  ;;  %v2621_v30 = vsel %vm2568_vm8, %v10960_v25, %v5193_v16  ;;  %v2622_v48 = vsel %vm2568_vm8, %v10961_v49, %v5194_v3  ;;  %v2623_v24 = vsel %vm2568_vm8, %v10962_v5, %v5198_v32  ;;  %v2624_v53 = vsel %vm2568_vm8, %v10963_v28, %v5199_v39  ;;  %v10964_v32 = vld [vmem:[#allocation85_spill] sm:$0xff] }
 0x262   :  { %v5202_v11 = vpop.permute.xlu0 %5201  ;;  %v5207_v52 = vpop.permute.xlu1 %5206 }
 0x263   :  { %v5204_v15 = vunpack.i.h.bf16 %v5202_v11  ;;  %v5203_v19 = vunpack.i.l.bf16 %v5202_v11  ;;  %v5209_v23 = vunpack.i.h.bf16 %v5207_v52  ;;  %v5208_v1 = vunpack.i.l.bf16 %v5207_v52 }
 0x265   :  { %v2686_v55 = vsel %vm2633_vm9, %v2621_v30, %v5203_v19  ;;  %v2687_v59 = vsel %vm2633_vm9, %v2622_v48, %v5204_v15  ;;  %v2688_v51 = vsel %vm2633_vm9, %v2623_v24, %v5208_v1  ;;  %v2689_v0 = vsel %vm2633_vm9, %v2624_v53, %v5209_v23  ;;  %v10965_v19 = vld [vmem:[#allocation160_spill] sm:$0xff] }
 0x266   :  { %v5212_v57 = vpop.permute.xlu0 %5211  ;;  %v5217_v8 = vpop.permute.xlu1 %5216 }
 0x267   :  { %v5214_v6 = vunpack.i.h.bf16 %v5212_v57  ;;  %v5213_v37 = vunpack.i.l.bf16 %v5212_v57  ;;  %v5219_v17 = vunpack.i.h.bf16 %v5217_v8  ;;  %v5218_v44 = vunpack.i.l.bf16 %v5217_v8  ;;  %v10966_v8 = vld [vmem:[#allocation93_spill] sm:$0xff] }
 0x269   :  { %v2751_v2 = vsel %vm2698_vm10, %v2686_v55, %v5213_v37  ;;  %v2752_v26 = vsel %vm2698_vm10, %v2687_v59, %v5214_v6  ;;  %v2753_v12 = vsel %vm2698_vm10, %v2688_v51, %v5218_v44  ;;  %v2754_v56 = vsel %vm2698_vm10, %v2689_v0, %v5219_v17  ;;  %v10967_v37 = vld [vmem:[#allocation113_spill] sm:$0xff] }
 0x26a   :  { %v5222_v41 = vpop.permute.xlu0 %5221  ;;  %v5227_v7 = vpop.permute.xlu1 %5226 }
 0x26b   :  { %v5224_v10 = vunpack.i.h.bf16 %v5222_v41  ;;  %v5223_v14 = vunpack.i.l.bf16 %v5222_v41  ;;  %v5229_v61 = vunpack.i.h.bf16 %v5227_v7  ;;  %v5228_v38 = vunpack.i.l.bf16 %v5227_v7 }
 0x26d   :  { %v2816_v43 = vsel %vm2763_vm11, %v2751_v2, %v5223_v14  ;;  %v2817_v13 = vsel %vm2763_vm11, %v2752_v26, %v5224_v10  ;;  %v2818_v33 = vsel %vm2763_vm11, %v2753_v12, %v5228_v38  ;;  %v2819_v36 = vsel %vm2763_vm11, %v2754_v56, %v5229_v61 }
 0x26e   :  { %v2854_v50 = vpack.c.bf16 %v2817_v13, %v2816_v43  ;;  %v5232_v27 = vpop.permute.xlu0 %5231  ;;  %v2855_v63 = vpack.c.bf16 %v2819_v36, %v2818_v33  ;;  %v5237_v18 = vpop.permute.xlu1 %5236  ;;  %v10968_v33 = vld [vmem:[#allocation161_spill] sm:$0xff] }
 0x26f   :  { %v5234_v46 = vunpack.i.h.bf16 %v5232_v27  ;;  %v5233_v60 = vunpack.i.l.bf16 %v5232_v27  ;;  %v5239_v29 = vunpack.i.h.bf16 %v5237_v18  ;;  %v5238_v35 = vunpack.i.l.bf16 %v5237_v18  ;;  %v10969_v27 = vld [vmem:[#allocation162_spill] sm:$0xff]  ;;  %v10970_v18 = vld [vmem:[#allocation164_spill] sm:$0xff] }
 0x270   :  { %4011 = vmatprep.mubr.msk.bf16.mxu1 %vm2880_vm12, %v2854_v50 }
 0x271   :  { %4012 = vmatmul.mubr.msk.bf16.gmra.mrb[20].mxu1 %vm2880_vm12, %v2855_v63  ;;  %v2625_v15 = vsel %vm2568_vm8, %v10964_v32, %v5233_v60  ;;  %v2626_v57 = vsel %vm2568_vm8, %v10965_v19, %v5234_v46  ;;  %v2627_v6 = vsel %vm2568_vm8, %v10966_v8, %v5238_v35  ;;  %v2628_v25 = vsel %vm2568_vm8, %v10967_v37, %v5239_v29 }
 0x272   :  { %v5242_v22 = vpop.permute.xlu0 %5241  ;;  %v5247_v34 = vpop.permute.xlu1 %5246 }
 0x273   :  { %v5244_v42 = vunpack.i.h.bf16 %v5242_v22  ;;  %v5243_v45 = vunpack.i.l.bf16 %v5242_v22  ;;  %v5249_v11 = vunpack.i.h.bf16 %v5247_v34  ;;  %v5248_v52 = vunpack.i.l.bf16 %v5247_v34  ;;  %v10971_v34 = vld [vmem:[#allocation114_spill] sm:$0xff] }
 0x275   :  { %v2690_v30 = vsel %vm2633_vm9, %v2625_v15, %v5243_v45  ;;  %v2691_v49 = vsel %vm2633_vm9, %v2626_v57, %v5244_v42  ;;  %v2692_v17 = vsel %vm2633_vm9, %v2627_v6, %v5248_v52  ;;  %v2693_v44 = vsel %vm2633_vm9, %v2628_v25, %v5249_v11 }
 0x276   :  { %v5252_v58 = vpop.permute.xlu0 %5251  ;;  %v5257_v3 = vpop.permute.xlu1 %5256 }
 0x277   :  { %v5254_v16 = vunpack.i.h.bf16 %v5252_v58  ;;  %v5253_v39 = vunpack.i.l.bf16 %v5252_v58  ;;  %v5259_v23 = vunpack.i.h.bf16 %v5257_v3  ;;  %v5258_v1 = vunpack.i.l.bf16 %v5257_v3 }
 0x279   :  { %v2755_v53 = vsel %vm2698_vm10, %v2690_v30, %v5253_v39  ;;  %v2756_v55 = vsel %vm2698_vm10, %v2691_v49, %v5254_v16  ;;  %v2757_v51 = vsel %vm2698_vm10, %v2692_v17, %v5258_v1  ;;  %v2758_v0 = vsel %vm2698_vm10, %v2693_v44, %v5259_v23 }
 0x27a   :  { %v5262_v48 = vpop.permute.xlu0 %5261  ;;  %v5267_v28 = vpop.permute.xlu1 %5266 }
 0x27b   :  { %v5264_v5 = vunpack.i.h.bf16 %v5262_v48  ;;  %v5263_v24 = vunpack.i.l.bf16 %v5262_v48  ;;  %v5269_v59 = vunpack.i.h.bf16 %v5267_v28  ;;  %v5268_v41 = vunpack.i.l.bf16 %v5267_v28 }
 0x27d   :  { %v2820_v10 = vsel %vm2763_vm11, %v2755_v53, %v5263_v24  ;;  %v2821_v14 = vsel %vm2763_vm11, %v2756_v55, %v5264_v5  ;;  %v2822_v2 = vsel %vm2763_vm11, %v2757_v51, %v5268_v41  ;;  %v2823_v26 = vsel %vm2763_vm11, %v2758_v0, %v5269_v59 }
 0x27e   :  { %v2856_v7 = vpack.c.bf16 %v2821_v14, %v2820_v10  ;;  %v5272_v61 = vpop.permute.xlu0 %5271  ;;  %v2857_v38 = vpack.c.bf16 %v2823_v26, %v2822_v2  ;;  %v5277_v43 = vpop.permute.xlu1 %5276 }
 0x27f   :  { %v5274_v12 = vunpack.i.h.bf16 %v5272_v61  ;;  %v5273_v56 = vunpack.i.l.bf16 %v5272_v61  ;;  %v5279_v13 = vunpack.i.h.bf16 %v5277_v43  ;;  %v5278_v50 = vunpack.i.l.bf16 %v5277_v43 }
 0x280   :  { %4015 = vmatprep.mubr.msk.bf16.mxu1 %vm2880_vm12, %v2856_v7 }
 0x281   :  { %4016 = vmatmul.mubr.msk.bf16.gmra.mrb[24].mxu1 %vm2880_vm12, %v2857_v38  ;;  %v2629_v36 = vsel %vm2568_vm8, %v10968_v33, %v5273_v56  ;;  %v2630_v63 = vsel %vm2568_vm8, %v10969_v27, %v5274_v12  ;;  %v2631_v22 = vsel %vm2568_vm8, %v10970_v18, %v5278_v50  ;;  %v2632_v46 = vsel %vm2568_vm8, %v10971_v34, %v5279_v13 }
 0x282   :  { %v5282_v60 = vpop.permute.xlu0 %5281  ;;  %v2696_v29 = vsel %vm2633_vm9, %v2631_v22, %v4968_v20  ;;  %v2697_v35 = vsel %vm2633_vm9, %v2632_v46, %v4969_v47 }
 0x283   :  { %v5284_v42 = vunpack.i.h.bf16 %v5282_v60  ;;  %v5283_v45 = vunpack.i.l.bf16 %v5282_v60  ;;  %v5287_v58 = vpop.permute.xlu1 %5286  ;;  %v2761_v3 = vsel %vm2698_vm10, %v2696_v29, %v4978_v31  ;;  %v2762_v16 = vsel %vm2698_vm10, %v2697_v35, %v4979_v9 }
 0x284   :  { %v5289_v11 = vunpack.i.h.bf16 %v5287_v58  ;;  %v5288_v52 = vunpack.i.l.bf16 %v5287_v58  ;;  %v2826_v4 = vsel %vm2763_vm11, %v2761_v3, %v4988_v54  ;;  %v2827_v47 = vsel %vm2763_vm11, %v2762_v16, %v4989_v62 }
 0x285   :  { %v2694_v39 = vsel %vm2633_vm9, %v2629_v36, %v5283_v45  ;;  %v2695_v20 = vsel %vm2633_vm9, %v2630_v63, %v5284_v42  ;;  %v2859_v15 = vpack.c.bf16 %v2827_v47, %v2826_v4 }
 0x286   :  { %v5292_v32 = vpop.permute.xlu0 %5291  ;;  %v2759_v40 = vsel %vm2698_vm10, %v2694_v39, %v5288_v52  ;;  %v2760_v9 = vsel %vm2698_vm10, %v2695_v20, %v5289_v11 }
 0x287   :  { %v5294_v19 = vunpack.i.h.bf16 %v5292_v32  ;;  %v5293_v31 = vunpack.i.l.bf16 %v5292_v32 }
 0x289   :  { %v2824_v57 = vsel %vm2763_vm11, %v2759_v40, %v5293_v31  ;;  %v2825_v23 = vsel %vm2763_vm11, %v2760_v9, %v5294_v19 }
 0x28a   :  { %v2858_v1 = vpack.c.bf16 %v2825_v23, %v2824_v57  ;;  %v8591_v8 = vpop.f32.mrb[0].mxu0 }
 0x28b   :  { %v8593_v54 = vpop.f32.mrb[1].mxu0  ;;  %v3406_v37 = vmul.f32 %v8591_v8, %v8591_v8  ;;  %v3273_v17 = vsel %vm2375_vm4, %v8591_v8, 0.0 }
 0x28c   :  { %4019 = vmatprep.mubr.msk.bf16.mxu1 %vm2880_vm12, %v2858_v1  ;;  %v3404_v21 = vmul.f32 %v8593_v54, %v8593_v54  ;;  %v8598_v62 = vpop.f32.mrb[2].mxu0  ;;  %v3270_v25 = vsel %vm2375_vm4, %v8593_v54, 0.0 }
 0x28d   :  { %4020 = vmatmul.mubr.msk.bf16.gmra.mrb[28].mxu1 %vm2880_vm12, %v2859_v15  ;;  %v8601_v6 = vpop.f32.mrb[3].mxu0  ;;  %v3407_v5 = vmul.f32 %v8598_v62, %v8598_v62  ;;  %v3471_v55 = vsel %vm2375_vm4, %v3406_v37, 0.0  ;;  %v3275_v59 = vsel %vm2375_vm4, %v8598_v62, 0.0 }
 0x28e   :  { %v3271_v30 = vsel %vm2375_vm4, %v8601_v6, 0.0  ;;  %v3405_v49 = vmul.f32 %v8601_v6, %v8601_v6  ;;  %v3468_v44 = vsel %vm2375_vm4, %v3404_v21, 0.0 }
 0x28f   :  { %v3272_v48 = vadd.f32 %v3271_v30, %v3270_v25  ;;  %v3473_v0 = vsel %vm2375_vm4, %v3407_v5, 0.0 }
 0x290   :  { %v3469_v24 = vsel %vm2375_vm4, %v3405_v49, 0.0 }
 0x291   :  { %v3274_v28 = vadd.f32 %v3273_v17, %v3272_v48  ;;  %v3470_v53 = vadd.f32 %v3469_v24, %v3468_v44 }
 0x293   :  { %v3472_v41 = vadd.f32 %v3471_v55, %v3470_v53  ;;  %v3276_v51 = vadd.f32 %v3275_v59, %v3274_v28 }
 0x295   :  { %v3474_v10 = vadd.f32 %v3473_v0, %v3472_v41 }
 0x296   :  { %v8621_v14 = vpop.f32.mrb[4].mxu0 }
 0x297   :  { %v8623_v7 = vpop.f32.mrb[5].mxu0  ;;  %v3410_v56 = vmul.f32 %v8621_v14, %v8621_v14  ;;  %v3281_v27 = vsel %vm2375_vm4, %v8621_v14, 0.0 }
 0x298   :  { %v3277_v2 = vsel %vm2375_vm4, %v8623_v7, 0.0  ;;  %v3408_v26 = vmul.f32 %v8623_v7, %v8623_v7  ;;  %v8629_v61 = vpop.f32.mrb[6].mxu0 }
 0x299   :  { %v3278_v38 = vadd.f32 %v3277_v2, %v3276_v51  ;;  %v8631_v12 = vpop.f32.mrb[7].mxu0  ;;  %v3411_v63 = vmul.f32 %v8629_v61, %v8629_v61  ;;  %v3479_v46 = vsel %vm2375_vm4, %v3410_v56, 0.0  ;;  %v3283_v60 = vsel %vm2375_vm4, %v8629_v61, 0.0 }
 0x29a   :  { %v3475_v43 = vsel %vm2375_vm4, %v3408_v26, 0.0  ;;  %v3279_v13 = vsel %vm2375_vm4, %v8631_v12, 0.0  ;;  %v3409_v50 = vmul.f32 %v8631_v12, %v8631_v12 }
 0x29b   :  { %v3476_v33 = vadd.f32 %v3475_v43, %v3474_v10  ;;  %v3280_v36 = vadd.f32 %v3279_v13, %v3278_v38  ;;  %v3481_v42 = vsel %vm2375_vm4, %v3411_v63, 0.0 }
 0x29c   :  { %v3477_v18 = vsel %vm2375_vm4, %v3409_v50, 0.0 }
 0x29d   :  { %v3282_v22 = vadd.f32 %v3281_v27, %v3280_v36  ;;  %v3478_v34 = vadd.f32 %v3477_v18, %v3476_v33 }
 0x29f   :  { %v3480_v29 = vadd.f32 %v3479_v46, %v3478_v34  ;;  %v3284_v35 = vadd.f32 %v3283_v60, %v3282_v22 }
 0x2a1   :  { %v3482_v45 = vadd.f32 %v3481_v42, %v3480_v29 }
 0x2a2   :  { %v8649_v58 = vpop.f32.mrb[8].mxu0 }
 0x2a3   :  { %v8651_v11 = vpop.f32.mrb[9].mxu0  ;;  %v3414_v4 = vmul.f32 %v8649_v58, %v8649_v58  ;;  %v3289_v40 = vsel %vm2375_vm4, %v8649_v58, 0.0 }
 0x2a4   :  { %v3285_v52 = vsel %vm2375_vm4, %v8651_v11, 0.0  ;;  %v3412_v3 = vmul.f32 %v8651_v11, %v8651_v11  ;;  %v8657_v16 = vpop.f32.mrb[10].mxu0 }
 0x2a5   :  { %v3286_v39 = vadd.f32 %v3285_v52, %v3284_v35  ;;  %v8659_v20 = vpop.f32.mrb[11].mxu0  ;;  %v3415_v9 = vmul.f32 %v8657_v16, %v8657_v16  ;;  %v3487_v21 = vsel %vm2375_vm4, %v3414_v4, 0.0  ;;  %v3291_v37 = vsel %vm2375_vm4, %v8657_v16, 0.0 }
 0x2a6   :  { %v3483_v47 = vsel %vm2375_vm4, %v3412_v3, 0.0  ;;  %v3287_v32 = vsel %vm2375_vm4, %v8659_v20, 0.0  ;;  %v3413_v15 = vmul.f32 %v8659_v20, %v8659_v20 }
 0x2a7   :  { %v3484_v19 = vadd.f32 %v3483_v47, %v3482_v45  ;;  %v3288_v31 = vadd.f32 %v3287_v32, %v3286_v39  ;;  %v3489_v49 = vsel %vm2375_vm4, %v3415_v9, 0.0 }
 0x2a8   :  { %v3485_v57 = vsel %vm2375_vm4, %v3413_v15, 0.0 }
 0x2a9   :  { %v3290_v23 = vadd.f32 %v3289_v40, %v3288_v31  ;;  %v3486_v1 = vadd.f32 %v3485_v57, %v3484_v19 }
 0x2ab   :  { %v3488_v25 = vadd.f32 %v3487_v21, %v3486_v1  ;;  %v3292_v30 = vadd.f32 %v3291_v37, %v3290_v23 }
 0x2ad   :  { %v3490_v48 = vadd.f32 %v3489_v49, %v3488_v25 }
 0x2ae   :  { %v8677_v17 = vpop.f32.mrb[12].mxu0 }
 0x2af   :  { %v8679_v44 = vpop.f32.mrb[13].mxu0  ;;  %v3418_v59 = vmul.f32 %v8677_v17, %v8677_v17  ;;  %v3297_v26 = vsel %vm2375_vm4, %v8677_v17, 0.0 }
 0x2b0   :  { %v3293_v5 = vsel %vm2375_vm4, %v8679_v44, 0.0  ;;  %v3416_v24 = vmul.f32 %v8679_v44, %v8679_v44  ;;  %v8685_v28 = vpop.f32.mrb[14].mxu0 }
 0x2b1   :  { %v3294_v53 = vadd.f32 %v3293_v5, %v3292_v30  ;;  %v8687_v55 = vpop.f32.mrb[15].mxu0  ;;  %v3419_v38 = vmul.f32 %v8685_v28, %v8685_v28  ;;  %v3495_v50 = vsel %vm2375_vm4, %v3418_v59, 0.0  ;;  %v3299_v33 = vsel %vm2375_vm4, %v8685_v28, 0.0 }
 0x2b2   :  { %v3491_v41 = vsel %vm2375_vm4, %v3416_v24, 0.0  ;;  %v3295_v51 = vsel %vm2375_vm4, %v8687_v55, 0.0  ;;  %v3417_v0 = vmul.f32 %v8687_v55, %v8687_v55 }
 0x2b3   :  { %v3492_v10 = vadd.f32 %v3491_v41, %v3490_v48  ;;  %v3296_v2 = vadd.f32 %v3295_v51, %v3294_v53  ;;  %v3497_v63 = vsel %vm2375_vm4, %v3419_v38, 0.0 }
 0x2b4   :  { %v3493_v56 = vsel %vm2375_vm4, %v3417_v0, 0.0 }
 0x2b5   :  { %v3298_v43 = vadd.f32 %v3297_v26, %v3296_v2  ;;  %v3494_v13 = vadd.f32 %v3493_v56, %v3492_v10 }
 0x2b7   :  { %v3496_v36 = vadd.f32 %v3495_v50, %v3494_v13  ;;  %v3300_v27 = vadd.f32 %v3299_v33, %v3298_v43 }
 0x2b9   :  { %v3498_v18 = vadd.f32 %v3497_v63, %v3496_v36 }
 0x2ba   :  { %v8705_v22 = vpop.f32.mrb[16].mxu0 }
 0x2bb   :  { %v8707_v34 = vpop.f32.mrb[17].mxu0  ;;  %v3422_v45 = vmul.f32 %v8705_v22, %v8705_v22  ;;  %v3305_v32 = vsel %vm2375_vm4, %v8705_v22, 0.0 }
 0x2bc   :  { %v3301_v46 = vsel %vm2375_vm4, %v8707_v34, 0.0  ;;  %v3420_v60 = vmul.f32 %v8707_v34, %v8707_v34  ;;  %v8713_v29 = vpop.f32.mrb[18].mxu0 }
 0x2bd   :  { %v3302_v35 = vadd.f32 %v3301_v46, %v3300_v27  ;;  %v8715_v42 = vpop.f32.mrb[19].mxu0  ;;  %v3423_v15 = vmul.f32 %v8713_v29, %v8713_v29  ;;  %v3503_v9 = vsel %vm2375_vm4, %v3422_v45, 0.0  ;;  %v3307_v57 = vsel %vm2375_vm4, %v8713_v29, 0.0 }
 0x2be   :  { %v3499_v52 = vsel %vm2375_vm4, %v3420_v60, 0.0  ;;  %v3303_v3 = vsel %vm2375_vm4, %v8715_v42, 0.0  ;;  %v3421_v39 = vmul.f32 %v8715_v42, %v8715_v42 }
 0x2bf   :  { %v3500_v4 = vadd.f32 %v3499_v52, %v3498_v18  ;;  %v3304_v47 = vadd.f32 %v3303_v3, %v3302_v35  ;;  %v3505_v21 = vsel %vm2375_vm4, %v3423_v15, 0.0 }
 0x2c0   :  { %v3501_v19 = vsel %vm2375_vm4, %v3421_v39, 0.0 }
 0x2c1   :  { %v3306_v31 = vadd.f32 %v3305_v32, %v3304_v47  ;;  %v3502_v40 = vadd.f32 %v3501_v19, %v3500_v4 }
 0x2c3   :  { %v3504_v23 = vadd.f32 %v3503_v9, %v3502_v40  ;;  %v3308_v1 = vadd.f32 %v3307_v57, %v3306_v31 }
 0x2c5   :  { %v3506_v37 = vadd.f32 %v3505_v21, %v3504_v23 }
 0x2c6   :  { %v8733_v25 = vpop.f32.mrb[20].mxu0 }
 0x2c7   :  { %v8735_v30 = vpop.f32.mrb[21].mxu0  ;;  %v3426_v59 = vmul.f32 %v8733_v25, %v8733_v25  ;;  %v3313_v26 = vsel %vm2375_vm4, %v8733_v25, 0.0 }
 0x2c8   :  { %v3309_v49 = vsel %vm2375_vm4, %v8735_v30, 0.0  ;;  %v3424_v48 = vmul.f32 %v8735_v30, %v8735_v30  ;;  %v8741_v5 = vpop.f32.mrb[22].mxu0 }
 0x2c9   :  { %v3310_v24 = vadd.f32 %v3309_v49, %v3308_v1  ;;  %v8743_v53 = vpop.f32.mrb[23].mxu0  ;;  %v3427_v38 = vmul.f32 %v8741_v5, %v8741_v5  ;;  %v3511_v50 = vsel %vm2375_vm4, %v3426_v59, 0.0  ;;  %v3315_v33 = vsel %vm2375_vm4, %v8741_v5, 0.0 }
 0x2ca   :  { %v3507_v41 = vsel %vm2375_vm4, %v3424_v48, 0.0  ;;  %v3311_v51 = vsel %vm2375_vm4, %v8743_v53, 0.0  ;;  %v3425_v0 = vmul.f32 %v8743_v53, %v8743_v53 }
 0x2cb   :  { %v3508_v10 = vadd.f32 %v3507_v41, %v3506_v37  ;;  %v3312_v2 = vadd.f32 %v3311_v51, %v3310_v24  ;;  %v3513_v63 = vsel %vm2375_vm4, %v3427_v38, 0.0 }
 0x2cc   :  { %v3509_v56 = vsel %vm2375_vm4, %v3425_v0, 0.0 }
 0x2cd   :  { %v3314_v43 = vadd.f32 %v3313_v26, %v3312_v2  ;;  %v3510_v13 = vadd.f32 %v3509_v56, %v3508_v10 }
 0x2cf   :  { %v3512_v36 = vadd.f32 %v3511_v50, %v3510_v13  ;;  %v3316_v27 = vadd.f32 %v3315_v33, %v3314_v43 }
 0x2d1   :  { %v3514_v18 = vadd.f32 %v3513_v63, %v3512_v36 }
 0x2d4   :  { %v8761_v46 = vpop.f32.mrb[24].mxu0 }
 0x2d5   :  { %v8763_v60 = vpop.f32.mrb[25].mxu0  ;;  %v3430_v4 = vmul.f32 %v8761_v46, %v8761_v46  ;;  %v3321_v40 = vsel %vm2375_vm4, %v8761_v46, 0.0 }
 0x2d6   :  { %v3317_v35 = vsel %vm2375_vm4, %v8763_v60, 0.0  ;;  %v3428_v45 = vmul.f32 %v8763_v60, %v8763_v60  ;;  %v8769_v52 = vpop.f32.mrb[26].mxu0 }
 0x2d7   :  { %v3318_v3 = vadd.f32 %v3317_v35, %v3316_v27  ;;  %v8771_v39 = vpop.f32.mrb[27].mxu0  ;;  %v3431_v9 = vmul.f32 %v8769_v52, %v8769_v52  ;;  %v3519_v21 = vsel %vm2375_vm4, %v3430_v4, 0.0  ;;  %v3323_v37 = vsel %vm2375_vm4, %v8769_v52, 0.0 }
 0x2d8   :  { %v3515_v47 = vsel %vm2375_vm4, %v3428_v45, 0.0  ;;  %v3319_v32 = vsel %vm2375_vm4, %v8771_v39, 0.0  ;;  %v3429_v15 = vmul.f32 %v8771_v39, %v8771_v39 }
 0x2d9   :  { %v3516_v19 = vadd.f32 %v3515_v47, %v3514_v18  ;;  %v3320_v31 = vadd.f32 %v3319_v32, %v3318_v3  ;;  %v3521_v24 = vsel %vm2375_vm4, %v3431_v9, 0.0 }
 0x2da   :  { %v3517_v57 = vsel %vm2375_vm4, %v3429_v15, 0.0 }
 0x2db   :  { %v3322_v23 = vadd.f32 %v3321_v40, %v3320_v31  ;;  %v3518_v1 = vadd.f32 %v3517_v57, %v3516_v19 }
 0x2dd   :  { %v3520_v49 = vadd.f32 %v3519_v21, %v3518_v1  ;;  %v3324_v48 = vadd.f32 %v3323_v37, %v3322_v23 }
 0x2df   :  { %v3522_v59 = vadd.f32 %v3521_v24, %v3520_v49 }
 0x2e4   :  { %v8789_v41 = vpop.f32.mrb[28].mxu0 }
 0x2e5   :  { %v8791_v51 = vpop.f32.mrb[29].mxu0  ;;  %v3434_v56 = vmul.f32 %v8789_v41, %v8789_v41  ;;  %v3329_v27 = vsel %vm2375_vm4, %v8789_v41, 0.0 }
 0x2e6   :  { %v3325_v0 = vsel %vm2375_vm4, %v8791_v51, 0.0  ;;  %v3432_v10 = vmul.f32 %v8791_v51, %v8791_v51  ;;  %v8797_v2 = vpop.f32.mrb[30].mxu0 }
 0x2e7   :  { %v3326_v26 = vadd.f32 %v3325_v0, %v3324_v48  ;;  %v8799_v38 = vpop.f32.mrb[31].mxu0  ;;  %v3435_v63 = vmul.f32 %v8797_v2, %v8797_v2  ;;  %v3527_v3 = vsel %vm2375_vm4, %v3434_v56, 0.0  ;;  %v3331_v4 = vsel %vm2375_vm4, %v8797_v2, 0.0 }
 0x2e8   :  { %v3523_v43 = vsel %vm2375_vm4, %v3432_v10, 0.0  ;;  %v3327_v13 = vsel %vm2375_vm4, %v8799_v38, 0.0  ;;  %v3433_v50 = vmul.f32 %v8799_v38, %v8799_v38 }
 0x2e9   :  { %v3524_v33 = vadd.f32 %v3523_v43, %v3522_v59  ;;  %v3328_v36 = vadd.f32 %v3327_v13, %v3326_v26  ;;  %v3529_v15 = vsel %vm2375_vm4, %v3435_v63, 0.0 }
 0x2ea   :  { %v3525_v18 = vsel %vm2375_vm4, %v3433_v50, 0.0 }
 0x2eb   :  { %v3330_v35 = vadd.f32 %v3329_v27, %v3328_v36  ;;  %v3526_v45 = vadd.f32 %v3525_v18, %v3524_v33 }
 0x2ed   :  { %v3528_v47 = vadd.f32 %v3527_v3, %v3526_v45  ;;  %v3332_v32 = vadd.f32 %v3331_v4, %v3330_v35 }
 0x2ef   :  { %v3530_v19 = vadd.f32 %v3529_v15, %v3528_v47 }
 0x2f4   :  { %v8817_v31 = vpop.f32.mrb[0].mxu1 }
 0x2f5   :  { %v8819_v40 = vpop.f32.mrb[1].mxu1  ;;  %v3438_v37 = vmul.f32 %v8817_v31, %v8817_v31  ;;  %v3337_v10 = vsel %vm2375_vm4, %v8817_v31, 0.0 }
 0x2f6   :  { %v3333_v9 = vsel %vm2375_vm4, %v8819_v40, 0.0  ;;  %v3436_v57 = vmul.f32 %v8819_v40, %v8819_v40  ;;  %v8825_v23 = vpop.f32.mrb[2].mxu1 }
 0x2f7   :  { %v3334_v1 = vadd.f32 %v3333_v9, %v3332_v32  ;;  %v8827_v21 = vpop.f32.mrb[3].mxu1  ;;  %v3439_v26 = vmul.f32 %v8825_v23, %v8825_v23  ;;  %v3535_v50 = vsel %vm2375_vm4, %v3438_v37, 0.0  ;;  %v3339_v33 = vsel %vm2375_vm4, %v8825_v23, 0.0 }
 0x2f8   :  { %v3531_v49 = vsel %vm2375_vm4, %v3436_v57, 0.0  ;;  %v3335_v48 = vsel %vm2375_vm4, %v8827_v21, 0.0  ;;  %v3437_v24 = vmul.f32 %v8827_v21, %v8827_v21 }
 0x2f9   :  { %v3532_v59 = vadd.f32 %v3531_v49, %v3530_v19  ;;  %v3336_v0 = vadd.f32 %v3335_v48, %v3334_v1  ;;  %v3537_v63 = vsel %vm2375_vm4, %v3439_v26, 0.0 }
 0x2fa   :  { %v3533_v56 = vsel %vm2375_vm4, %v3437_v24, 0.0 }
 0x2fb   :  { %v3338_v43 = vadd.f32 %v3337_v10, %v3336_v0  ;;  %v3534_v13 = vadd.f32 %v3533_v56, %v3532_v59 }
 0x2fd   :  { %v3536_v36 = vadd.f32 %v3535_v50, %v3534_v13  ;;  %v3340_v27 = vadd.f32 %v3339_v33, %v3338_v43 }
 0x2ff   :  { %v3538_v18 = vadd.f32 %v3537_v63, %v3536_v36 }
 0x304   :  { %v8845_v35 = vpop.f32.mrb[4].mxu1 }
 0x305   :  { %v8847_v45 = vpop.f32.mrb[5].mxu1  ;;  %v3442_v19 = vmul.f32 %v8845_v35, %v8845_v35  ;;  %v3345_v48 = vsel %vm2375_vm4, %v8845_v35, 0.0 }
 0x306   :  { %v3341_v3 = vsel %vm2375_vm4, %v8847_v45, 0.0  ;;  %v3440_v4 = vmul.f32 %v8847_v45, %v8847_v45  ;;  %v8853_v47 = vpop.f32.mrb[6].mxu1 }
 0x307   :  { %v3342_v32 = vadd.f32 %v3341_v3, %v3340_v27  ;;  %v8855_v15 = vpop.f32.mrb[7].mxu1  ;;  %v3443_v24 = vmul.f32 %v8853_v47, %v8853_v47  ;;  %v3543_v26 = vsel %vm2375_vm4, %v3442_v19, 0.0  ;;  %v3347_v56 = vsel %vm2375_vm4, %v8853_v47, 0.0 }
 0x308   :  { %v3539_v9 = vsel %vm2375_vm4, %v3440_v4, 0.0  ;;  %v3343_v57 = vsel %vm2375_vm4, %v8855_v15, 0.0  ;;  %v3441_v1 = vmul.f32 %v8855_v15, %v8855_v15 }
 0x309   :  { %v3540_v37 = vadd.f32 %v3539_v9, %v3538_v18  ;;  %v3344_v49 = vadd.f32 %v3343_v57, %v3342_v32  ;;  %v3545_v50 = vsel %vm2375_vm4, %v3443_v24, 0.0 }
 0x30a   :  { %v3541_v59 = vsel %vm2375_vm4, %v3441_v1, 0.0 }
 0x30b   :  { %v3346_v0 = vadd.f32 %v3345_v48, %v3344_v49  ;;  %v3542_v10 = vadd.f32 %v3541_v59, %v3540_v37 }
 0x30d   :  { %v3544_v43 = vadd.f32 %v3543_v26, %v3542_v10  ;;  %v3348_v13 = vadd.f32 %v3347_v56, %v3346_v0 }
 0x30f   :  { %v3546_v33 = vadd.f32 %v3545_v50, %v3544_v43 }
 0x314   :  { %v8873_v36 = vpop.f32.mrb[8].mxu1 }
 0x315   :  { %10972 = vst [vmem:[#allocation11_spill] sm:$0xff] %v8873_v36  ;;  %v8875_v27 = vpop.f32.mrb[9].mxu1  ;;  %v3446_v19 = vmul.f32 %v8873_v36, %v8873_v36  ;;  %v3353_v48 = vsel %vm2375_vm4, %v8873_v36, 0.0 }
 0x316   :  { %10973 = vst [vmem:[#allocation166_spill] sm:$0xff] %v8875_v27  ;;  %v3349_v63 = vsel %vm2375_vm4, %v8875_v27, 0.0  ;;  %v3444_v18 = vmul.f32 %v8875_v27, %v8875_v27  ;;  %v8881_v3 = vpop.f32.mrb[10].mxu1 }
 0x317   :  { %10974 = vst [vmem:[#allocation167_spill] sm:$0xff] %v8881_v3  ;;  %v3350_v4 = vadd.f32 %v3349_v63, %v3348_v13  ;;  %v8883_v32 = vpop.f32.mrb[11].mxu1  ;;  %v3447_v24 = vmul.f32 %v8881_v3, %v8881_v3  ;;  %v3551_v26 = vsel %vm2375_vm4, %v3446_v19, 0.0  ;;  %v3355_v56 = vsel %vm2375_vm4, %v8881_v3, 0.0 }
 0x318   :  { %10975 = vst [vmem:[#allocation12_spill] sm:$0xff] %v8883_v32  ;;  %v3547_v9 = vsel %vm2375_vm4, %v3444_v18, 0.0  ;;  %v3351_v57 = vsel %vm2375_vm4, %v8883_v32, 0.0  ;;  %v3445_v1 = vmul.f32 %v8883_v32, %v8883_v32 }
 0x319   :  { %v3548_v37 = vadd.f32 %v3547_v9, %v3546_v33  ;;  %v3352_v49 = vadd.f32 %v3351_v57, %v3350_v4  ;;  %v3553_v50 = vsel %vm2375_vm4, %v3447_v24, 0.0 }
 0x31a   :  { %v3549_v59 = vsel %vm2375_vm4, %v3445_v1, 0.0 }
 0x31b   :  { %v3354_v0 = vadd.f32 %v3353_v48, %v3352_v49  ;;  %v3550_v10 = vadd.f32 %v3549_v59, %v3548_v37 }
 0x31d   :  { %v3552_v43 = vadd.f32 %v3551_v26, %v3550_v10  ;;  %v3356_v13 = vadd.f32 %v3355_v56, %v3354_v0 }
 0x31f   :  { %v3554_v33 = vadd.f32 %v3553_v50, %v3552_v43 }
 0x324   :  { %v8901_v63 = vpop.f32.mrb[12].mxu1 }
 0x325   :  { %10976 = vst [vmem:[#allocation169_spill] sm:$0xff] %v8901_v63  ;;  %v8903_v18 = vpop.f32.mrb[13].mxu1  ;;  %v3450_v37 = vmul.f32 %v8901_v63, %v8901_v63  ;;  %v3361_v10 = vsel %vm2375_vm4, %v8901_v63, 0.0 }
 0x326   :  { %10977 = vst [vmem:[#allocation94_spill] sm:$0xff] %v8903_v18  ;;  %v3357_v4 = vsel %vm2375_vm4, %v8903_v18, 0.0  ;;  %v3448_v9 = vmul.f32 %v8903_v18, %v8903_v18  ;;  %v8909_v57 = vpop.f32.mrb[14].mxu1 }
 0x327   :  { %10978 = vst [vmem:[#allocation170_spill] sm:$0xff] %v8909_v57  ;;  %v3358_v19 = vadd.f32 %v3357_v4, %v3356_v13  ;;  %v8911_v1 = vpop.f32.mrb[15].mxu1  ;;  %v3451_v26 = vmul.f32 %v8909_v57, %v8909_v57  ;;  %v3559_v50 = vsel %vm2375_vm4, %v3450_v37, 0.0  ;;  %v3363_v4 = vsel %vm2375_vm4, %v8909_v57, 0.0 }
 0x328   :  { %10979 = vst [vmem:[#allocation171_spill] sm:$0xff] %v8911_v1  ;;  %v3555_v49 = vsel %vm2375_vm4, %v3448_v9, 0.0  ;;  %v3359_v48 = vsel %vm2375_vm4, %v8911_v1, 0.0  ;;  %v3449_v24 = vmul.f32 %v8911_v1, %v8911_v1 }
 0x329   :  { %v3556_v59 = vadd.f32 %v3555_v49, %v3554_v33  ;;  %v3360_v0 = vadd.f32 %v3359_v48, %v3358_v19  ;;  %v3561_v33 = vsel %vm2375_vm4, %v3451_v26, 0.0 }
 0x32a   :  { %v3557_v56 = vsel %vm2375_vm4, %v3449_v24, 0.0 }
 0x32b   :  { %v3362_v43 = vadd.f32 %v3361_v10, %v3360_v0  ;;  %v3558_v13 = vadd.f32 %v3557_v56, %v3556_v59 }
 0x32d   :  { %v3560_v9 = vadd.f32 %v3559_v50, %v3558_v13  ;;  %v3364_v18 = vadd.f32 %v3363_v4, %v3362_v43 }
 0x32f   :  { %v3562_v19 = vadd.f32 %v3561_v33, %v3560_v9 }
 0x334   :  { %v8929_v49 = vpop.f32.mrb[16].mxu1 }
 0x335   :  { %10980 = vst [vmem:[#allocation172_spill] sm:$0xff] %v8929_v49  ;;  %v8931_v48 = vpop.f32.mrb[17].mxu1  ;;  %v3454_v10 = vmul.f32 %v8929_v49, %v8929_v49  ;;  %v3369_v4 = vsel %vm2375_vm4, %v8929_v49, 0.0 }
 0x336   :  { %10981 = vst [vmem:[#allocation115_spill] sm:$0xff] %v8931_v48  ;;  %v3365_v63 = vsel %vm2375_vm4, %v8931_v48, 0.0  ;;  %v3452_v24 = vmul.f32 %v8931_v48, %v8931_v48  ;;  %v8937_v59 = vpop.f32.mrb[18].mxu1 }
 0x337   :  { %10982 = vst [vmem:[#allocation37_spill] sm:$0xff] %v8937_v59  ;;  %v3366_v37 = vadd.f32 %v3365_v63, %v3364_v18  ;;  %v8939_v0 = vpop.f32.mrb[19].mxu1  ;;  %v3455_v63 = vmul.f32 %v8937_v59, %v8937_v59  ;;  %v3371_v48 = vsel %vm2375_vm4, %v8937_v59, 0.0 }
 0x338   :  { %10983 = vst [vmem:[#allocation173_spill] sm:$0xff] %v8939_v0  ;;  %v3563_v26 = vsel %vm2375_vm4, %v3452_v24, 0.0  ;;  %v3367_v56 = vsel %vm2375_vm4, %v8939_v0, 0.0  ;;  %v3453_v43 = vmul.f32 %v8939_v0, %v8939_v0  ;;  %v3567_v24 = vsel %vm2375_vm4, %v3454_v10, 0.0 }
 0x339   :  { %v3564_v13 = vadd.f32 %v3563_v26, %v3562_v19  ;;  %v3368_v50 = vadd.f32 %v3367_v56, %v3366_v37  ;;  %v3569_v19 = vsel %vm2375_vm4, %v3455_v63, 0.0 }
 0x33a   :  { %v3565_v18 = vsel %vm2375_vm4, %v3453_v43, 0.0 }
 0x33b   :  { %v3370_v9 = vadd.f32 %v3369_v4, %v3368_v50  ;;  %v3566_v33 = vadd.f32 %v3565_v18, %v3564_v13 }
 0x33d   :  { %v3568_v57 = vadd.f32 %v3567_v24, %v3566_v33  ;;  %v3372_v1 = vadd.f32 %v3371_v48, %v3370_v9 }
 0x33f   :  { %v3570_v37 = vadd.f32 %v3569_v19, %v3568_v57 }
 0x344   :  { %v8957_v26 = vpop.f32.mrb[20].mxu1 }
 0x345   :  { %10984 = vst [vmem:[#allocation116_spill] sm:$0xff] %v8957_v26  ;;  %v8959_v56 = vpop.f32.mrb[21].mxu1  ;;  %v3458_v48 = vmul.f32 %v8957_v26, %v8957_v26  ;;  %v3377_v33 = vsel %vm2375_vm4, %v8957_v26, 0.0 }
 0x346   :  { %10985 = vst [vmem:[#allocation174_spill] sm:$0xff] %v8959_v56  ;;  %v3373_v49 = vsel %vm2375_vm4, %v8959_v56, 0.0  ;;  %v3456_v43 = vmul.f32 %v8959_v56, %v8959_v56  ;;  %v8965_v13 = vpop.f32.mrb[22].mxu1 }
 0x347   :  { %10986 = vst [vmem:[#allocation175_spill] sm:$0xff] %v8965_v13  ;;  %v3374_v10 = vadd.f32 %v3373_v49, %v3372_v1  ;;  %v8967_v50 = vpop.f32.mrb[23].mxu1  ;;  %v3459_v1 = vmul.f32 %v8965_v13, %v8965_v13  ;;  %v3379_v56 = vsel %vm2375_vm4, %v8965_v13, 0.0 }
 0x348   :  { %10987 = vst [vmem:[#allocation13_spill] sm:$0xff] %v8967_v50  ;;  %v3571_v57 = vsel %vm2375_vm4, %v3456_v43, 0.0  ;;  %v3375_v4 = vsel %vm2375_vm4, %v8967_v50, 0.0  ;;  %v3457_v63 = vmul.f32 %v8967_v50, %v8967_v50  ;;  %v3575_v43 = vsel %vm2375_vm4, %v3458_v48, 0.0 }
 0x349   :  { %v3572_v18 = vadd.f32 %v3571_v57, %v3570_v37  ;;  %v3376_v9 = vadd.f32 %v3375_v4, %v3374_v10  ;;  %v3577_v37 = vsel %vm2375_vm4, %v3459_v1, 0.0 }
 0x34a   :  { %v3573_v49 = vsel %vm2375_vm4, %v3457_v63, 0.0 }
 0x34b   :  { %v3378_v24 = vadd.f32 %v3377_v33, %v3376_v9  ;;  %v3574_v19 = vadd.f32 %v3573_v49, %v3572_v18 }
 0x34d   :  { %v3576_v59 = vadd.f32 %v3575_v43, %v3574_v19  ;;  %v3380_v0 = vadd.f32 %v3379_v56, %v3378_v24 }
 0x34f   :  { %v3578_v10 = vadd.f32 %v3577_v37, %v3576_v59 }
 0x354   :  { %v8985_v57 = vpop.f32.mrb[24].mxu1 }
 0x355   :  { %10988 = vst [vmem:[#allocation176_spill] sm:$0xff] %v8985_v57  ;;  %v8987_v4 = vpop.f32.mrb[25].mxu1  ;;  %v3462_v56 = vmul.f32 %v8985_v57, %v8985_v57  ;;  %v3385_v19 = vsel %vm2375_vm4, %v8985_v57, 0.0 }
 0x356   :  { %10989 = vst [vmem:[#allocation177_spill] sm:$0xff] %v8987_v4  ;;  %v3381_v26 = vsel %vm2375_vm4, %v8987_v4, 0.0  ;;  %v3460_v63 = vmul.f32 %v8987_v4, %v8987_v4  ;;  %v8993_v18 = vpop.f32.mrb[26].mxu1 }
 0x357   :  { %10990 = vst [vmem:[#allocation14_spill] sm:$0xff] %v8993_v18  ;;  %v3382_v48 = vadd.f32 %v3381_v26, %v3380_v0  ;;  %v8995_v9 = vpop.f32.mrb[27].mxu1  ;;  %v3463_v0 = vmul.f32 %v8993_v18, %v8993_v18  ;;  %v3387_v4 = vsel %vm2375_vm4, %v8993_v18, 0.0 }
 0x358   :  { %10991 = vst [vmem:[#allocation163_spill] sm:$0xff] %v8995_v9  ;;  %v3579_v59 = vsel %vm2375_vm4, %v3460_v63, 0.0  ;;  %v3383_v33 = vsel %vm2375_vm4, %v8995_v9, 0.0  ;;  %v3461_v1 = vmul.f32 %v8995_v9, %v8995_v9  ;;  %v3583_v63 = vsel %vm2375_vm4, %v3462_v56, 0.0 }
 0x359   :  { %v3580_v49 = vadd.f32 %v3579_v59, %v3578_v10  ;;  %v3384_v24 = vadd.f32 %v3383_v33, %v3382_v48  ;;  %v3585_v10 = vsel %vm2375_vm4, %v3463_v0, 0.0 }
 0x35a   :  { %v3581_v26 = vsel %vm2375_vm4, %v3461_v1, 0.0 }
 0x35b   :  { %v3386_v43 = vadd.f32 %v3385_v19, %v3384_v24  ;;  %v3582_v37 = vadd.f32 %v3581_v26, %v3580_v49 }
 0x35d   :  { %v3584_v13 = vadd.f32 %v3583_v63, %v3582_v37  ;;  %v3388_v50 = vadd.f32 %v3387_v4, %v3386_v43 }
 0x35f   :  { %v3586_v48 = vadd.f32 %v3585_v10, %v3584_v13 }
 0x360   :  { %v9013_v59 = vpop.f32.mrb[28].mxu1 }
 0x361   :  { %10992 = vst [vmem:[#allocation178_spill] sm:$0xff] %v9013_v59  ;;  %v9015_v33 = vpop.f32.mrb[29].mxu1  ;;  %v3466_v4 = vmul.f32 %v9013_v59, %v9013_v59  ;;  %v3393_v37 = vsel %vm2375_vm4, %v9013_v59, 0.0 }
 0x362   :  { %10993 = vst [vmem:[#allocation117_spill] sm:$0xff] %v9015_v33  ;;  %v3389_v57 = vsel %vm2375_vm4, %v9015_v33, 0.0  ;;  %v3464_v1 = vmul.f32 %v9015_v33, %v9015_v33  ;;  %v9021_v49 = vpop.f32.mrb[30].mxu1 }
 0x363   :  { %10994 = vst [vmem:[#allocation179_spill] sm:$0xff] %v9021_v49  ;;  %v3390_v56 = vadd.f32 %v3389_v57, %v3388_v50  ;;  %v9023_v24 = vpop.f32.mrb[31].mxu1  ;;  %v3467_v50 = vmul.f32 %v9021_v49, %v9021_v49  ;;  %v3395_v33 = vsel %vm2375_vm4, %v9021_v49, 0.0 }
 0x364   :  { %10995 = vst [vmem:[#allocation119_spill] sm:$0xff] %v9023_v24  ;;  %v3587_v13 = vsel %vm2375_vm4, %v3464_v1, 0.0  ;;  %v3391_v19 = vsel %vm2375_vm4, %v9023_v24, 0.0  ;;  %v3465_v0 = vmul.f32 %v9023_v24, %v9023_v24  ;;  %v3591_v1 = vsel %vm2375_vm4, %v3466_v4, 0.0 }
 0x365   :  { %v3588_v26 = vadd.f32 %v3587_v13, %v3586_v48  ;;  %v3392_v43 = vadd.f32 %v3391_v19, %v3390_v56  ;;  %v3593_v48 = vsel %vm2375_vm4, %v3467_v50, 0.0  ;;  %v3612_v50 = vlaneseq }
 0x366   :  { %v3589_v57 = vsel %vm2375_vm4, %v3465_v0, 0.0 }
 0x367   :  { %v3394_v63 = vadd.f32 %v3393_v37, %v3392_v43  ;;  %v3590_v10 = vadd.f32 %v3589_v57, %v3588_v26 }
 0x369   :  { %v3396_v18 = vadd.f32 %v3395_v33, %v3394_v63  ;;  %v3592_v9 = vadd.f32 %v3591_v1, %v3590_v10  ;;  %v9041_v10 = vshrl.u32 %v3612_v50, 7  ;;  %v11003_v50 = vld [vmem:[#allocation170_spill] sm:$0xff] }
 0x36b   :  { %v3397_v56 = vrot.slane %v3396_v18, 4  ;;  %v3594_v13 = vadd.f32 %v3593_v48, %v3592_v9  ;;  %v10271_v9 = vsub.s32 0, %v9041_v10 }
 0x36d   :  { %v3398_v19 = vadd.f32 %v3397_v56, %v3396_v18  ;;  %v3595_v59 = vrot.slane %v3594_v13, 4  ;;  %v3604_v18 = vld [vmem:[%s9901_s2] sm:$0x1] }
 0x36f   :  { %v3399_v24 = vrot.slane %v3398_v19, 2  ;;  %v3596_v3 = vadd.f32 %v3595_v59, %v3594_v13 }
 0x371   :  { %v3400_v36 = vadd.f32 %v3399_v24, %v3398_v19  ;;  %v3597_v32 = vrot.slane %v3596_v3, 2  ;;  %v10996_v19 = vld [vmem:[#allocation166_spill] sm:$0xff] }
 0x373   :  { %v3401_v0 = vrot.slane %v3400_v36, 1  ;;  %v3598_v43 = vadd.f32 %v3597_v32, %v3596_v3 }
 0x375   :  { %v3402_v26 = vadd.f32 %v3401_v0, %v3400_v36  ;;  %v3599_v37 = vrot.slane %v3598_v43, 1  ;;  %v9050_v36 = vld [vmem:[%s9902_s3] sm:$0x1]  ;;  %v10997_v0 = vld [vmem:[#allocation12_spill] sm:$0xff] }
 0x377   :  { %v3403_v4 = vmul.f32 0.001953125, %v3402_v26  ;;  %v3600_v57 = vadd.f32 %v3599_v37, %v3598_v43  ;;  %v10998_v43 = vld [vmem:[#allocation11_spill] sm:$0xff]  ;;  %v11000_v37 = vld [vmem:[#allocation94_spill] sm:$0xff] }
 0x378   :  { %v10999_v26 = vld [vmem:[#allocation167_spill] sm:$0xff] }
 0x379   :  { %v3601_v27 = vmul.f32 0.001953125, %v3600_v57  ;;  %v3602_v49 = vmul.f32 %v3403_v4, %v3403_v4 }
 0x37b   :  { %v3603_v33 = vsub.f32 %v3601_v27, %v3602_v49  ;;  %v11013_v49 = vld [vmem:[#allocation13_spill] sm:$0xff] }
 0x37d   :  { %v3605_v63 = vadd.f32 1e-05, %v3603_v33  ;;  %v11002_v33 = vld [vmem:[#allocation169_spill] sm:$0xff] }
 0x37f   :  { %5298 = vrsqrt.f32 %v3605_v63 }
 0x389   :  { %v5299_v59 = vpop.eup %5298 }
 0x38a   :  { %v3607_v3 = vmul.f32 %v5299_v59, %v3604_v18  ;;  %v11004_v59 = vld [vmem:[#allocation115_spill] sm:$0xff] }
 0x38c   :  { %v9052_v32 = vmul.f32 %v3607_v3, %v3403_v4  ;;  %v9056_v27 = vrot.slane %v3607_v3, %v10271_v9  ;;  %v11001_v4 = vld [vmem:[#allocation171_spill] sm:$0xff]  ;;  %v11015_v9 = vld [vmem:[#allocation116_spill] sm:$0xff] }
 0x38e   :  { %v9062_v24 = vmul.f32 %v9056_v27, %v8593_v54  ;;  %v9066_v1 = vmul.f32 %v9056_v27, %v8601_v6  ;;  %v9070_v48 = vmul.f32 %v8591_v8, %v9056_v27  ;;  %v9074_v56 = vmul.f32 %v8598_v62, %v9056_v27 }
 0x38f   :  { %v9078_v13 = vmul.f32 %v9056_v27, %v8623_v7  ;;  %v9082_v54 = vmul.f32 %v9056_v27, %v8631_v12  ;;  %v9086_v6 = vmul.f32 %v8621_v14, %v9056_v27  ;;  %v9090_v8 = vmul.f32 %v8629_v61, %v9056_v27 }
 0x390   :  { %v9094_v62 = vmul.f32 %v9056_v27, %v8651_v11  ;;  %v9098_v7 = vmul.f32 %v9056_v27, %v8659_v20  ;;  %v9102_v12 = vmul.f32 %v8649_v58, %v9056_v27  ;;  %v9106_v14 = vmul.f32 %v8657_v16, %v9056_v27 }
 0x391   :  { %v9110_v61 = vmul.f32 %v9056_v27, %v8679_v44  ;;  %v9114_v11 = vmul.f32 %v9056_v27, %v8687_v55  ;;  %v9118_v20 = vmul.f32 %v8677_v17, %v9056_v27  ;;  %v9122_v58 = vmul.f32 %v8685_v28, %v9056_v27 }
 0x392   :  { %v9126_v16 = vmul.f32 %v9056_v27, %v8707_v34  ;;  %v9130_v44 = vmul.f32 %v9056_v27, %v8715_v42  ;;  %v9134_v55 = vmul.f32 %v8705_v22, %v9056_v27  ;;  %v9138_v17 = vmul.f32 %v8713_v29, %v9056_v27 }
 0x393   :  { %v9142_v28 = vmul.f32 %v9056_v27, %v8735_v30  ;;  %v9146_v34 = vmul.f32 %v9056_v27, %v8743_v53  ;;  %v9150_v42 = vmul.f32 %v8733_v25, %v9056_v27  ;;  %v9154_v22 = vmul.f32 %v8741_v5, %v9056_v27 }
 0x394   :  { %v9158_v29 = vmul.f32 %v9056_v27, %v8763_v60  ;;  %v9162_v30 = vmul.f32 %v9056_v27, %v8771_v39  ;;  %v9166_v53 = vmul.f32 %v8761_v46, %v9056_v27  ;;  %v9170_v25 = vmul.f32 %v8769_v52, %v9056_v27 }
 0x395   :  { %v9174_v5 = vmul.f32 %v9056_v27, %v8791_v51  ;;  %v9178_v60 = vmul.f32 %v9056_v27, %v8799_v38  ;;  %v9182_v39 = vmul.f32 %v8789_v41, %v9056_v27  ;;  %v9186_v46 = vmul.f32 %v8797_v2, %v9056_v27 }
 0x396   :  { %v9190_v52 = vmul.f32 %v9056_v27, %v8819_v40  ;;  %v9194_v51 = vmul.f32 %v9056_v27, %v8827_v21  ;;  %v9198_v38 = vmul.f32 %v8817_v31, %v9056_v27  ;;  %v9202_v41 = vmul.f32 %v8825_v23, %v9056_v27 }
 0x397   :  { %v9206_v2 = vmul.f32 %v9056_v27, %v8847_v45  ;;  %v9210_v40 = vmul.f32 %v9056_v27, %v8855_v15  ;;  %v9214_v21 = vmul.f32 %v8845_v35, %v9056_v27  ;;  %v9218_v31 = vmul.f32 %v8853_v47, %v9056_v27 }
 0x398   :  { %v9222_v23 = vmul.f32 %v9056_v27, %v10996_v19  ;;  %v9226_v45 = vmul.f32 %v9056_v27, %v10997_v0  ;;  %v9230_v15 = vmul.f32 %v10998_v43, %v9056_v27  ;;  %v9234_v35 = vmul.f32 %v10999_v26, %v9056_v27  ;;  %v11005_v19 = vld [vmem:[#allocation173_spill] sm:$0xff]  ;;  %v11007_v43 = vld [vmem:[#allocation172_spill] sm:$0xff] }
 0x399   :  { %v9238_v47 = vmul.f32 %v9056_v27, %v11000_v37  ;;  %v9242_v57 = vmul.f32 %v9056_v27, %v11001_v4  ;;  %v9246_v63 = vmul.f32 %v11002_v33, %v9056_v27  ;;  %v9250_v18 = vmul.f32 %v11003_v50, %v9056_v27  ;;  %v11009_v37 = vld [vmem:[#allocation37_spill] sm:$0xff]  ;;  %v11011_v33 = vld [vmem:[#allocation174_spill] sm:$0xff] }
 0x39a   :  { %v9254_v3 = vmul.f32 %v9056_v27, %v11004_v59  ;;  %v9258_v0 = vmul.f32 %v9056_v27, %v11005_v19  ;;  %v9262_v26 = vmul.f32 %v11007_v43, %v9056_v27  ;;  %v9266_v4 = vmul.f32 %v11009_v37, %v9056_v27 }
 0x39b   :  { %v9270_v50 = vmul.f32 %v9056_v27, %v11011_v33  ;;  %v9274_v59 = vmul.f32 %v9056_v27, %v11013_v49  ;;  %v9278_v19 = vmul.f32 %v11015_v9, %v9056_v27 }
 0x39c   :  { %11006 = vst [vmem:[#allocation16_spill] sm:$0xff] %v9258_v0  ;;  %11008 = vst [vmem:[#allocation17_spill] sm:$0xff] %v9262_v26  ;;  %v11017_v0 = vld [vmem:[#allocation175_spill] sm:$0xff]  ;;  %v11019_v26 = vld [vmem:[#allocation177_spill] sm:$0xff] }
 0x39d   :  { %11010 = vst [vmem:[#allocation204_spill] sm:$0xff] %v9266_v4  ;;  %11012 = vst [vmem:[#allocation20_spill] sm:$0xff] %v9270_v50  ;;  %v9282_v43 = vmul.f32 %v11017_v0, %v9056_v27  ;;  %v9286_v37 = vmul.f32 %v9056_v27, %v11019_v26  ;;  %v11021_v4 = vld [vmem:[#allocation163_spill] sm:$0xff]  ;;  %v11023_v50 = vld [vmem:[#allocation176_spill] sm:$0xff] }
 0x39e   :  { %11014 = vst [vmem:[#allocation205_spill] sm:$0xff] %v9274_v59  ;;  %11016 = vst [vmem:[#allocation201_spill] sm:$0xff] %v9278_v19  ;;  %v9290_v33 = vmul.f32 %v9056_v27, %v11021_v4  ;;  %v9294_v49 = vmul.f32 %v11023_v50, %v9056_v27  ;;  %v11025_v59 = vld [vmem:[#allocation14_spill] sm:$0xff]  ;;  %v11027_v19 = vld [vmem:[#allocation117_spill] sm:$0xff] }
 0x39f   :  { %11018 = vst [vmem:[#allocation200_spill] sm:$0xff] %v9282_v43  ;;  %11020 = vst [vmem:[#allocation121_spill] sm:$0xff] %v9286_v37  ;;  %v9298_v9 = vmul.f32 %v11025_v59, %v9056_v27  ;;  %v9302_v0 = vmul.f32 %v9056_v27, %v11027_v19  ;;  %v11028_v43 = vld [vmem:[#allocation119_spill] sm:$0xff]  ;;  %v11029_v37 = vld [vmem:[#allocation178_spill] sm:$0xff]  ;;  %v11032_v59 = vsub.f32 %v9050_v36, %v9052_v32 }
 0x3a0   :  { %11022 = vst [vmem:[#allocation208_spill] sm:$0xff] %v9290_v33  ;;  %11024 = vst [vmem:[#allocation210_spill] sm:$0xff] %v9294_v49  ;;  %v9306_v26 = vmul.f32 %v9056_v27, %v11028_v43  ;;  %v9310_v4 = vmul.f32 %v11029_v37, %v9056_v27  ;;  %v11030_v33 = vld [vmem:[#allocation179_spill] sm:$0xff]  ;;  %v11031_v49 = vsub.s32 0, %v9041_v10 }
 0x3a1   :  { %11026 = vst [vmem:[#allocation122_spill] sm:$0xff] %v9298_v9  ;;  %v9314_v50 = vmul.f32 %v11030_v33, %v9056_v27 }
 0x3a2   :  { %v9321_v9 = vrot.slane %v11032_v59, %v11031_v49 }
 0x3a4   :  { %v9325_v19 = vadd.f32 %v9321_v9, %v9062_v24  ;;  %v9329_v43 = vadd.f32 %v9321_v9, %v9066_v1  ;;  %v9333_v37 = vadd.f32 %v9321_v9, %v9070_v48  ;;  %v9337_v10 = vadd.f32 %v9321_v9, %v9074_v56  ;;  %v11038_v33 = vld [vmem:[#allocation204_spill] sm:$0xff] }
 0x3a5   :  { %v9341_v36 = vadd.f32 %v9321_v9, %v9078_v13  ;;  %v9345_v32 = vadd.f32 %v9321_v9, %v9082_v54  ;;  %v9349_v27 = vadd.f32 %v9321_v9, %v9086_v6  ;;  %v9353_v24 = vadd.f32 %v9321_v9, %v9090_v8  ;;  %v11040_v49 = vld [vmem:[#allocation20_spill] sm:$0xff]  ;;  %v11042_v59 = vld [vmem:[#allocation205_spill] sm:$0xff] }
 0x3a6   :  { %v9357_v1 = vadd.f32 %v9321_v9, %v9094_v62  ;;  %v9361_v48 = vadd.f32 %v9321_v9, %v9098_v7  ;;  %v9365_v56 = vadd.f32 %v9321_v9, %v9102_v12  ;;  %v9369_v13 = vadd.f32 %v9321_v9, %v9106_v14 }
 0x3a7   :  { %v9373_v54 = vadd.f32 %v9321_v9, %v9110_v61  ;;  %v9377_v6 = vadd.f32 %v9321_v9, %v9114_v11  ;;  %v9381_v8 = vadd.f32 %v9321_v9, %v9118_v20  ;;  %v9385_v62 = vadd.f32 %v9321_v9, %v9122_v58 }
 0x3a8   :  { %v9389_v7 = vadd.f32 %v9321_v9, %v9126_v16  ;;  %v9393_v12 = vadd.f32 %v9321_v9, %v9130_v44  ;;  %v9397_v14 = vadd.f32 %v9321_v9, %v9134_v55  ;;  %v9401_v61 = vadd.f32 %v9321_v9, %v9138_v17 }
 0x3a9   :  { %v9405_v11 = vadd.f32 %v9321_v9, %v9142_v28  ;;  %v9409_v20 = vadd.f32 %v9321_v9, %v9146_v34  ;;  %v9413_v58 = vadd.f32 %v9321_v9, %v9150_v42  ;;  %v9417_v16 = vadd.f32 %v9321_v9, %v9154_v22 }
 0x3aa   :  { %v9421_v44 = vadd.f32 %v9321_v9, %v9158_v29  ;;  %v9425_v55 = vadd.f32 %v9321_v9, %v9162_v30  ;;  %v9429_v17 = vadd.f32 %v9321_v9, %v9166_v53  ;;  %v9433_v28 = vadd.f32 %v9321_v9, %v9170_v25 }
 0x3ab   :  { %v9437_v34 = vadd.f32 %v9321_v9, %v9174_v5  ;;  %v9441_v42 = vadd.f32 %v9321_v9, %v9178_v60  ;;  %v9445_v22 = vadd.f32 %v9321_v9, %v9182_v39  ;;  %v9449_v29 = vadd.f32 %v9321_v9, %v9186_v46 }
 0x3ac   :  { %v9453_v30 = vadd.f32 %v9321_v9, %v9190_v52  ;;  %v9457_v53 = vadd.f32 %v9321_v9, %v9194_v51  ;;  %v9461_v25 = vadd.f32 %v9321_v9, %v9198_v38  ;;  %v9465_v5 = vadd.f32 %v9321_v9, %v9202_v41 }
 0x3ad   :  { %v9469_v60 = vadd.f32 %v9321_v9, %v9206_v2  ;;  %v9473_v39 = vadd.f32 %v9321_v9, %v9210_v40  ;;  %v9477_v46 = vadd.f32 %v9321_v9, %v9214_v21  ;;  %v9481_v52 = vadd.f32 %v9321_v9, %v9218_v31 }
 0x3ae   :  { %v9485_v51 = vadd.f32 %v9321_v9, %v9222_v23  ;;  %v9489_v38 = vadd.f32 %v9321_v9, %v9226_v45  ;;  %v9493_v41 = vadd.f32 %v9321_v9, %v9230_v15  ;;  %v9497_v2 = vadd.f32 %v9321_v9, %v9234_v35  ;;  %v11034_v15 = vld [vmem:[#allocation16_spill] sm:$0xff] }
 0x3af   :  { %v9501_v40 = vadd.f32 %v9321_v9, %v9238_v47  ;;  %v9505_v21 = vadd.f32 %v9321_v9, %v9242_v57  ;;  %v9509_v31 = vadd.f32 %v9321_v9, %v9246_v63  ;;  %v9513_v23 = vadd.f32 %v9321_v9, %v9250_v18  ;;  %v11036_v47 = vld [vmem:[#allocation17_spill] sm:$0xff] }
 0x3b0   :  { %v9517_v45 = vadd.f32 %v9321_v9, %v9254_v3  ;;  %v9521_v35 = vadd.f32 %v9321_v9, %v11034_v15  ;;  %v9525_v57 = vadd.f32 %v9321_v9, %v11036_v47  ;;  %v9529_v63 = vadd.f32 %v9321_v9, %v11038_v33 }
 0x3b1   :  { %v9533_v18 = vadd.f32 %v9321_v9, %v11040_v49  ;;  %v9537_v3 = vadd.f32 %v9321_v9, %v11042_v59 }
 0x3b2   :  { %11033 = vst [vmem:[#allocation21_spill] sm:$0xff] %v9517_v45  ;;  %11035 = vst [vmem:[#allocation18_spill] sm:$0xff] %v9521_v35  ;;  %v11044_v45 = vld [vmem:[#allocation201_spill] sm:$0xff]  ;;  %v11045_v35 = vld [vmem:[#allocation200_spill] sm:$0xff] }
 0x3b3   :  { %11037 = vst [vmem:[#allocation25_spill] sm:$0xff] %v9525_v57  ;;  %11039 = vst [vmem:[#allocation19_spill] sm:$0xff] %v9529_v63  ;;  %v9541_v15 = vadd.f32 %v9321_v9, %v11044_v45  ;;  %v9545_v47 = vadd.f32 %v9321_v9, %v11045_v35  ;;  %v11046_v57 = vld [vmem:[#allocation121_spill] sm:$0xff]  ;;  %v11047_v63 = vld [vmem:[#allocation208_spill] sm:$0xff]  ;;  %v9565_v35 = vadd.f32 %v9321_v9, %v9302_v0  ;;  %v3754_v0 = vmax.f32 %v9337_v10, 0.0 }
 0x3b4   :  { %11041 = vst [vmem:[#allocation24_spill] sm:$0xff] %v9533_v18  ;;  %11043 = vst [vmem:[#allocation110_spill] sm:$0xff] %v9537_v3  ;;  %v9549_v33 = vadd.f32 %v9321_v9, %v11046_v57  ;;  %v9553_v49 = vadd.f32 %v9321_v9, %v11047_v63  ;;  %v11048_v18 = vld [vmem:[#allocation210_spill] sm:$0xff]  ;;  %v9569_v57 = vadd.f32 %v9321_v9, %v9306_v26  ;;  %v3756_v26 = vmax.f32 %v9345_v32, 0.0 }
 0x3b5   :  { %v9557_v59 = vadd.f32 %v9321_v9, %v11048_v18  ;;  %v11050_v3 = vld [vmem:[#allocation122_spill] sm:$0xff]  ;;  %11052 = vst [vmem:[#allocation99_spill] sm:$0xff] %v9565_v35  ;;  %v9573_v63 = vadd.f32 %v9321_v9, %v9310_v4  ;;  %v9577_v18 = vadd.f32 %v9321_v9, %v9314_v50  ;;  %v3755_v35 = vmax.f32 %v9341_v36, 0.0  ;;  %3818 = vst.msk [vmem:[%s9903_s4 + $0x18] sm:$0xff] %vm2375_vm4, %v3754_v0 }
 0x3b6   :  { %v9561_v45 = vadd.f32 %v9321_v9, %v11050_v3  ;;  %11053 = vst [vmem:[#allocation22_spill] sm:$0xff] %v9569_v57  ;;  %v3752_v3 = vmax.f32 %v9329_v43, 0.0  ;;  %v3757_v57 = vmax.f32 %v9349_v27, 0.0  ;;  %v3758_v4 = vmax.f32 %v9353_v24, 0.0  ;;  %3820 = vst.msk [vmem:[%s9903_s4 + $0x28] sm:$0xff] %vm2375_vm4, %v3756_v26 }
 0x3b7   :  { %11049 = vst [vmem:[#allocation23_spill] sm:$0xff] %v9557_v59  ;;  %11054 = vst [vmem:[#allocation124_spill] sm:$0xff] %v9573_v63  ;;  %v3751_v59 = vmax.f32 %v9325_v19, 0.0  ;;  %v3759_v63 = vmax.f32 %v9357_v1, 0.0  ;;  %v3760_v9 = vmax.f32 %v9361_v48, 0.0  ;;  %v3761_v50 = vmax.f32 %v9365_v56, 0.0 }
 0x3b8   :  { %11051 = vst [vmem:[#allocation28_spill] sm:$0xff] %v9561_v45  ;;  %v3753_v45 = vmax.f32 %v9333_v37, 0.0  ;;  %v3762_v19 = vmax.f32 %v9369_v13, 0.0  ;;  %3816 = vst.msk [vmem:[%s9903_s4 + $0x8] sm:$0xff] %vm2375_vm4, %v3752_v3  ;;  %v3763_v43 = vmax.f32 %v9373_v54, 0.0  ;;  %v3764_v37 = vmax.f32 %v9377_v6, 0.0 }
 0x3b9   :  { %3815 = vst.msk [vmem:[%s9903_s4] sm:$0xff] %vm2375_vm4, %v3751_v59  ;;  %v3765_v10 = vmax.f32 %v9381_v8, 0.0  ;;  %v3766_v36 = vmax.f32 %v9385_v62, 0.0  ;;  %3819 = vst.msk [vmem:[%s9903_s4 + $0x20] sm:$0xff] %vm2375_vm4, %v3755_v35  ;;  %v3767_v32 = vmax.f32 %v9389_v7, 0.0  ;;  %v3768_v27 = vmax.f32 %v9393_v12, 0.0 }
 0x3ba   :  { %3817 = vst.msk [vmem:[%s9903_s4 + $0x10] sm:$0xff] %vm2375_vm4, %v3753_v45  ;;  %3821 = vst.msk [vmem:[%s9903_s4 + $0x30] sm:$0xff] %vm2375_vm4, %v3757_v57  ;;  %v3769_v24 = vmax.f32 %v9397_v14, 0.0  ;;  %v3770_v1 = vmax.f32 %v9401_v61, 0.0  ;;  %v3771_v48 = vmax.f32 %v9405_v11, 0.0  ;;  %v3772_v56 = vmax.f32 %v9409_v20, 0.0 }
 0x3bb   :  { %3822 = vst.msk [vmem:[%s9903_s4 + $0x38] sm:$0xff] %vm2375_vm4, %v3758_v4  ;;  %3823 = vst.msk [vmem:[%s9903_s4 + $0x40] sm:$0xff] %vm2375_vm4, %v3759_v63  ;;  %v3773_v13 = vmax.f32 %v9413_v58, 0.0  ;;  %v3774_v54 = vmax.f32 %v9417_v16, 0.0  ;;  %v3775_v6 = vmax.f32 %v9421_v44, 0.0  ;;  %v3776_v8 = vmax.f32 %v9425_v55, 0.0 }
 0x3bc   :  { %3824 = vst.msk [vmem:[%s9903_s4 + $0x48] sm:$0xff] %vm2375_vm4, %v3760_v9  ;;  %3825 = vst.msk [vmem:[%s9903_s4 + $0x50] sm:$0xff] %vm2375_vm4, %v3761_v50  ;;  %v3777_v62 = vmax.f32 %v9429_v17, 0.0  ;;  %v3778_v7 = vmax.f32 %v9433_v28, 0.0  ;;  %v3779_v12 = vmax.f32 %v9437_v34, 0.0  ;;  %v3780_v14 = vmax.f32 %v9441_v42, 0.0 }
 0x3bd   :  { %3826 = vst.msk [vmem:[%s9903_s4 + $0x58] sm:$0xff] %vm2375_vm4, %v3762_v19  ;;  %3827 = vst.msk [vmem:[%s9903_s4 + $0x60] sm:$0xff] %vm2375_vm4, %v3763_v43  ;;  %v3781_v61 = vmax.f32 %v9445_v22, 0.0  ;;  %v3782_v11 = vmax.f32 %v9449_v29, 0.0  ;;  %v3783_v20 = vmax.f32 %v9453_v30, 0.0  ;;  %v3784_v58 = vmax.f32 %v9457_v53, 0.0 }
 0x3be   :  { %3828 = vst.msk [vmem:[%s9903_s4 + $0x68] sm:$0xff] %vm2375_vm4, %v3764_v37  ;;  %3829 = vst.msk [vmem:[%s9903_s4 + $0x70] sm:$0xff] %vm2375_vm4, %v3765_v10  ;;  %v3785_v16 = vmax.f32 %v9461_v25, 0.0  ;;  %v3786_v44 = vmax.f32 %v9465_v5, 0.0  ;;  %v3787_v55 = vmax.f32 %v9469_v60, 0.0  ;;  %v3788_v17 = vmax.f32 %v9473_v39, 0.0 }
 0x3bf   :  { %3830 = vst.msk [vmem:[%s9903_s4 + $0x78] sm:$0xff] %vm2375_vm4, %v3766_v36  ;;  %3831 = vst.msk [vmem:[%s9903_s4 + $0x80] sm:$0xff] %vm2375_vm4, %v3767_v32  ;;  %v3789_v28 = vmax.f32 %v9477_v46, 0.0  ;;  %v3790_v34 = vmax.f32 %v9481_v52, 0.0  ;;  %v3791_v42 = vmax.f32 %v9485_v51, 0.0  ;;  %v3792_v22 = vmax.f32 %v9489_v38, 0.0 }
 0x3c0   :  { %3832 = vst.msk [vmem:[%s9903_s4 + $0x88] sm:$0xff] %vm2375_vm4, %v3768_v27  ;;  %3833 = vst.msk [vmem:[%s9903_s4 + $0x90] sm:$0xff] %vm2375_vm4, %v3769_v24  ;;  %v3793_v29 = vmax.f32 %v9493_v41, 0.0  ;;  %v3794_v30 = vmax.f32 %v9497_v2, 0.0  ;;  %v3795_v53 = vmax.f32 %v9501_v40, 0.0  ;;  %v3796_v25 = vmax.f32 %v9505_v21, 0.0 }
 0x3c1   :  { %3834 = vst.msk [vmem:[%s9903_s4 + $0x98] sm:$0xff] %vm2375_vm4, %v3770_v1  ;;  %3835 = vst.msk [vmem:[%s9903_s4 + $0xa0] sm:$0xff] %vm2375_vm4, %v3771_v48  ;;  %v3797_v5 = vmax.f32 %v9509_v31, 0.0  ;;  %v3798_v60 = vmax.f32 %v9513_v23, 0.0  ;;  %v11055_v39 = vld [vmem:[#allocation21_spill] sm:$0xff]  ;;  %v11056_v52 = vld [vmem:[#allocation18_spill] sm:$0xff] }
 0x3c2   :  { %3836 = vst.msk [vmem:[%s9903_s4 + $0xa8] sm:$0xff] %vm2375_vm4, %v3772_v56  ;;  %3837 = vst.msk [vmem:[%s9903_s4 + $0xb0] sm:$0xff] %vm2375_vm4, %v3773_v13  ;;  %v3799_v46 = vmax.f32 %v11055_v39, 0.0  ;;  %v3800_v51 = vmax.f32 %v11056_v52, 0.0  ;;  %v11057_v38 = vld [vmem:[#allocation25_spill] sm:$0xff]  ;;  %v11058_v2 = vld [vmem:[#allocation19_spill] sm:$0xff] }
 0x3c3   :  { %3838 = vst.msk [vmem:[%s9903_s4 + $0xb8] sm:$0xff] %vm2375_vm4, %v3774_v54  ;;  %3839 = vst.msk [vmem:[%s9903_s4 + $0xc0] sm:$0xff] %vm2375_vm4, %v3775_v6  ;;  %v3801_v41 = vmax.f32 %v11057_v38, 0.0  ;;  %v3802_v40 = vmax.f32 %v11058_v2, 0.0  ;;  %v11059_v21 = vld [vmem:[#allocation24_spill] sm:$0xff]  ;;  %v11060_v23 = vld [vmem:[#allocation110_spill] sm:$0xff] }
 0x3c4   :  { %3840 = vst.msk [vmem:[%s9903_s4 + $0xc8] sm:$0xff] %vm2375_vm4, %v3776_v8  ;;  %3841 = vst.msk [vmem:[%s9903_s4 + $0xd0] sm:$0xff] %vm2375_vm4, %v3777_v62  ;;  %v3803_v31 = vmax.f32 %v11059_v21, 0.0  ;;  %v3804_v59 = vmax.f32 %v11060_v23, 0.0  ;;  %v3805_v45 = vmax.f32 %v9541_v15, 0.0  ;;  %v3806_v35 = vmax.f32 %v9545_v47, 0.0 }
 0x3c5   :  { %3842 = vst.msk [vmem:[%s9903_s4 + $0xd8] sm:$0xff] %vm2375_vm4, %v3778_v7  ;;  %3843 = vst.msk [vmem:[%s9903_s4 + $0xe0] sm:$0xff] %vm2375_vm4, %v3779_v12  ;;  %v3807_v15 = vmax.f32 %v9549_v33, 0.0  ;;  %v3808_v47 = vmax.f32 %v9553_v49, 0.0  ;;  %v11061_v57 = vld [vmem:[#allocation23_spill] sm:$0xff]  ;;  %v11062_v3 = vld [vmem:[#allocation28_spill] sm:$0xff] }
 0x3c6   :  { %3844 = vst.msk [vmem:[%s9903_s4 + $0xe8] sm:$0xff] %vm2375_vm4, %v3780_v14  ;;  %3845 = vst.msk [vmem:[%s9903_s4 + $0xf0] sm:$0xff] %vm2375_vm4, %v3781_v61  ;;  %v3809_v63 = vmax.f32 %v11061_v57, 0.0  ;;  %v3810_v0 = vmax.f32 %v11062_v3, 0.0  ;;  %v11063_v33 = vld [vmem:[#allocation99_spill] sm:$0xff]  ;;  %v11064_v26 = vld [vmem:[#allocation22_spill] sm:$0xff] }
 0x3c7   :  { %3846 = vst.msk [vmem:[%s9903_s4 + $0xf8] sm:$0xff] %vm2375_vm4, %v3782_v11  ;;  %3847 = vst.msk [vmem:[%s9903_s4 + $0x100] sm:$0xff] %vm2375_vm4, %v3783_v20  ;;  %v3811_v49 = vmax.f32 %v11063_v33, 0.0  ;;  %v3812_v4 = vmax.f32 %v11064_v26, 0.0  ;;  %v11065_v9 = vld [vmem:[#allocation124_spill] sm:$0xff]  ;;  %v3814_v19 = vmax.f32 %v9577_v18, 0.0 }
 0x3c8   :  { %3848 = vst.msk [vmem:[%s9903_s4 + $0x108] sm:$0xff] %vm2375_vm4, %v3784_v58  ;;  %3849 = vst.msk [vmem:[%s9903_s4 + $0x110] sm:$0xff] %vm2375_vm4, %v3785_v16  ;;  %v3813_v50 = vmax.f32 %v11065_v9, 0.0 }
 0x3c9   :  { %3850 = vst.msk [vmem:[%s9903_s4 + $0x118] sm:$0xff] %vm2375_vm4, %v3786_v44  ;;  %3851 = vst.msk [vmem:[%s9903_s4 + $0x120] sm:$0xff] %vm2375_vm4, %v3787_v55 }
 0x3ca   :  { %3852 = vst.msk [vmem:[%s9903_s4 + $0x128] sm:$0xff] %vm2375_vm4, %v3788_v17  ;;  %3853 = vst.msk [vmem:[%s9903_s4 + $0x130] sm:$0xff] %vm2375_vm4, %v3789_v28 }
 0x3cb   :  { %3854 = vst.msk [vmem:[%s9903_s4 + $0x138] sm:$0xff] %vm2375_vm4, %v3790_v34  ;;  %3855 = vst.msk [vmem:[%s9903_s4 + $0x140] sm:$0xff] %vm2375_vm4, %v3791_v42 }
 0x3cc   :  { %3856 = vst.msk [vmem:[%s9903_s4 + $0x148] sm:$0xff] %vm2375_vm4, %v3792_v22  ;;  %3857 = vst.msk [vmem:[%s9903_s4 + $0x150] sm:$0xff] %vm2375_vm4, %v3793_v29 }
 0x3cd   :  { %3858 = vst.msk [vmem:[%s9903_s4 + $0x158] sm:$0xff] %vm2375_vm4, %v3794_v30  ;;  %3859 = vst.msk [vmem:[%s9903_s4 + $0x160] sm:$0xff] %vm2375_vm4, %v3795_v53 }
 0x3ce   :  { %3860 = vst.msk [vmem:[%s9903_s4 + $0x168] sm:$0xff] %vm2375_vm4, %v3796_v25  ;;  %3861 = vst.msk [vmem:[%s9903_s4 + $0x170] sm:$0xff] %vm2375_vm4, %v3797_v5 }
 0x3cf   :  { %3862 = vst.msk [vmem:[%s9903_s4 + $0x178] sm:$0xff] %vm2375_vm4, %v3798_v60  ;;  %3863 = vst.msk [vmem:[%s9903_s4 + $0x180] sm:$0xff] %vm2375_vm4, %v3799_v46 }
 0x3d0   :  { %3864 = vst.msk [vmem:[%s9903_s4 + $0x188] sm:$0xff] %vm2375_vm4, %v3800_v51  ;;  %3865 = vst.msk [vmem:[%s9903_s4 + $0x190] sm:$0xff] %vm2375_vm4, %v3801_v41 }
 0x3d1   :  { %3866 = vst.msk [vmem:[%s9903_s4 + $0x198] sm:$0xff] %vm2375_vm4, %v3802_v40  ;;  %3867 = vst.msk [vmem:[%s9903_s4 + $0x1a0] sm:$0xff] %vm2375_vm4, %v3803_v31 }
 0x3d2   :  { %3868 = vst.msk [vmem:[%s9903_s4 + $0x1a8] sm:$0xff] %vm2375_vm4, %v3804_v59  ;;  %3869 = vst.msk [vmem:[%s9903_s4 + $0x1b0] sm:$0xff] %vm2375_vm4, %v3805_v45 }
 0x3d3   :  { %3870 = vst.msk [vmem:[%s9903_s4 + $0x1b8] sm:$0xff] %vm2375_vm4, %v3806_v35  ;;  %3871 = vst.msk [vmem:[%s9903_s4 + $0x1c0] sm:$0xff] %vm2375_vm4, %v3807_v15 }
 0x3d4   :  { %3872 = vst.msk [vmem:[%s9903_s4 + $0x1c8] sm:$0xff] %vm2375_vm4, %v3808_v47  ;;  %3873 = vst.msk [vmem:[%s9903_s4 + $0x1d0] sm:$0xff] %vm2375_vm4, %v3809_v63 }
 0x3d5   :  { %3874 = vst.msk [vmem:[%s9903_s4 + $0x1d8] sm:$0xff] %vm2375_vm4, %v3810_v0  ;;  %3875 = vst.msk [vmem:[%s9903_s4 + $0x1e0] sm:$0xff] %vm2375_vm4, %v3811_v49 }
 0x3d6   :  { %3876 = vst.msk [vmem:[%s9903_s4 + $0x1e8] sm:$0xff] %vm2375_vm4, %v3812_v4  ;;  %3877 = vst.msk [vmem:[%s9903_s4 + $0x1f0] sm:$0xff] %vm2375_vm4, %v3813_v50 }
 0x3d7   :  { %3878 = vst.msk [vmem:[%s9903_s4 + $0x1f8] sm:$0xff] %vm2375_vm4, %v3814_v19 }

</bundles_post_ra>
